<compile_context>
chip_gen: v6e
topology: v6e:2x2x1
jax: 0.10.0
libtpu: 0.0.40
codegen_flags: <defaults>
</compile_context>

<pallas_src>
import functools

import jax
import jax.numpy as jnp
from jax.experimental import pallas as pl
from jax.experimental.pallas import tpu as pltpu

_BN_EPS = 1e-5

# (cin, cout, stride, relu_after_bn) in forward order.
# NOTE: the reference module applies NO ReLU after bn1.
_CONV_CFG = [
    (3, 64, 1, False),      # conv1 + bn1
    (64, 64, 1, True),      # layer1.0
    (64, 64, 1, True),      # layer1.1
    (64, 128, 2, True),     # layer2.0
    (128, 128, 1, True),    # layer2.1
    (128, 256, 2, True),    # layer3.0
    (256, 256, 1, True),    # layer3.1
    (256, 512, 2, True),    # layer4.0
    (512, 512, 1, True),    # layer4.1
]


def _pad_c(c):
    """Channel padding target: lane-dense (multiple of 128) for big channel
    counts, 8 for the tiny conv1 input."""
    if c <= 8:
        return 8
    return ((c + 127) // 128) * 128


# ----------------------------- Pallas kernels -----------------------------

def _conv_bn_kernel(x_ref, w_ref, scale_ref, shift_ref, o_ref,
                    *, stride, th, wo, relu):
    # x_ref:     (s*s, Hph, Wph, Cin_p)  phase-split padded activation (bf16)
    # w_ref:     (9, Cin_p, tn)          tap-major weights (bf16)
    # scale_ref: (1, tn) f32, shift_ref: (1, tn) f32
    # o_ref:     (1, th*wo, tn)          bf16 output tile (lane-dense)
    s = stride
    tn = o_ref.shape[-1]
    row0 = pl.multiple_of(pl.program_id(1) * th, th)

    acc = jnp.zeros((th * wo, tn), jnp.float32)
    for dy in range(3):
        for dx in range(3):
            phase = (dy % s) * s + (dx % s)
            tap = x_ref[phase,
                        pl.ds(row0 + dy // s, th),
                        pl.ds(dx // s, wo), :]            # (th, wo, Cin_p)
            acc += jnp.dot(tap.reshape(th * wo, tap.shape[-1]),
                           w_ref[dy * 3 + dx],
                           preferred_element_type=jnp.float32)

    y = acc * scale_ref[...] + shift_ref[...]             # eval-mode BN (f32)
    if relu:
        y = jnp.maximum(y, 0.0)
    o_ref[0] = y.astype(o_ref.dtype)


def _head_kernel(x_ref, w_ref, b_ref, o_ref):
    # Global average pool over the spatial axis + Linear, fused.
    pooled = jnp.mean(x_ref[...].astype(jnp.float32), axis=1)   # (N, C)
    y = jnp.dot(pooled, w_ref[...], preferred_element_type=jnp.float32)
    o_ref[...] = y + b_ref[...]


# ------------------------------ JAX wrappers -------------------------------

def _full_spec(shape):
    n = len(shape)
    return pl.BlockSpec(shape, lambda i, _n=n: (0,) * _n)


def conv_bn_relu(x, w9, scale, shift, *, stride, relu):
    """x: (N, H, W, Cin_p) bf16 NHWC; w9: (9, Cin_p, Cout_p) bf16;
    scale/shift: (1, Cout_p) f32.  Returns (N, Ho, Wo, Cout_p) bf16."""
    N, H, W, cin_p = x.shape
    cout_p = w9.shape[-1]
    s = stride
    Ho = (H + 2 - 3) // s + 1
    Wo = (W + 2 - 3) // s + 1

    # Spatial zero-pad (padding=1), then split into s*s phases so that every
    # in-kernel tap read is a contiguous (unstrided) slice.  Total bytes are
    # preserved -- this is NOT an im2col inflation.
    xp = jnp.pad(x, ((0, 0), (1, 1), (1, 1), (0, 0)))
    Hp, Wp = H + 2, W + 2
    Hp2 = -(-Hp // s) * s
    Wp2 = -(-Wp // s) * s
    if (Hp2, Wp2) != (Hp, Wp):
        xp = jnp.pad(xp, ((0, 0), (0, Hp2 - Hp), (0, Wp2 - Wp), (0, 0)))
        Hp, Wp = Hp2, Wp2
    Hph, Wph = Hp // s, Wp // s
    ph = xp.reshape(N, Hph, s, Wph, s, cin_p)
    ph = ph.transpose(0, 2, 4, 1, 3, 5).reshape(N * s * s, Hph, Wph, cin_p)

    # Tiling: whole output rows per step for small images (a divisor of Ho
    # otherwise); lane-dense 128-wide output-channel tiles.
    th = Ho if Ho <= 128 else max(d for d in range(1, 129) if Ho % d == 0)
    tn = 128 if cout_p % 128 == 0 else cout_p
    grid = (N, Ho // th, cout_p // tn)

    kernel = functools.partial(_conv_bn_kernel, stride=s, th=th, wo=Wo, relu=relu)
    flops = 2 * N * Ho * Wo * 9 * cin_p * cout_p
    bytes_accessed = int(ph.size * 2 + w9.size * 2
                         + N * Ho * Wo * cout_p * 2 + scale.size * 8)

    out = pl.pallas_call(
        kernel,
        out_shape=jax.ShapeDtypeStruct((N, Ho * Wo, cout_p), jnp.bfloat16),
        grid=grid,
        in_specs=[
            # Whole (phase-split) image of batch b stays resident across the
            # row/cout axes (index map constant in r, j).
            pl.BlockSpec((s * s, Hph, Wph, cin_p),
                         lambda b, r, j: (b, 0, 0, 0)),
            pl.BlockSpec((9, cin_p, tn), lambda b, r, j: (0, 0, j)),
            pl.BlockSpec((1, tn), lambda b, r, j: (0, j)),
            pl.BlockSpec((1, tn), lambda b, r, j: (0, j)),
        ],
        out_specs=pl.BlockSpec((1, th * Wo, tn), lambda b, r, j: (b, r, j)),
        compiler_params=pltpu.CompilerParams(
            dimension_semantics=("parallel", "parallel", "parallel")),
        cost_estimate=pl.CostEstimate(flops=flops, transcendentals=0,
                                      bytes_accessed=bytes_accessed),
    )(ph, w9, scale, shift)
    return out.reshape(N, Ho, Wo, cout_p)


def avgpool_fc(x, w_fc_t, b_fc):
    """x: (N, Ho, Wo, 512) bf16; w_fc_t: (512, num_classes) f32;
    b_fc: (1, num_classes) f32."""
    N, Ho, Wo, C = x.shape
    num_classes = w_fc_t.shape[-1]
    xr = x.reshape(N, Ho * Wo, C)
    return pl.pallas_call(
        _head_kernel,
        out_shape=jax.ShapeDtypeStruct((N, num_classes), jnp.float32),
        grid=(1,),
        in_specs=[_full_spec((N, Ho * Wo, C)),
                  _full_spec((C, num_classes)),
                  _full_spec((1, num_classes))],
        out_specs=_full_spec((N, num_classes)),
    )(xr, w_fc_t, b_fc)


# --------------------------- parameter construction -------------------------

def init_params(key, num_classes=4):
    params = []
    for (cin, cout, stride, relu) in _CONV_CFG:
        key, kw, kg, kb, km, kv = jax.random.split(key, 6)
        fan_in = cin * 9
        w = jax.random.normal(kw, (cout, cin, 3, 3), jnp.float32) / jnp.sqrt(fan_in)
        gamma = 1.0 + 0.1 * jax.random.normal(kg, (cout,), jnp.float32)
        beta = 0.1 * jax.random.normal(kb, (cout,), jnp.float32)
        mean = 0.1 * jax.random.normal(km, (cout,), jnp.float32)
        var = 1.0 + 0.1 * jax.random.uniform(kv, (cout,), jnp.float32)
        # eval-mode BatchNorm folded into affine scale/shift
        scale = gamma / jnp.sqrt(var + _BN_EPS)
        shift = beta - mean * scale

        cin_p, cout_p = _pad_c(cin), _pad_c(cout)
        w_t = jnp.transpose(w, (2, 3, 1, 0))                        # (3,3,cin,cout)
        w_t = jnp.pad(w_t, ((0, 0), (0, 0),
                            (0, cin_p - cin), (0, cout_p - cout)))  # zero-pad K/Cout
        w9 = w_t.reshape(9, cin_p, cout_p).astype(jnp.bfloat16)
        scale_p = jnp.pad(scale, (0, cout_p - cout)).reshape(1, cout_p)
        shift_p = jnp.pad(shift, (0, cout_p - cout)).reshape(1, cout_p)
        params.append(dict(w9=w9, scale=scale_p, shift=shift_p,
                           stride=stride, relu=relu))
    key, kfw, kfb = jax.random.split(key, 3)
    w_fc = jax.random.normal(kfw, (num_classes, 512), jnp.float32) / jnp.sqrt(512.0)
    b_fc = 0.1 * jax.random.normal(kfb, (num_classes,), jnp.float32)
    return params, jnp.transpose(w_fc), b_fc.reshape(1, num_classes)


def resnet18_forward(x_nchw, conv_params, w_fc_t, b_fc):
    # PyTorch NCHW input -> NHWC bf16 for the TPU kernels.
    x = jnp.transpose(x_nchw, (0, 2, 3, 1)).astype(jnp.bfloat16)
    cin_p = conv_params[0]["w9"].shape[1]
    if cin_p != x.shape[-1]:
        x = jnp.pad(x, ((0, 0), (0, 0), (0, 0), (0, cin_p - x.shape[-1])))
    for p in conv_params:
        x = conv_bn_relu(x, p["w9"], p["scale"], p["shift"],
                         stride=p["stride"], relu=p["relu"])
    return avgpool_fc(x, w_fc_t, b_fc)


# ----------------------------------- main -----------------------------------

if __name__ == "__main__":
    key = jax.random.PRNGKey(0)
    key, kx = jax.random.split(key)
    # Small 3-channel image, NCHW like the PyTorch module expects.
    x = jax.random.normal(kx, (2, 3, 16, 16), jnp.float32)

    conv_params, w_fc_t, b_fc = init_params(key, num_classes=4)

    logits = resnet18_forward(x, conv_params, w_fc_t, b_fc)
    jax.block_until_ready(logits)
    assert logits.shape == (2, 4), logits.shape
    print("KERNEL_OK")
</pallas_src>

<mosaic_0001>
module attributes {stable_mosaic.version = 11 : i64} {
  func.func @_conv_bn_kernel(%arg0: i32, %arg1: i32, %arg2: i32, %arg3: memref<1x18x18x8xbf16, #tpu.memory_space<vmem>>, %arg4: memref<9x8x128xbf16, #tpu.memory_space<vmem>>, %arg5: memref<1x128xf32, #tpu.memory_space<vmem>>, %arg6: memref<1x128xf32, #tpu.memory_space<vmem>>, %arg7: memref<1x256x128xbf16, #tpu.memory_space<vmem>>) attributes {dimension_semantics = [#tpu.dimension_semantics<parallel>, #tpu.dimension_semantics<parallel>, #tpu.dimension_semantics<parallel>], iteration_bounds = array<i64: 2, 1, 1>, scalar_prefetch = 0 : i64, scratch_operands = 0 : i64, tpu.core_type = #tpu.core_type<tc>, window_params = [{transform_indices = @transform_0, window_bounds = array<i64: 1, 18, 18, 8>}, {transform_indices = @transform_1, window_bounds = array<i64: 9, 8, 128>}, {transform_indices = @transform_2, window_bounds = array<i64: 1, 128>}, {transform_indices = @transform_3, window_bounds = array<i64: 1, 128>}, {transform_indices = @transform_4, window_bounds = array<i64: 1, 256, 128>}]} {
    %c16_i32 = arith.constant 16 : i32
    %0 = arith.muli %arg1, %c16_i32 : i32
    %1 = tpu.assume_multiple %0, 16 : i32
    %cst = arith.constant 0.000000e+00 : f32
    %2 = vector.broadcast %cst : f32 to vector<256x128xf32>
    %c0_i32 = arith.constant 0 : i32
    %3 = arith.addi %1, %c0_i32 : i32
    %c0 = arith.constant 0 : index
    %4 = arith.index_cast %3 : i32 to index
    %c0_0 = arith.constant 0 : index
    %c0_1 = arith.constant 0 : index
    %5 = vector.load %arg3[%c0, %4, %c0_0, %c0_1] : memref<1x18x18x8xbf16, #tpu.memory_space<vmem>>, vector<1x16x16x8xbf16>
    %6 = vector.shape_cast %5 : vector<1x16x16x8xbf16> to vector<16x16x8xbf16>
    %7 = vector.shape_cast %6 : vector<16x16x8xbf16> to vector<256x8xbf16>
    %c0_2 = arith.constant 0 : index
    %c0_3 = arith.constant 0 : index
    %c0_4 = arith.constant 0 : index
    %8 = vector.load %arg4[%c0_2, %c0_3, %c0_4] : memref<9x8x128xbf16, #tpu.memory_space<vmem>>, vector<1x8x128xbf16>
    %9 = vector.shape_cast %8 : vector<1x8x128xbf16> to vector<8x128xbf16>
    %cst_5 = arith.constant dense<0.000000e+00> : vector<256x128xf32>
    %10 = tpu.matmul %7, %9, %cst_5 {dimension_numbers = #tpu.dot_dimension_numbers<[1], [0], [0], [1], [0, 0, 1, 1], [], []>} : vector<256x8xbf16>, vector<8x128xbf16>, vector<256x128xf32> -> vector<256x128xf32>
    %11 = arith.addf %2, %10 : vector<256x128xf32>
    %c0_i32_6 = arith.constant 0 : i32
    %12 = arith.addi %1, %c0_i32_6 : i32
    %c0_7 = arith.constant 0 : index
    %13 = arith.index_cast %12 : i32 to index
    %c1 = arith.constant 1 : index
    %c0_8 = arith.constant 0 : index
    %14 = vector.load %arg3[%c0_7, %13, %c1, %c0_8] : memref<1x18x18x8xbf16, #tpu.memory_space<vmem>>, vector<1x16x16x8xbf16>
    %15 = vector.shape_cast %14 : vector<1x16x16x8xbf16> to vector<16x16x8xbf16>
    %16 = vector.shape_cast %15 : vector<16x16x8xbf16> to vector<256x8xbf16>
    %c1_9 = arith.constant 1 : index
    %c0_10 = arith.constant 0 : index
    %c0_11 = arith.constant 0 : index
    %17 = vector.load %arg4[%c1_9, %c0_10, %c0_11] : memref<9x8x128xbf16, #tpu.memory_space<vmem>>, vector<1x8x128xbf16>
    %18 = vector.shape_cast %17 : vector<1x8x128xbf16> to vector<8x128xbf16>
    %cst_12 = arith.constant dense<0.000000e+00> : vector<256x128xf32>
    %19 = tpu.matmul %16, %18, %cst_12 {dimension_numbers = #tpu.dot_dimension_numbers<[1], [0], [0], [1], [0, 0, 1, 1], [], []>} : vector<256x8xbf16>, vector<8x128xbf16>, vector<256x128xf32> -> vector<256x128xf32>
    %20 = arith.addf %11, %19 : vector<256x128xf32>
    %c0_i32_13 = arith.constant 0 : i32
    %21 = arith.addi %1, %c0_i32_13 : i32
    %c0_14 = arith.constant 0 : index
    %22 = arith.index_cast %21 : i32 to index
    %c2 = arith.constant 2 : index
    %c0_15 = arith.constant 0 : index
    %23 = vector.load %arg3[%c0_14, %22, %c2, %c0_15] : memref<1x18x18x8xbf16, #tpu.memory_space<vmem>>, vector<1x16x16x8xbf16>
    %24 = vector.shape_cast %23 : vector<1x16x16x8xbf16> to vector<16x16x8xbf16>
    %25 = vector.shape_cast %24 : vector<16x16x8xbf16> to vector<256x8xbf16>
    %c2_16 = arith.constant 2 : index
    %c0_17 = arith.constant 0 : index
    %c0_18 = arith.constant 0 : index
    %26 = vector.load %arg4[%c2_16, %c0_17, %c0_18] : memref<9x8x128xbf16, #tpu.memory_space<vmem>>, vector<1x8x128xbf16>
    %27 = vector.shape_cast %26 : vector<1x8x128xbf16> to vector<8x128xbf16>
    %cst_19 = arith.constant dense<0.000000e+00> : vector<256x128xf32>
    %28 = tpu.matmul %25, %27, %cst_19 {dimension_numbers = #tpu.dot_dimension_numbers<[1], [0], [0], [1], [0, 0, 1, 1], [], []>} : vector<256x8xbf16>, vector<8x128xbf16>, vector<256x128xf32> -> vector<256x128xf32>
    %29 = arith.addf %20, %28 : vector<256x128xf32>
    %c1_i32 = arith.constant 1 : i32
    %30 = arith.addi %1, %c1_i32 : i32
    %c0_20 = arith.constant 0 : index
    %31 = arith.index_cast %30 : i32 to index
    %c0_21 = arith.constant 0 : index
    %c0_22 = arith.constant 0 : index
    %32 = vector.load %arg3[%c0_20, %31, %c0_21, %c0_22] : memref<1x18x18x8xbf16, #tpu.memory_space<vmem>>, vector<1x16x16x8xbf16>
    %33 = vector.shape_cast %32 : vector<1x16x16x8xbf16> to vector<16x16x8xbf16>
    %34 = vector.shape_cast %33 : vector<16x16x8xbf16> to vector<256x8xbf16>
    %c3 = arith.constant 3 : index
    %c0_23 = arith.constant 0 : index
    %c0_24 = arith.constant 0 : index
    %35 = vector.load %arg4[%c3, %c0_23, %c0_24] : memref<9x8x128xbf16, #tpu.memory_space<vmem>>, vector<1x8x128xbf16>
    %36 = vector.shape_cast %35 : vector<1x8x128xbf16> to vector<8x128xbf16>
    %cst_25 = arith.constant dense<0.000000e+00> : vector<256x128xf32>
    %37 = tpu.matmul %34, %36, %cst_25 {dimension_numbers = #tpu.dot_dimension_numbers<[1], [0], [0], [1], [0, 0, 1, 1], [], []>} : vector<256x8xbf16>, vector<8x128xbf16>, vector<256x128xf32> -> vector<256x128xf32>
    %38 = arith.addf %29, %37 : vector<256x128xf32>
    %c1_i32_26 = arith.constant 1 : i32
    %39 = arith.addi %1, %c1_i32_26 : i32
    %c0_27 = arith.constant 0 : index
    %40 = arith.index_cast %39 : i32 to index
    %c1_28 = arith.constant 1 : index
    %c0_29 = arith.constant 0 : index
    %41 = vector.load %arg3[%c0_27, %40, %c1_28, %c0_29] : memref<1x18x18x8xbf16, #tpu.memory_space<vmem>>, vector<1x16x16x8xbf16>
    %42 = vector.shape_cast %41 : vector<1x16x16x8xbf16> to vector<16x16x8xbf16>
    %43 = vector.shape_cast %42 : vector<16x16x8xbf16> to vector<256x8xbf16>
    %c4 = arith.constant 4 : index
    %c0_30 = arith.constant 0 : index
    %c0_31 = arith.constant 0 : index
    %44 = vector.load %arg4[%c4, %c0_30, %c0_31] : memref<9x8x128xbf16, #tpu.memory_space<vmem>>, vector<1x8x128xbf16>
    %45 = vector.shape_cast %44 : vector<1x8x128xbf16> to vector<8x128xbf16>
    %cst_32 = arith.constant dense<0.000000e+00> : vector<256x128xf32>
    %46 = tpu.matmul %43, %45, %cst_32 {dimension_numbers = #tpu.dot_dimension_numbers<[1], [0], [0], [1], [0, 0, 1, 1], [], []>} : vector<256x8xbf16>, vector<8x128xbf16>, vector<256x128xf32> -> vector<256x128xf32>
    %47 = arith.addf %38, %46 : vector<256x128xf32>
    %c1_i32_33 = arith.constant 1 : i32
    %48 = arith.addi %1, %c1_i32_33 : i32
    %c0_34 = arith.constant 0 : index
    %49 = arith.index_cast %48 : i32 to index
    %c2_35 = arith.constant 2 : index
    %c0_36 = arith.constant 0 : index
    %50 = vector.load %arg3[%c0_34, %49, %c2_35, %c0_36] : memref<1x18x18x8xbf16, #tpu.memory_space<vmem>>, vector<1x16x16x8xbf16>
    %51 = vector.shape_cast %50 : vector<1x16x16x8xbf16> to vector<16x16x8xbf16>
    %52 = vector.shape_cast %51 : vector<16x16x8xbf16> to vector<256x8xbf16>
    %c5 = arith.constant 5 : index
    %c0_37 = arith.constant 0 : index
    %c0_38 = arith.constant 0 : index
    %53 = vector.load %arg4[%c5, %c0_37, %c0_38] : memref<9x8x128xbf16, #tpu.memory_space<vmem>>, vector<1x8x128xbf16>
    %54 = vector.shape_cast %53 : vector<1x8x128xbf16> to vector<8x128xbf16>
    %cst_39 = arith.constant dense<0.000000e+00> : vector<256x128xf32>
    %55 = tpu.matmul %52, %54, %cst_39 {dimension_numbers = #tpu.dot_dimension_numbers<[1], [0], [0], [1], [0, 0, 1, 1], [], []>} : vector<256x8xbf16>, vector<8x128xbf16>, vector<256x128xf32> -> vector<256x128xf32>
    %56 = arith.addf %47, %55 : vector<256x128xf32>
    %c2_i32 = arith.constant 2 : i32
    %57 = arith.addi %1, %c2_i32 : i32
    %c0_40 = arith.constant 0 : index
    %58 = arith.index_cast %57 : i32 to index
    %c0_41 = arith.constant 0 : index
    %c0_42 = arith.constant 0 : index
    %59 = vector.load %arg3[%c0_40, %58, %c0_41, %c0_42] : memref<1x18x18x8xbf16, #tpu.memory_space<vmem>>, vector<1x16x16x8xbf16>
    %60 = vector.shape_cast %59 : vector<1x16x16x8xbf16> to vector<16x16x8xbf16>
    %61 = vector.shape_cast %60 : vector<16x16x8xbf16> to vector<256x8xbf16>
    %c6 = arith.constant 6 : index
    %c0_43 = arith.constant 0 : index
    %c0_44 = arith.constant 0 : index
    %62 = vector.load %arg4[%c6, %c0_43, %c0_44] : memref<9x8x128xbf16, #tpu.memory_space<vmem>>, vector<1x8x128xbf16>
    %63 = vector.shape_cast %62 : vector<1x8x128xbf16> to vector<8x128xbf16>
    %cst_45 = arith.constant dense<0.000000e+00> : vector<256x128xf32>
    %64 = tpu.matmul %61, %63, %cst_45 {dimension_numbers = #tpu.dot_dimension_numbers<[1], [0], [0], [1], [0, 0, 1, 1], [], []>} : vector<256x8xbf16>, vector<8x128xbf16>, vector<256x128xf32> -> vector<256x128xf32>
    %65 = arith.addf %56, %64 : vector<256x128xf32>
    %c2_i32_46 = arith.constant 2 : i32
    %66 = arith.addi %1, %c2_i32_46 : i32
    %c0_47 = arith.constant 0 : index
    %67 = arith.index_cast %66 : i32 to index
    %c1_48 = arith.constant 1 : index
    %c0_49 = arith.constant 0 : index
    %68 = vector.load %arg3[%c0_47, %67, %c1_48, %c0_49] : memref<1x18x18x8xbf16, #tpu.memory_space<vmem>>, vector<1x16x16x8xbf16>
    %69 = vector.shape_cast %68 : vector<1x16x16x8xbf16> to vector<16x16x8xbf16>
    %70 = vector.shape_cast %69 : vector<16x16x8xbf16> to vector<256x8xbf16>
    %c7 = arith.constant 7 : index
    %c0_50 = arith.constant 0 : index
    %c0_51 = arith.constant 0 : index
    %71 = vector.load %arg4[%c7, %c0_50, %c0_51] : memref<9x8x128xbf16, #tpu.memory_space<vmem>>, vector<1x8x128xbf16>
    %72 = vector.shape_cast %71 : vector<1x8x128xbf16> to vector<8x128xbf16>
    %cst_52 = arith.constant dense<0.000000e+00> : vector<256x128xf32>
    %73 = tpu.matmul %70, %72, %cst_52 {dimension_numbers = #tpu.dot_dimension_numbers<[1], [0], [0], [1], [0, 0, 1, 1], [], []>} : vector<256x8xbf16>, vector<8x128xbf16>, vector<256x128xf32> -> vector<256x128xf32>
    %74 = arith.addf %65, %73 : vector<256x128xf32>
    %c2_i32_53 = arith.constant 2 : i32
    %75 = arith.addi %1, %c2_i32_53 : i32
    %c0_54 = arith.constant 0 : index
    %76 = arith.index_cast %75 : i32 to index
    %c2_55 = arith.constant 2 : index
    %c0_56 = arith.constant 0 : index
    %77 = vector.load %arg3[%c0_54, %76, %c2_55, %c0_56] : memref<1x18x18x8xbf16, #tpu.memory_space<vmem>>, vector<1x16x16x8xbf16>
    %78 = vector.shape_cast %77 : vector<1x16x16x8xbf16> to vector<16x16x8xbf16>
    %79 = vector.shape_cast %78 : vector<16x16x8xbf16> to vector<256x8xbf16>
    %c8 = arith.constant 8 : index
    %c0_57 = arith.constant 0 : index
    %c0_58 = arith.constant 0 : index
    %80 = vector.load %arg4[%c8, %c0_57, %c0_58] : memref<9x8x128xbf16, #tpu.memory_space<vmem>>, vector<1x8x128xbf16>
    %81 = vector.shape_cast %80 : vector<1x8x128xbf16> to vector<8x128xbf16>
    %cst_59 = arith.constant dense<0.000000e+00> : vector<256x128xf32>
    %82 = tpu.matmul %79, %81, %cst_59 {dimension_numbers = #tpu.dot_dimension_numbers<[1], [0], [0], [1], [0, 0, 1, 1], [], []>} : vector<256x8xbf16>, vector<8x128xbf16>, vector<256x128xf32> -> vector<256x128xf32>
    %83 = arith.addf %74, %82 : vector<256x128xf32>
    %c0_60 = arith.constant 0 : index
    %c0_61 = arith.constant 0 : index
    %84 = vector.load %arg5[%c0_60, %c0_61] : memref<1x128xf32, #tpu.memory_space<vmem>>, vector<1x128xf32>
    %85 = vector.broadcast %84 : vector<1x128xf32> to vector<256x128xf32>
    %86 = arith.mulf %83, %85 : vector<256x128xf32>
    %c0_62 = arith.constant 0 : index
    %c0_63 = arith.constant 0 : index
    %87 = vector.load %arg6[%c0_62, %c0_63] : memref<1x128xf32, #tpu.memory_space<vmem>>, vector<1x128xf32>
    %88 = vector.broadcast %87 : vector<1x128xf32> to vector<256x128xf32>
    %89 = arith.addf %86, %88 : vector<256x128xf32>
    %90 = arith.truncf %89 : vector<256x128xf32> to vector<256x128xbf16>
    %c0_64 = arith.constant 0 : index
    %c0_65 = arith.constant 0 : index
    %c0_66 = arith.constant 0 : index
    %91 = vector.load %arg7[%c0_64, %c0_65, %c0_66] : memref<1x256x128xbf16, #tpu.memory_space<vmem>>, vector<1x256x128xbf16>
    %92 = vector.shape_cast %91 : vector<1x256x128xbf16> to vector<256x128xbf16>
    %93 = vector.shape_cast %90 : vector<256x128xbf16> to vector<1x256x128xbf16>
    tpu.vector_store %arg7[%c0_64, %c0_65, %c0_66], %93 {strides = array<i32>} : memref<1x256x128xbf16, #tpu.memory_space<vmem>>, vector<1x256x128xbf16>,
    return
  }
  func.func @transform_0(%arg0: i32, %arg1: i32, %arg2: i32) -> (i32, i32, i32, i32) {
    %c0_i32 = arith.constant 0 : i32
    %c0_i32_0 = arith.constant 0 : i32
    %c0_i32_1 = arith.constant 0 : i32
    %c0_i32_2 = arith.constant 0 : i32
    return %arg0, %c0_i32, %c0_i32_0, %c0_i32_1 : i32, i32, i32, i32
  }
  func.func @transform_1(%arg0: i32, %arg1: i32, %arg2: i32) -> (i32, i32, i32) {
    %c0_i32 = arith.constant 0 : i32
    %c0_i32_0 = arith.constant 0 : i32
    %c0_i32_1 = arith.constant 0 : i32
    return %c0_i32, %c0_i32_0, %arg2 : i32, i32, i32
  }
  func.func @transform_2(%arg0: i32, %arg1: i32, %arg2: i32) -> (i32, i32) {
    %c0_i32 = arith.constant 0 : i32
    %c0_i32_0 = arith.constant 0 : i32
    return %c0_i32, %arg2 : i32, i32
  }
  func.func @transform_3(%arg0: i32, %arg1: i32, %arg2: i32) -> (i32, i32) {
    %c0_i32 = arith.constant 0 : i32
    %c0_i32_0 = arith.constant 0 : i32
    return %c0_i32, %arg2 : i32, i32
  }
  func.func @transform_4(%arg0: i32, %arg1: i32, %arg2: i32) -> (i32, i32, i32) {
    %c0_i32 = arith.constant 0 : i32
    return %arg0, %arg1, %arg2 : i32, i32, i32
  }
}

</mosaic_0001>

<bundles_post_ra>
// kernel: tpu_custom_call.1
= control target key start
LH: loop header
LB: loop body
LE: loop exit
PB: predicated region body
PF: predicated region fallthrough
CT: control target
= control target key end

     0   :  { %9 = vsyncpa [#allocation3], 0  ;;  %s9339_s0 = inlined_call_operand.vmem [shape: bf16[2,18,18,8], index: 0, kind: input, shape index: {}]   ;;  %s9340_s1 = inlined_call_operand.vmem [shape: bf16[9,8,128], index: 1, kind: input, shape index: {}]   ;;  %s9341_s2 = inlined_call_operand.vmem [shape: f32[1,128], index: 2, kind: input, shape index: {}]   ;;  %s9342_s3 = inlined_call_operand.vmem [shape: f32[1,128], index: 3, kind: input, shape index: {}]   ;;  %s9343_s4 = inlined_call_operand.hbm [shape: bf16[2,256,128], index: 4, kind: output, shape index: {}]  }
   0x1   :  { %11 = vsyncpa [#allocation3 + $0x1], 0  ;;  %s6614_s15 = smov 0   ;;  %s6616_s16 = smov 0  }
   0x2   :  { %s6618_s17 = smov 0   ;;  %s6620_s18 = smov 0  }
   0x3   :  { %s6622_s19 = smov 0   ;;  %s6624_s20 = smov 0  }
   0x4 LB: > { %s5216_s21 = sadd.s32 4294967295, %s6584_s20   ;;  %s5217_s22 = sadd.s32 4294967294, %s6584_s20   ;;  %s6584_s20 = sphi %s6624_s20, %s17_s20   ;;  %s6580_s19 = sphi %s6622_s19, %s9568_s19   ;;  %s6576_s18 = sphi %s6620_s18, %s9567_s18   ;;  %s6572_s17 = sphi %s6618_s17, %s9566_s17   ;;  %s6568_s16 = sphi %s6616_s16, %s9565_s16   ;;  %s6564_s15 = sphi %s6614_s15, %s9564_s15  }
   0x5   : > { %s36_s23 = sadd.s32 1, %s6580_s19  ;;  %s151_s24 = sadd.s32 1, %s6572_s17 }
   0x6   : > { %p38_p0 = scmp.ge.s32.totalorder %s36_s23, 2  ;;  %p161_p1 = scmp.ne.s32.totalorder %s6572_s17, %s6568_s16 }
   0x7   : > { %p162_p2 = scmp.eq.s32.totalorder %s5216_s21, 1  ;;  %p167_p3 = scmp.ne.s32.totalorder %s6568_s16, %s6564_s15 }
   0x8   : > { %s9570_s23 = smov (%p38_p0, %s36_s23), 0  ;;  %p168_p5 = scmp.eq.s32.totalorder %s5217_s22, 1 }
   0x9   : > { %p6654_p4 = por %p162_p2, %p161_p1  ;;  %s144_s26 = ssub.s32 %s6580_s19, %s9570_s23 }
   0xa   : > { %p5223_p6 = scmp.ge.s32.totalorder %s6584_s20, 1  ;;  %p149_p7 = scmp.eq.s32.totalorder %s144_s26, 0 }
   0xb   : > { %p6661_p8 = por %p168_p5, %p167_p3  ;;  %p213_p9 = scmp.lt.s32.totalorder %s6584_s20, 3 }
   0xc   : > { %s6667_s28 = scalar_select %p149_p7, %s6572_s17, %s151_s24  }
   0xd   : > { %p214_p10 = pnand %p5223_p6, %p213_p9 }
   0xf   : > { %217 = sbr.rel (%p214_p10) target bundleno = 581 (0x245), region = 36 }
  0x14   : > { %v5226_v0 = vld [vmem:[%s9340_s1 + $0x4] sm:$0xf]  ;;  %vm805_vm0 = vcmask 1043456   ;;  %p249_p11 = scmp.lt.s32.totalorder %s6576_s18, 1  ;;  %v302_v2 = vld [vmem:[%s9340_s1] sm:$0xf] }
  0x15   : > { %6391 = vmatprep.subr.msk.bf16.mxu1 %vm805_vm0, %v5226_v0  ;;  %6390 = vmatprep.subr.msk.bf16.mxu0 %vm805_vm0, %v5226_v0  ;;  %v807_v1 = vsel %vm805_vm0, %v5226_v0, 0  ;;  %v5307_v3 = vld [vmem:[%s9340_s1 + $0x8] sm:$0xf]  ;;  %vm319_vm1 = vsmask.f32 3328  ;;  %v6691_v4 = vsel %vm805_vm0, %v302_v2, 0 }
  0x16   : > { %6389 = vmatpush3.bf16.msra.mxu1 %v807_v1  ;;  %6083 = vmatpush3.bf16.msra.mxu0 %v807_v1  ;;  %s250_s7 = scalar_select %p249_p11, %s6576_s18, 1  ;;  %vm320_vm2 = vsmask.f32 7440  ;;  %vm756_vm3 = vcmask 64512   ;;  %v6717_v16 = vsel %vm805_vm0, %v5307_v3, 0  ;;  %vm1310_vm5 = vcmask 1042432  }
  0x17   : > { %6392 = vmatprep.subr.msk.bf16.mxu1 %vm805_vm0, %v302_v2  ;;  %6393 = vmatprep.subr.msk.bf16.mxu0 %vm805_vm0, %v5307_v3  ;;  %vm6732_vm4 = vmor %vm319_vm1, %vm320_vm2  ;;  %vm1311_vm6 = vcmask 1046532   ;;  %s246_s12 = sand.u32 1, %s6568_s16   ;;  %s5833_s24 = sshll.u32 %s6576_s18, 11 }
  0x18   : > { %s6400_s10 = smul.u32 216, %s250_s7  ;;  %vm7018_vm7 = vmor %vm1310_vm5, %vm1311_vm6  ;;  %s5224_s21 = sshll.u32 %s246_s12, 7 }
  0x19   : > { %s9163_s22 = scalar_lea.vmem [#allocation2], %s5224_s21  ;;  %s9286_s5 = scalar_lea.hbm %s9343_s4, %s5833_s24 }
  0x1a   : > { %s6688_s13 = scalar_lea.vmem %s9339_s0, %s6400_s10  ;;  %s5090_s26 = sshll.u32 %s9163_s22, 4  ;;  %s9288_s26 = int_to_ptr.vmem [resolvable:$true] %s5090_s26 }
  0x1b   : > { %v6694_v5 = vld [vmem:[%s6688_s13] sm:$0xf]  ;;  %v6697_v6 = vld [vmem:[%s6688_s13 + $0x4] sm:$0xf]  ;;  %v6700_v7 = vld [vmem:[%s6688_s13 + $0x8] sm:$0x1] }
  0x1c   : > { %v323_v8 = vshrl.u32 %v6694_v5, 16  ;;  %v326_v9 = vshll.u32 %v6694_v5, 16  ;;  %v332_v10 = vshll.u32 %v6697_v6, 16  ;;  %v336_v11 = vshrl.u32 %v6697_v6, 16  ;;  %v6707_v12 = vld [vmem:[%s6688_s13 + $0x60] sm:$0xf] }
  0x1d   : > { %v342_v13 = vshll.u32 %v6700_v7, 16  ;;  %v6711_v14 = vld [vmem:[%s6688_s13 + $0x64] sm:$0xf]  ;;  %v6714_v15 = vld [vmem:[%s6688_s13 + $0x68] sm:$0x1]  ;;  %v515_v22 = vshrl.u32 %v6707_v12, 16 }
  0x1e   : > { %v325_v17 = vrot.slane %v323_v8, 4  ;;  %v328_v18 = vrot.slane %v326_v9, 5  ;;  %v334_v19 = vrot.slane %v332_v10, 5  ;;  %v338_v20 = vrot.slane %v336_v11, 4  ;;  %v6725_v29 = vld [vmem:[%s6688_s13 + $0xc] sm:$0xf] }
  0x1f   : > { %v344_v21 = vrot.slane %v342_v13, 5  ;;  %v518_v23 = vshll.u32 %v6707_v12, 16  ;;  %v524_v24 = vshll.u32 %v6711_v14, 16  ;;  %v528_v27 = vshrl.u32 %v6711_v14, 16  ;;  %v6728_v30 = vld [vmem:[%s6688_s13 + $0x10] sm:$0xf] }
  0x20   : > { %v329_v25 = vor.u32 %v328_v18, %v325_v17  ;;  %v339_v26 = vor.u32 %v338_v20, %v334_v19  ;;  %v534_v28 = vshll.u32 %v6714_v15, 16  ;;  %v517_v33 = vrot.slane %v515_v22, 4  ;;  %v6738_v41 = vld [vmem:[%s6688_s13 + $0x14] sm:$0x1]  ;;  %v6749_v53 = vld [vmem:[%s6688_s13 + $0x6c] sm:$0xf] }
  0x21   : > { %v520_v34 = vrot.slane %v518_v23, 5  ;;  %v526_v35 = vrot.slane %v524_v24, 5  ;;  %v530_v38 = vrot.slane %v528_v27, 4  ;;  %v347_v42 = vshrl.u32 %v6725_v29, 16  ;;  %v6753_v58 = vld [vmem:[%s6688_s13 + $0x70] sm:$0xf] }
  0x22   : > { %v330_v36 = vrot.slane %v329_v25, 4  ;;  %v340_v37 = vrot.slane %v339_v26, 4  ;;  %v536_v39 = vrot.slane %v534_v28, 5  ;;  %v350_v43 = vshll.u32 %v6725_v29, 16  ;;  %v6761_v63 = vld [vmem:[%s6688_s13 + $0x74] sm:$0x1] }
  0x23   : > { %v521_v40 = vor.u32 %v520_v34, %v517_v33  ;;  %v356_v44 = vshll.u32 %v6728_v30, 16  ;;  %v531_v47 = vor.u32 %v530_v38, %v526_v35  ;;  %v360_v48 = vshrl.u32 %v6728_v30, 16  ;;  %v6767_v8 = vld [vmem:[%s6688_s13 + $0x18] sm:$0xf]  ;;  %v6780_v25 = vld [vmem:[%s6688_s13 + $0x20] sm:$0x1] }
  0x24   : > { %v335_v45 = vsel %vm6732_vm4, %v330_v36, %v334_v19  ;;  %v345_v46 = vsel %vm6732_vm4, %v340_v37, %v344_v21  ;;  %v349_v51 = vrot.slane %v347_v42, 4  ;;  %v352_v52 = vrot.slane %v350_v43, 5  ;;  %v6774_v21 = vld [vmem:[%s6688_s13 + $0x1c] sm:$0xf]  ;;  %s9294_s18 = scalar_lea.sflag [#allocation3], %s246_s12  ;;  %s6508_s6 = scalar_lea.vmem %s9288_s26, 2048 }
  0x25   : > { %v5227_v49 = vcombine.low %v335_v45, %v345_v46  ;;  %v522_v50 = vrot.slane %v521_v40, 4  ;;  %v532_v54 = vrot.slane %v531_v47, 4  ;;  %v358_v55 = vrot.slane %v356_v44, 5  ;;  %v6793_v40 = vld [vmem:[%s9340_s1 + $0x10] sm:$0xf]  ;;  %p6509_p12 = scmp.ne.s32.totalorder %s9288_s26, %s6508_s6  ;;  %s6586_s7 = smov [#allocation2]  }
  0x26   : > { %v362_v56 = vrot.slane %v360_v48, 4  ;;  %v366_v57 = vshll.u32 %v6738_v41, 16  ;;  %v353_v60 = vor.u32 %v352_v52, %v349_v51  ;;  %v539_v3 = vshrl.u32 %v6749_v53, 16  ;;  %v6798_v46 = vld [vmem:[%s6688_s13 + $0x7c] sm:$0xf]  ;;  %s6512_s8 = sshll.u32 %s6586_s7, 4  ;;  %s6513_s8 = int_to_ptr.vmem [resolvable:$false] %s6512_s8 }
  0x27   : > { %6084 = vmatprep.mubr.msk.bf16.mxu0 %vm756_vm3, %v5227_v49  ;;  %v527_v59 = vsel %vm6732_vm4, %v522_v50, %v526_v35  ;;  %v537_v0 = vsel %vm6732_vm4, %v532_v54, %v536_v39  ;;  %v542_v11 = vshll.u32 %v6749_v53, 16  ;;  %v548_v13 = vshll.u32 %v6753_v58, 16  ;;  %v6787_v35 = vld [vmem:[%s6688_s13 + $0x78] sm:$0xf]  ;;  %p6510_p13 = pnand %p6509_p12, %p6654_p4  ;;  %s6514_s9 = scalar_lea.vmem %s6513_s8, 4096 }
  0x28   : > { %v363_v1 = vor.u32 %v362_v56, %v358_v55  ;;  %v368_v2 = vrot.slane %v366_v57, 5  ;;  %v5235_v9 = vcombine.low %v527_v59, %v537_v0  ;;  %v354_v10 = vrot.slane %v353_v60, 4  ;;  %v6805_v56 = vld [vmem:[%s6688_s13 + $0x80] sm:$0x1]  ;;  %p6515_p1 = scmp.lt.s32.totalorder %s9288_s26, %s6513_s8  ;;  %p6516_p2 = scmp.lt.s32.totalorder %s6514_s9, %s6508_s6 }
  0x29   : > { %v541_v18 = vrot.slane %v539_v3, 4  ;;  %v552_v19 = vshrl.u32 %v6753_v58, 16  ;;  %v558_v20 = vshll.u32 %v6761_v63, 16  ;;  %v544_v23 = vrot.slane %v542_v11, 5  ;;  %9381 = vst [vmem:[#allocation5_spill] sm:$0xff] %v6805_v56  ;;  %p6511_p0 = pneg %p6510_p13 }
  0x2a   : > { %v364_v17 = vrot.slane %v363_v1, 4  ;;  %6100 = vmatprep.mubr.msk.bf16.mxu1 %vm756_vm3, %v5235_v9  ;;  %v359_v22 = vsel %vm6732_vm4, %v354_v10, %v358_v55  ;;  %v550_v24 = vrot.slane %v548_v13, 5  ;;  %v371_v26 = vshrl.u32 %v6767_v8, 16  ;;  %v6811_v1 = vld [vmem:[%s6688_s13 + $0x24] sm:$0xf]  ;;  %p6517_p3 = por %p6516_p2, %p6515_p1 }
  0x2b   : > { %v554_v28 = vrot.slane %v552_v19, 4  ;;  %v560_v33 = vrot.slane %v558_v20, 5  ;;  %v374_v34 = vshll.u32 %v6767_v8, 16  ;;  %v545_v37 = vor.u32 %v544_v23, %v541_v18  ;;  %v6819_v10 = vld [vmem:[%s6688_s13 + $0x28] sm:$0xf] }
  0x2c   : > { %v369_v27 = vsel %vm6732_vm4, %v364_v17, %v368_v2  ;;  %v373_v38 = vrot.slane %v371_v26, 4  ;;  %v380_v39 = vshll.u32 %v6774_v21, 16  ;;  %v384_v44 = vshrl.u32 %v6774_v21, 16  ;;  %v6825_v19 = vld [vmem:[%s9340_s1 + $0xc] sm:$0xf]  ;;  %p6518_p5 = pnand %p6517_p3, %p6511_p0 }
  0x2d   : > { %v5228_v36 = vcombine.low %v359_v22, %v369_v27  ;;  %v555_v42 = vor.u32 %v554_v28, %v550_v24  ;;  %v376_v43 = vrot.slane %v374_v34, 5  ;;  %v390_v45 = vshll.u32 %v6780_v25, 16 }
  0x2e   : > { %v546_v47 = vrot.slane %v545_v37, 4  ;;  %v382_v48 = vrot.slane %v380_v39, 5  ;;  %v563_v49 = vshrl.u32 %v6787_v35, 16  ;;  %v566_v50 = vshll.u32 %v6787_v35, 16 }
  0x2f   : > { %6085 = vmatmul.mubr.msk.bf16.vlgmr.msra.gmra.mxu0 %vm756_vm3, %v5228_v36  ;;  %v556_v51 = vrot.slane %v555_v42, 4  ;;  %v377_v52 = vor.u32 %v376_v43, %v373_v38  ;;  %v386_v54 = vrot.slane %v384_v44, 4  ;;  %v392_v55 = vrot.slane %v390_v45, 5  ;;  %v6837_v36 = vld [vmem:[%s6688_s13 + $0x84] sm:$0xf] }
  0x30   : > { %6151 = vmatpush3.bf16.msra.mxu0 %v6717_v16  ;;  %v551_v57 = vsel %vm6732_vm4, %v546_v47, %v550_v24  ;;  %v565_v59 = vrot.slane %v563_v49, 4  ;;  %v568_v60 = vrot.slane %v566_v50, 5  ;;  %v572_v0 = vshll.u32 %v6798_v46, 16  ;;  %v6830_v24 = vld [vmem:[%s6688_s13 + $0x2c] sm:$0x1] }
  0x31   : > { %6395 = vmatprep.subr.msk.bf16.mxu0 %vm805_vm0, %v6793_v40  ;;  %v561_v16 = vsel %vm6732_vm4, %v556_v51, %v560_v33  ;;  %v378_v2 = vrot.slane %v377_v52, 4  ;;  %v387_v3 = vor.u32 %v386_v54, %v382_v48  ;;  %v576_v9 = vshrl.u32 %v6798_v46, 16  ;;  %v6844_v43 = vld [vmem:[%s6688_s13 + $0x88] sm:$0xf]  ;;  %v6852_v51 = vld [vmem:[%s6688_s13 + $0x8c] sm:$0x1] }
  0x32   : > { %v5236_v11 = vcombine.low %v551_v57, %v561_v16  ;;  %v569_v13 = vor.u32 %v568_v60, %v565_v59  ;;  %v574_v17 = vrot.slane %v572_v0, 5  ;;  %v582_v18 = vshll.u32 %v6805_v56, 16  ;;  %9382 = vst [vmem:[#allocation6_spill] sm:$0xff] %v6852_v51  ;;  %v6860_v60 = vld [vmem:[%s6688_s13 + $0x30] sm:$0xf] }
  0x33   : > { %v383_v20 = vsel %vm6732_vm4, %v378_v2, %v382_v48  ;;  %v388_v22 = vrot.slane %v387_v3, 4  ;;  %v578_v23 = vrot.slane %v576_v9, 4  ;;  %v395_v26 = vshrl.u32 %v6811_v1, 16  ;;  %v6865_v9 = vld [vmem:[%s6688_s13 + $0x34] sm:$0xf] }
  0x34   : > { %6101 = vmatmul.mubr.msk.bf16.vlgmr.msra.gmra.mxu1 %vm756_vm3, %v5236_v11  ;;  %v570_v27 = vrot.slane %v569_v13, 4  ;;  %v584_v28 = vrot.slane %v582_v18, 5  ;;  %v398_v33 = vshll.u32 %v6811_v1, 16  ;;  %v404_v34 = vshll.u32 %v6819_v10, 16 }
  0x35   : > { %6117 = vmatpush3.bf16.msra.mxu1 %v6691_v4  ;;  %v393_v37 = vsel %vm6732_vm4, %v388_v22, %v392_v55  ;;  %v579_v38 = vor.u32 %v578_v23, %v574_v17  ;;  %v397_v39 = vrot.slane %v395_v26, 4  ;;  %v408_v42 = vshrl.u32 %v6819_v10, 16 }
  0x36   : > { %v5229_v44 = vcombine.low %v383_v20, %v393_v37  ;;  %v575_v45 = vsel %vm6732_vm4, %v570_v27, %v574_v17  ;;  %v400_v47 = vrot.slane %v398_v33, 5  ;;  %v406_v48 = vrot.slane %v404_v34, 5  ;;  %6394 = vmatprep.subr.msk.bf16.mxu1 %vm805_vm0, %v6825_v19  ;;  %v6873_v33 = vld [vmem:[%s6688_s13 + $0x38] sm:$0x1] }
  0x37   : > { %v580_v4 = vrot.slane %v579_v38, 4  ;;  %v410_v49 = vrot.slane %v408_v42, 4  ;;  %v414_v50 = vshll.u32 %v6830_v24, 16  ;;  %v587_v52 = vshrl.u32 %v6837_v36, 16  ;;  %v6878_v38 = vld [vmem:[%s6688_s13 + $0x90] sm:$0xf] }
  0x38   : > { %6088 = vmatprep.mubr.msk.bf16.mxu0 %vm756_vm3, %v5229_v44  ;;  %v401_v54 = vor.u32 %v400_v47, %v397_v39  ;;  %v590_v55 = vshll.u32 %v6837_v36, 16  ;;  %v596_v57 = vshll.u32 %v6844_v43, 16  ;;  %v600_v59 = vshrl.u32 %v6844_v43, 16  ;;  %9383 = vst [vmem:[#allocation7_spill] sm:$0xff] %v6878_v38  ;;  %v6883_v47 = vld [vmem:[%s6688_s13 + $0x94] sm:$0xf] }
  0x39   : > { %v585_v0 = vsel %vm6732_vm4, %v580_v4, %v584_v28  ;;  %v411_v16 = vor.u32 %v410_v49, %v406_v48  ;;  %v416_v2 = vrot.slane %v414_v50, 5  ;;  %v589_v3 = vrot.slane %v587_v52, 4  ;;  %9384 = vst [vmem:[#allocation8_spill] sm:$0xff] %v6883_v47 }
  0x3a   : > { %v5237_v11 = vcombine.low %v575_v45, %v585_v0  ;;  %v402_v13 = vrot.slane %v401_v54, 4  ;;  %v592_v17 = vrot.slane %v590_v55, 5  ;;  %v598_v18 = vrot.slane %v596_v57, 5 }
  0x3b   : > { %v412_v20 = vrot.slane %v411_v16, 4  ;;  %v602_v22 = vrot.slane %v600_v59, 4  ;;  %v606_v23 = vshll.u32 %v6852_v51, 16  ;;  %v419_v26 = vshrl.u32 %v6860_v60, 16  ;;  %v6892_v16 = vld [vmem:[%s6688_s13 + $0x98] sm:$0x1] }
  0x3c   : > { %6104 = vmatprep.mubr.msk.bf16.mxu1 %vm756_vm3, %v5237_v11  ;;  %v407_v27 = vsel %vm6732_vm4, %v402_v13, %v406_v48  ;;  %v593_v28 = vor.u32 %v592_v17, %v589_v3  ;;  %v422_v34 = vshll.u32 %v6860_v60, 16  ;;  %v428_v37 = vshll.u32 %v6865_v9, 16  ;;  %9385 = vst [vmem:[#allocation9_spill] sm:$0xff] %v6892_v16  ;;  %v6897_v11 = vld [vmem:[%s6688_s13 + $0x3c] sm:$0xf] }
  0x3d   : > { %v417_v39 = vsel %vm6732_vm4, %v412_v20, %v416_v2  ;;  %v603_v42 = vor.u32 %v602_v22, %v598_v18  ;;  %v608_v44 = vrot.slane %v606_v23, 5  ;;  %v421_v45 = vrot.slane %v419_v26, 4  ;;  %v6902_v23 = vld [vmem:[%s6688_s13 + $0x40] sm:$0xf]  ;;  %v1263_v51 = vld [vmem:[%s6688_s13 + $0xc] sm:$0xe] }
  0x3e   : > { %v5230_v48 = vcombine.low %v407_v27, %v417_v39  ;;  %v594_v4 = vrot.slane %v593_v28, 4  ;;  %v424_v49 = vrot.slane %v422_v34, 5  ;;  %v430_v50 = vrot.slane %v428_v37, 5 }
  0x3f   : > { %v604_v52 = vrot.slane %v603_v42, 4  ;;  %v432_v54 = vshrl.u32 %v6865_v9, 16  ;;  %v438_v55 = vshll.u32 %v6873_v33, 16  ;;  %v611_v57 = vshrl.u32 %v6878_v38, 16 }
  0x40   : > { %6089 = vmatmul.mubr.msk.bf16.gmra.mxu0 %vm756_vm3, %v5230_v48  ;;  %v599_v59 = vsel %vm6732_vm4, %v594_v4, %v598_v18  ;;  %v425_v0 = vor.u32 %v424_v49, %v421_v45  ;;  %v614_v2 = vshll.u32 %v6878_v38, 16  ;;  %v620_v3 = vshll.u32 %v6883_v47, 16  ;;  %v6911_v48 = vld [vmem:[%s6688_s13 + $0x44] sm:$0x1] }
  0x41   : > { %v609_v13 = vsel %vm6732_vm4, %v604_v52, %v608_v44  ;;  %v434_v17 = vrot.slane %v432_v54, 4  ;;  %v440_v20 = vrot.slane %v438_v55, 5  ;;  %v613_v22 = vrot.slane %v611_v57, 4  ;;  %v6916_v52 = vld [vmem:[%s6688_s13 + $0x9c] sm:$0xf] }
  0x42   : > { %v5238_v18 = vcombine.low %v599_v59, %v609_v13  ;;  %v426_v26 = vrot.slane %v425_v0, 4  ;;  %v616_v27 = vrot.slane %v614_v2, 5  ;;  %v622_v28 = vrot.slane %v620_v3, 5  ;;  %9386 = vst [vmem:[#allocation10_spill] sm:$0xff] %v6916_v52  ;;  %v6920_v13 = vld [vmem:[%s6688_s13 + $0xa0] sm:$0xf] }
  0x43   : > { %v435_v34 = vor.u32 %v434_v17, %v430_v50  ;;  %v624_v37 = vshrl.u32 %v6883_v47, 16  ;;  %v630_v39 = vshll.u32 %v6892_v16, 16  ;;  %v443_v42 = vshrl.u32 %v6897_v11, 16  ;;  %9387 = vst [vmem:[#allocation11_spill] sm:$0xff] %v6920_v13 }
  0x44   : > { %6105 = vmatmul.mubr.msk.bf16.gmra.mxu1 %vm756_vm3, %v5238_v18  ;;  %v431_v44 = vsel %vm6732_vm4, %v426_v26, %v430_v50  ;;  %v617_v45 = vor.u32 %v616_v27, %v613_v22  ;;  %v446_v4 = vshll.u32 %v6897_v11, 16  ;;  %v452_v49 = vshll.u32 %v6902_v23, 16  ;;  %v6926_v26 = vld [vmem:[%s6688_s13 + $0xa4] sm:$0x1] }
  0x45   : > { %v436_v54 = vrot.slane %v435_v34, 4  ;;  %v626_v55 = vrot.slane %v624_v37, 4  ;;  %v632_v57 = vrot.slane %v630_v39, 5  ;;  %v445_v59 = vrot.slane %v443_v42, 4  ;;  %9388 = vst [vmem:[#allocation12_spill] sm:$0xff] %v6926_v26 }
  0x46   : > { %v618_v0 = vrot.slane %v617_v45, 4  ;;  %v448_v2 = vrot.slane %v446_v4, 5  ;;  %v454_v3 = vrot.slane %v452_v49, 5  ;;  %v456_v50 = vshrl.u32 %v6902_v23, 16  ;;  %v6930_v34 = vld [vmem:[%s6688_s13 + $0x48] sm:$0xf] }
  0x47   : > { %v441_v17 = vsel %vm6732_vm4, %v436_v54, %v440_v20  ;;  %v627_v22 = vor.u32 %v626_v55, %v622_v28  ;;  %v462_v18 = vshll.u32 %v6911_v48, 16  ;;  %v635_v27 = vshrl.u32 %v6916_v52, 16 }
  0x48   : > { %v5231_v37 = vcombine.low %v431_v44, %v441_v17  ;;  %v623_v39 = vsel %vm6732_vm4, %v618_v0, %v622_v28  ;;  %v449_v42 = vor.u32 %v448_v2, %v445_v59  ;;  %v458_v45 = vrot.slane %v456_v50, 4  ;;  %v6939_v17 = vld [vmem:[%s6688_s13 + $0x4c] sm:$0xf]  ;;  %v6945_v2 = vld [vmem:[%s6688_s13 + $0x50] sm:$0x1] }
  0x49   : > { %v628_v4 = vrot.slane %v627_v22, 4  ;;  %v464_v49 = vrot.slane %v462_v18, 5  ;;  %v637_v20 = vrot.slane %v635_v27, 4  ;;  %v638_v54 = vshll.u32 %v6916_v52, 16 }
  0x4a   : > { %6092 = vmatprep.mubr.msk.bf16.mxu0 %vm756_vm3, %v5231_v37  ;;  %v450_v55 = vrot.slane %v449_v42, 4  ;;  %v459_v62 = vor.u32 %v458_v45, %v454_v3  ;;  %v644_v32 = vshll.u32 %v6920_v13, 16  ;;  %v648_v44 = vshrl.u32 %v6920_v13, 16  ;;  %v6951_v42 = vld [vmem:[%s6688_s13 + $0xa8] sm:$0xf] }
  0x4b   : > { %v633_v28 = vsel %vm6732_vm4, %v628_v4, %v632_v57  ;;  %v640_v59 = vrot.slane %v638_v54, 5  ;;  %v654_v0 = vshll.u32 %v6926_v26, 16  ;;  %v467_v50 = vshrl.u32 %v6930_v34, 16  ;;  %9389 = vst [vmem:[#allocation13_spill] sm:$0xff] %v6951_v42 }
  0x4c   : > { %v5239_v22 = vcombine.low %v623_v39, %v633_v28  ;;  %v455_v18 = vsel %vm6732_vm4, %v450_v55, %v454_v3  ;;  %v460_v27 = vrot.slane %v459_v62, 4  ;;  %v646_v37 = vrot.slane %v644_v32, 5 }
  0x4d   : > { %v641_v45 = vor.u32 %v640_v59, %v637_v20  ;;  %v650_v61 = vrot.slane %v648_v44, 4  ;;  %v656_v57 = vrot.slane %v654_v0, 5  ;;  %v469_v4 = vrot.slane %v467_v50, 4  ;;  %v6961_v44 = vld [vmem:[%s6688_s13 + $0xac] sm:$0xf] }
  0x4e   : > { %6108 = vmatprep.mubr.msk.bf16.mxu1 %vm756_vm3, %v5239_v22  ;;  %v465_v54 = vsel %vm6732_vm4, %v460_v27, %v464_v49  ;;  %v470_v39 = vshll.u32 %v6930_v34, 16  ;;  %v476_v28 = vshll.u32 %v6939_v17, 16  ;;  %v480_v62 = vshrl.u32 %v6939_v17, 16  ;;  %9390 = vst [vmem:[#allocation14_spill] sm:$0xff] %v6961_v44  ;;  %v6964_v22 = vld [vmem:[%s6688_s13 + $0xb0] sm:$0x1] }
  0x4f   : > { %v5232_v3 = vcombine.low %v455_v18, %v465_v54  ;;  %v642_v32 = vrot.slane %v641_v45, 4  ;;  %v651_v55 = vor.u32 %v650_v61, %v646_v37  ;;  %v486_v20 = vshll.u32 %v6945_v2, 16  ;;  %9391 = vst [vmem:[#allocation15_spill] sm:$0xff] %v6964_v22 }
  0x50   : > { %v472_v59 = vrot.slane %v470_v39, 5  ;;  %v478_v0 = vrot.slane %v476_v28, 5  ;;  %v482_v50 = vrot.slane %v480_v62, 4  ;;  %v659_v49 = vshrl.u32 %v6951_v42, 16  ;;  %v6973_v62 = vld [vmem:[%s6688_s13 + $0x54] sm:$0xf] }
  0x51   : > { %6093 = vmatmul.mubr.msk.bf16.gmra.mxu0 %vm756_vm3, %v5232_v3  ;;  %v647_v18 = vsel %vm6732_vm4, %v642_v32, %v646_v37  ;;  %v652_v27 = vrot.slane %v651_v55, 4  ;;  %v488_v61 = vrot.slane %v486_v20, 5  ;;  %v662_v45 = vshll.u32 %v6951_v42, 16  ;;  %v6980_v55 = vld [vmem:[%s6688_s13 + $0x58] sm:$0xf] }
  0x52   : > { %v473_v54 = vor.u32 %v472_v59, %v469_v4  ;;  %v483_v56 = vor.u32 %v482_v50, %v478_v0  ;;  %v661_v39 = vrot.slane %v659_v49, 4  ;;  %v668_v28 = vshll.u32 %v6961_v44, 16  ;;  %v6983_v49 = vld [vmem:[%s6688_s13 + $0x5c] sm:$0x1] }
  0x53   : > { %v657_v3 = vsel %vm6732_vm4, %v652_v27, %v656_v57  ;;  %v664_v26 = vrot.slane %v662_v45, 5  ;;  %v672_v37 = vshrl.u32 %v6961_v44, 16  ;;  %v678_v32 = vshll.u32 %v6964_v22, 16  ;;  %v1262_v22 = vld [vmem:[%s6688_s13] sm:$0xe] }
  0x54   : > { %v5240_v4 = vcombine.low %v647_v18, %v657_v3  ;;  %v474_v20 = vrot.slane %v473_v54, 4  ;;  %v484_v59 = vrot.slane %v483_v56, 4  ;;  %v670_v50 = vrot.slane %v668_v28, 5  ;;  %v6994_v54 = vld [vmem:[%s6688_s13 + $0xb4] sm:$0xf] }
  0x55   : > { %v665_v42 = vor.u32 %v664_v26, %v661_v39  ;;  %v674_v52 = vrot.slane %v672_v37, 4  ;;  %v680_v13 = vrot.slane %v678_v32, 5  ;;  %v491_v57 = vshrl.u32 %v6973_v62, 16  ;;  %9392 = vst [vmem:[#allocation16_spill] sm:$0xff] %v6994_v54  ;;  %v6997_v37 = vld [vmem:[%s6688_s13 + $0xb8] sm:$0xf] }
  0x56   : > { %6109 = vmatmul.mubr.msk.bf16.gmra.mxu1 %vm756_vm3, %v5240_v4  ;;  %v479_v27 = vsel %vm6732_vm4, %v474_v20, %v478_v0  ;;  %v489_v18 = vsel %vm6732_vm4, %v484_v59, %v488_v61  ;;  %v494_v56 = vshll.u32 %v6973_v62, 16  ;;  %v500_v45 = vshll.u32 %v6980_v55, 16  ;;  %v7002_v61 = vld [vmem:[%s6688_s13 + $0xbc] sm:$0x1] }
  0x57   : > { %v5233_v26 = vcombine.low %v479_v27, %v489_v18  ;;  %v666_v39 = vrot.slane %v665_v42, 4  ;;  %v675_v28 = vor.u32 %v674_v52, %v670_v50  ;;  %v493_v3 = vrot.slane %v491_v57, 4 }
  0x58   : > { %v496_v32 = vrot.slane %v494_v56, 5  ;;  %v502_v4 = vrot.slane %v500_v45, 5  ;;  %v504_v0 = vshrl.u32 %v6980_v55, 16  ;;  %v510_v20 = vshll.u32 %v6983_v49, 16 }
  0x59   : > { %6096 = vmatprep.mubr.msk.bf16.mxu0 %vm756_vm3, %v5233_v26  ;;  %v671_v59 = vsel %vm6732_vm4, %v666_v39, %v670_v50  ;;  %v676_v27 = vrot.slane %v675_v28, 4  ;;  %v683_v52 = vshrl.u32 %v6994_v54, 16  ;;  %v686_v42 = vshll.u32 %v6994_v54, 16 }
  0x5a   : > { %v497_v57 = vor.u32 %v496_v32, %v493_v3  ;;  %v506_v18 = vrot.slane %v504_v0, 4  ;;  %v512_v56 = vrot.slane %v510_v20, 5  ;;  %v692_v45 = vshll.u32 %v6997_v37, 16 }
  0x5b   : > { %v681_v44 = vsel %vm6732_vm4, %v676_v27, %v680_v13  ;;  %v685_v16 = vrot.slane %v683_v52, 4  ;;  %v688_v26 = vrot.slane %v686_v42, 5  ;;  %v696_v38 = vshrl.u32 %v6997_v37, 16 }
  0x5c   : > { %v5241_v50 = vcombine.low %v671_v59, %v681_v44  ;;  %v498_v39 = vrot.slane %v497_v57, 4  ;;  %v507_v28 = vor.u32 %v506_v18, %v502_v4  ;;  %v694_v47 = vrot.slane %v692_v45, 5  ;;  %v1264_v57 = vld [vmem:[%s6688_s13 + $0x18] sm:$0xe] }
  0x5d   : > { %v689_v54 = vor.u32 %v688_v26, %v685_v16  ;;  %v698_v3 = vrot.slane %v696_v38, 4  ;;  %v702_v32 = vshll.u32 %v7002_v61, 16  ;;  %v5291_v13 = vrot.slane %v1262_v22, 9 }
  0x5e   : > { %6112 = vmatprep.mubr.msk.bf16.mxu1 %vm756_vm3, %v5241_v50  ;;  %v503_v44 = vsel %vm6732_vm4, %v498_v39, %v502_v4  ;;  %v508_v20 = vrot.slane %v507_v28, 4  ;;  %v1315_v59 = vrot.slane %v6697_v6, 5  ;;  %v5260_v38 = vcombine.low %v6725_v29, %v6728_v30 }
  0x5f   : > { %v690_v16 = vrot.slane %v689_v54, 4  ;;  %v699_v27 = vor.u32 %v698_v3, %v694_v47  ;;  %v704_v52 = vrot.slane %v702_v32, 5  ;;  %v5292_v42 = vrot.slane %v1263_v51, 9 }
  0x60   : > { %v513_v18 = vsel %vm6732_vm4, %v508_v20, %v512_v56  ;;  %v1316_v22 = vsel %vm7018_vm7, %v5291_v13, %v1315_v59  ;;  %v1317_v45 = vrot.slane %v1315_v59, 4  ;;  %v9395_v4 = vrot.slane %v6728_v30, 5 }
  0x61   : > { %v5234_v50 = vcombine.low %v503_v44, %v513_v18  ;;  %v695_v54 = vsel %vm6732_vm4, %v690_v16, %v694_v47  ;;  %v700_v39 = vrot.slane %v699_v27, 4  ;;  %v5259_v51 = vcombine.low %v6694_v5, %v6697_v6  ;;  %v1265_v27 = vld [vmem:[%s6688_s13 + $0x24] sm:$0xe] }
  0x62   : > { %v1324_v26 = vrot.slane %v9395_v4, 4  ;;  %v9396_v28 = vrot.slane %v6700_v7, 5  ;;  %v9397_v3 = vmov %v9395_v4  ;;  %v5261_v13 = vcombine.low %v6767_v8, %v6774_v21  ;;  %v1267_v4 = vld [vmem:[%s6688_s13 + $0x3c] sm:$0xe] }
  0x63   : > { %v1323_v32 = vsel %vm7018_vm7, %v5292_v42, %v9397_v3  ;;  %v5293_v44 = vrot.slane %v1264_v57, 9  ;;  %6097 = vmatmul.mubr.msk.bf16.gmra.mxu0 %vm756_vm3, %v5234_v50  ;;  %v705_v47 = vsel %vm6732_vm4, %v700_v39, %v704_v52  ;;  %v9398_v6 = vrot.slane %v6738_v41, 5  ;;  %v1266_v42 = vld [vmem:[%s6688_s13 + $0x30] sm:$0xe]  ;;  %v1268_v39 = vld [vmem:[%s6688_s13 + $0x48] sm:$0xe] }
  0x64   : > { %v1319_v56 = vsel %vm7018_vm7, %v1317_v45, %v9396_v28  ;;  %v1329_v20 = vrot.slane %v6774_v21, 5  ;;  %v5242_v59 = vcombine.low %v695_v54, %v705_v47  ;;  %v1332_v16 = vrot.slane %v6780_v25, 5  ;;  %v1269_v47 = vld [vmem:[%s6688_s13 + $0x54] sm:$0xe]  ;;  %v7313_v21 = vld [vmem:[%s6688_s13 + $0x2c] sm:$0x1] }
  0x65   : > { %v5308_v5 = vcombine.low %v1316_v22, %v1319_v56  ;;  %v1326_v7 = vsel %vm7018_vm7, %v1324_v26, %v9398_v6  ;;  %v1886_v52 = vsel %vm805_vm0, %v6825_v19, 0  ;;  %v1336_v18 = vrot.slane %v6819_v10, 5 }
  0x66   : > { %v1330_v41 = vsel %vm7018_vm7, %v5293_v44, %v1329_v20  ;;  %v1331_v57 = vrot.slane %v1329_v20, 4  ;;  %6113 = vmatmul.mubr.msk.bf16.gmra.mxu1 %vm756_vm3, %v5242_v59  ;;  %v5309_v22 = vcombine.low %v1323_v32, %v1326_v7  ;;  %v2612_v25 = vsel %vm805_vm0, %v6793_v40, 0 }
  0x67   : > { %6152 = vmatprep.mubr.msk.bf16.mxu0 %vm756_vm3, %v5308_v5  ;;  %v1343_v45 = vrot.slane %v6865_v9, 5  ;;  %6118 = vmatprep.mubr.msk.bf16.mxu1 %vm756_vm3, %v5259_v51  ;;  %v5294_v26 = vrot.slane %v1265_v27, 9  ;;  %v1339_v50 = vrot.slane %v6830_v24, 5  ;;  %v5295_v54 = vrot.slane %v1266_v42, 9  ;;  %v7085_v24 = vld [vmem:[%s9340_s1 + $0x18] sm:$0xf] }
  0x68   : > { %v1333_v19 = vsel %vm7018_vm7, %v1331_v57, %v1332_v16  ;;  %v1338_v56 = vrot.slane %v1336_v18, 4  ;;  %v1346_v32 = vrot.slane %v6873_v33, 5  ;;  %v5296_v44 = vrot.slane %v1267_v4, 9 }
  0x69   : > { %v5310_v28 = vcombine.low %v1330_v41, %v1333_v19  ;;  %v1345_v3 = vrot.slane %v1343_v45, 4  ;;  %v1350_v40 = vrot.slane %v6902_v23, 5  ;;  %v1374_v5 = vrot.slane %v6714_v15, 5 }
  0x6a   : > { %v1353_v51 = vrot.slane %v6911_v48, 5  ;;  %v5297_v6 = vrot.slane %v1268_v39, 9  ;;  %v1357_v7 = vrot.slane %v6939_v17, 5  ;;  %v5262_v33 = vcombine.low %v6811_v1, %v6819_v10  ;;  %v1270_v1 = vld [vmem:[%s6688_s13 + $0x60] sm:$0xe] }
  0x6b   : > { %6153 = vmatmul.mubr.msk.bf16.vlgmr.msra.gmra.mxu0 %vm756_vm3, %v5309_v22  ;;  %v1337_v20 = vsel %vm7018_vm7, %v5294_v26, %v1336_v18  ;;  %v1352_v59 = vrot.slane %v1350_v40, 4  ;;  %v1360_v16 = vrot.slane %v6945_v2, 5  ;;  %v1340_v48 = vsel %vm7018_vm7, %v1338_v56, %v1339_v50  ;;  %v7113_v22 = vld [vmem:[%s9340_s1 + $0x14] sm:$0xf]  ;;  %v7138_v50 = vld [vmem:[%s6688_s13 + $0x6c] sm:$0xe] }
  0x6c   : > { %6219 = vmatpush3.bf16.msra.mxu0 %v2612_v25  ;;  %6156 = vmatprep.mubr.msk.bf16.mxu0 %vm756_vm3, %v5310_v28  ;;  %v1344_v27 = vsel %vm7018_vm7, %v5295_v54, %v1343_v45  ;;  %v1347_v42 = vsel %vm7018_vm7, %v1345_v3, %v1346_v32  ;;  %v1359_v41 = vrot.slane %v1357_v7, 4  ;;  %v7103_v10 = vsel %vm7018_vm7, %v5296_v44, %v1350_v40  ;;  %v1273_v39 = vld [vmem:[%s6688_s13 + $0x84] sm:$0xe]  ;;  %v7167_v44 = vld [vmem:[%s6688_s13 + $0x78] sm:$0xe] }
  0x6d   : > { %v7107_v2 = vsel %vm7018_vm7, %v5297_v6, %v1357_v7  ;;  %v5298_v57 = vrot.slane %v1269_v47, 9  ;;  %v1364_v18 = vrot.slane %v6980_v55, 5  ;;  %6397 = vmatprep.subr.msk.bf16.mxu0 %vm805_vm0, %v7085_v24  ;;  %v7123_v25 = vsel %vm7018_vm7, %v1352_v59, %v1353_v51  ;;  %v1274_v40 = vld [vmem:[%s6688_s13 + $0x90] sm:$0xe] }
  0x6e   : > { %6119 = vmatmul.mubr.msk.bf16.vlgmr.msra.gmra.mxu1 %vm756_vm3, %v5260_v38  ;;  %v7127_v45 = vsel %vm7018_vm7, %v1359_v41, %v1360_v16  ;;  %v1367_v4 = vrot.slane %v6983_v49, 5  ;;  %v1371_v19 = vrot.slane %v6711_v14, 5  ;;  %v5311_v29 = vcombine.low %v1337_v20, %v1340_v48  ;;  %v9399_v48 = vld [vmem:[#allocation6_spill] sm:$0xff] }
  0x6f   : > { %6185 = vmatpush3.bf16.msra.mxu1 %v1886_v52  ;;  %6122 = vmatprep.mubr.msk.bf16.mxu1 %vm756_vm3, %v5261_v13  ;;  %v5263_v30 = vcombine.low %v6860_v60, %v6865_v9  ;;  %v1366_v38 = vrot.slane %v1364_v18, 4  ;;  %v5299_v26 = vrot.slane %v1270_v1, 9  ;;  %v5312_v49 = vcombine.low %v1344_v27, %v1347_v42  ;;  %v1275_v42 = vld [vmem:[%s6688_s13 + $0x9c] sm:$0xe] }
  0x70   : > { %v5264_v52 = vcombine.low %v6897_v11, %v6902_v23  ;;  %v5265_v8 = vcombine.low %v6930_v34, %v6939_v17  ;;  %6396 = vmatprep.subr.msk.bf16.mxu1 %vm805_vm0, %v7113_v22  ;;  %v5313_v60 = vcombine.low %v7103_v10, %v7123_v25  ;;  %v5314_v9 = vcombine.low %v7107_v2, %v7127_v45  ;;  %v9400_v10 = vld [vmem:[#allocation8_spill] sm:$0xff]  ;;  %v9401_v2 = vld [vmem:[#allocation7_spill] sm:$0xff] }
  0x71   : > { %v1373_v54 = vrot.slane %v1371_v19, 4  ;;  %v7157_v28 = vsel %vm7018_vm7, %v5298_v57, %v1364_v18  ;;  %v7161_v56 = vsel %vm7018_vm7, %v1366_v38, %v1367_v4  ;;  %v5300_v32 = vrot.slane %v7138_v50, 9  ;;  %v1276_v18 = vld [vmem:[%s6688_s13 + $0xa8] sm:$0xe]  ;;  %v9403_v38 = vld [vmem:[#allocation11_spill] sm:$0xff] }
  0x72   : > { %v7173_v47 = vsel %vm7018_vm7, %v5299_v26, %v1371_v19  ;;  %v1378_v51 = vrot.slane %v6753_v58, 5  ;;  %v1381_v6 = vrot.slane %v6761_v63, 5  ;;  %v5302_v59 = vrot.slane %v1273_v39, 9  ;;  %v9402_v19 = vld [vmem:[#allocation9_spill] sm:$0xff]  ;;  %v9404_v26 = vld [vmem:[#allocation10_spill] sm:$0xff] }
  0x73   : > { %6157 = vmatmul.mubr.msk.bf16.gmra.mxu0 %vm756_vm3, %v5311_v29  ;;  %v1392_v16 = vrot.slane %v6844_v43, 5  ;;  %v1395_v27 = vrot.slane %v9399_v48, 5  ;;  %v5315_v41 = vcombine.low %v7157_v28, %v7161_v56  ;;  %v7191_v63 = vsel %vm7018_vm7, %v1373_v54, %v1374_v5  ;;  %v9406_v48 = vld [vmem:[#allocation14_spill] sm:$0xff] }
  0x74   : > { %6160 = vmatprep.mubr.msk.bf16.mxu0 %vm756_vm3, %v5312_v49  ;;  %v5301_v1 = vrot.slane %v7167_v44, 9  ;;  %v5303_v4 = vrot.slane %v1274_v40, 9  ;;  %v1399_v15 = vrot.slane %v9400_v10, 5  ;;  %v1380_v5 = vrot.slane %v1378_v51, 4  ;;  %v5405_v57 = vld [vmem:[%s6688_s13 + $0xc] sm:$0xf] }
  0x75   : > { %v7200_v25 = vsel %vm7018_vm7, %v5302_v59, %v1392_v16  ;;  %v1394_v45 = vrot.slane %v1392_v16, 4  ;;  %v1402_v29 = vrot.slane %v9402_v19, 5  ;;  %v5304_v49 = vrot.slane %v1275_v42, 9  ;;  %v9405_v59 = vld [vmem:[#allocation12_spill] sm:$0xff]  ;;  %v9407_v42 = vld [vmem:[#allocation13_spill] sm:$0xff] }
  0x76   : > { %6123 = vmatmul.mubr.msk.bf16.gmra.mxu1 %vm756_vm3, %v5262_v33  ;;  %v1385_v33 = vrot.slane %v6798_v46, 5  ;;  %v7214_v39 = vsel %vm7018_vm7, %v5303_v4, %v1399_v15  ;;  %v1401_v44 = vrot.slane %v1399_v15, 4  ;;  %v1406_v40 = vrot.slane %v9403_v38, 5  ;;  %v9408_v15 = vld [vmem:[#allocation15_spill] sm:$0xff] }
  0x77   : > { %6126 = vmatprep.mubr.msk.bf16.mxu1 %vm756_vm3, %v5263_v30  ;;  %v7210_v54 = vsel %vm7018_vm7, %v1394_v45, %v1395_v27  ;;  %v1409_v16 = vrot.slane %v9405_v59, 5  ;;  %v5305_v45 = vrot.slane %v1276_v18, 9  ;;  %v1413_v4 = vrot.slane %v9406_v48, 5 }
  0x78   : > { %v7224_v27 = vsel %vm7018_vm7, %v1401_v44, %v1402_v29  ;;  %v1416_v50 = vrot.slane %v9408_v15, 5  ;;  %v7234_v19 = vsel %vm7018_vm7, %v5304_v49, %v1406_v40  ;;  %v1408_v7 = vrot.slane %v1406_v40, 4  ;;  %v9409_v29 = vld [vmem:[#allocation16_spill] sm:$0xff]  ;;  %v9410_v15 = vld [vmem:[#allocation5_spill] sm:$0xff]  ;;  %v7249_v49 = vld [vmem:[%s6688_s13 + $0x10] sm:$0xf] }
  0x79   : > { %v7241_v18 = vsel %vm7018_vm7, %v5300_v32, %v1378_v51  ;;  %v7246_v59 = vsel %vm7018_vm7, %v5305_v45, %v1413_v4  ;;  %v1415_v30 = vrot.slane %v1413_v4, 4  ;;  %v5408_v40 = vld [vmem:[%s6688_s13 + $0x18] sm:$0xf]  ;;  %v1387_v20 = vrot.slane %v1385_v33, 4 }
  0x7a   : > { %v2130_v44 = vshrl.u32 %v5405_v57, 16  ;;  %v2133_v32 = vshll.u32 %v5405_v57, 16  ;;  %v5316_v51 = vcombine.low %v7173_v47, %v7191_v63  ;;  %v7264_v45 = vsel %vm7018_vm7, %v1380_v5, %v1381_v6  ;;  %v1277_v57 = vld [vmem:[%s6688_s13 + $0xb4] sm:$0xe]  ;;  %v7285_v47 = vld [vmem:[%s6688_s13 + $0x14] sm:$0x1] }
  0x7b   : > { %6161 = vmatmul.mubr.msk.bf16.gmra.mxu0 %vm756_vm3, %v5313_v60  ;;  %v1388_v60 = vrot.slane %v9410_v15, 5  ;;  %v7279_v11 = vsel %vm7018_vm7, %v5301_v1, %v1385_v33  ;;  %v2139_v6 = vshll.u32 %v7249_v49, 16  ;;  %v5409_v63 = vld [vmem:[%s6688_s13 + $0x1c] sm:$0xf]  ;;  %v2143_v17 = vshrl.u32 %v7249_v49, 16 }
  0x7c   : > { %6164 = vmatprep.mubr.msk.bf16.mxu0 %vm756_vm3, %v5314_v9  ;;  %v7254_v9 = vsel %vm7018_vm7, %v1408_v7, %v1409_v16  ;;  %v7270_v7 = vsel %vm7018_vm7, %v1415_v30, %v1416_v50  ;;  %v2132_v5 = vrot.slane %v2130_v44, 4  ;;  %v2135_v34 = vrot.slane %v2133_v32, 5  ;;  %v5411_v15 = vld [vmem:[%s6688_s13 + $0x24] sm:$0xf]  ;;  %v7298_v44 = vld [vmem:[%s6688_s13 + $0x28] sm:$0xf] }
  0x7d   : > { %v2154_v50 = vshrl.u32 %v5408_v40, 16  ;;  %v1389_v1 = vsel %vm7018_vm7, %v1387_v20, %v1388_v60  ;;  %v5306_v33 = vrot.slane %v1277_v57, 9  ;;  %v7293_v30 = vrot.slane %v2139_v6, 5 }
  0x7e   : > { %6127 = vmatmul.mubr.msk.bf16.gmra.mxu1 %vm756_vm3, %v5264_v52  ;;  %v1420_v52 = vrot.slane %v6997_v37, 5  ;;  %v2157_v16 = vshll.u32 %v5408_v40, 16  ;;  %v1423_v23 = vrot.slane %v7002_v61, 5  ;;  %v2145_v4 = vrot.slane %v2143_v17, 4 }
  0x7f   : > { %6130 = vmatprep.mubr.msk.bf16.mxu1 %vm756_vm3, %v5265_v8  ;;  %v5410_v8 = vld [vmem:[%s6688_s13 + $0x20] sm:$0x1]  ;;  %v2156_v3 = vrot.slane %v2154_v50, 4  ;;  %v2163_v13 = vshll.u32 %v5409_v63, 16  ;;  %v2149_v20 = vshll.u32 %v7285_v47, 16  ;;  %v2167_v57 = vshrl.u32 %v5409_v63, 16 }
  0x80   : > { %v1422_v32 = vrot.slane %v1420_v52, 4  ;;  %v2159_v60 = vrot.slane %v2157_v16, 5  ;;  %v5317_v61 = vcombine.low %v7241_v18, %v7264_v45  ;;  %v5318_v40 = vcombine.low %v7279_v11, %v1389_v1 }
  0x81   : > { %v2136_v6 = vor.u32 %v2135_v34, %v2132_v5  ;;  %v7309_v17 = vrot.slane %v2163_v13, 5  ;;  %v2146_v28 = vor.u32 %v2145_v4, %v7293_v30  ;;  %v2173_v50 = vshll.u32 %v5410_v8, 16  ;;  %v7336_v5 = vld [vmem:[%s6688_s13 + $0x34] sm:$0xf] }
  0x82   : > { %v2160_v56 = vor.u32 %v2159_v60, %v2156_v3  ;;  %v7321_v18 = vsel %vm7018_vm7, %v5306_v33, %v1420_v52  ;;  %v2178_v13 = vshrl.u32 %v5411_v15, 16  ;;  %v2181_v45 = vshll.u32 %v5411_v15, 16  ;;  %v5414_v52 = vld [vmem:[%s6688_s13 + $0x30] sm:$0xf] }
  0x83   : > { %6165 = vmatmul.mubr.msk.bf16.gmra.mxu0 %vm756_vm3, %v5315_v41  ;;  %v2169_v41 = vrot.slane %v2167_v57, 4  ;;  %v2187_v11 = vshll.u32 %v7298_v44, 16  ;;  %v9412_v3 = vcombine.low %v6707_v12, %v6711_v14  ;;  %v7330_v4 = vsel %vm7018_vm7, %v1422_v32, %v1423_v23 }
  0x84   : > { %6168 = vmatprep.mubr.msk.bf16.mxu0 %vm756_vm3, %v5316_v51  ;;  %v9411_v51 = vcombine.low %v6973_v62, %v6980_v55  ;;  %v2151_v62 = vrot.slane %v2149_v20, 5  ;;  %v2191_v63 = vshrl.u32 %v7298_v44, 16  ;;  %v2137_v34 = vrot.slane %v2136_v6, 4 }
  0x85   : > { %v2170_v55 = vor.u32 %v2169_v41, %v7309_v17  ;;  %v2180_v8 = vrot.slane %v2178_v13, 4  ;;  %v2183_v1 = vrot.slane %v2181_v45, 5  ;;  %v7338_v33 = vrot.slane %v2187_v11, 5  ;;  %v7344_v41 = vld [vmem:[%s6688_s13 + $0x38] sm:$0x1] }
  0x86   : > { %6131 = vmatmul.mubr.msk.bf16.gmra.mxu1 %vm756_vm3, %v9411_v51  ;;  %v2147_v12 = vrot.slane %v2146_v28, 4  ;;  %v2161_v14 = vrot.slane %v2160_v56, 4  ;;  %v2175_v16 = vrot.slane %v2173_v50, 5  ;;  %v2193_v23 = vrot.slane %v2191_v63, 4  ;;  %v5417_v13 = vld [vmem:[%s6688_s13 + $0x3c] sm:$0xf] }
  0x87   : > { %6134 = vmatprep.mubr.msk.bf16.mxu1 %vm756_vm3, %v9412_v3  ;;  %v2171_v15 = vrot.slane %v2170_v55, 4  ;;  %v2197_v32 = vshll.u32 %v7313_v21, 16  ;;  %v2202_v20 = vshrl.u32 %v5414_v52, 16  ;;  %v2205_v60 = vshll.u32 %v5414_v52, 16 }
  0x88   : > { %v2184_v57 = vor.u32 %v2183_v1, %v2180_v8  ;;  %v2194_v6 = vor.u32 %v2193_v23, %v7338_v33  ;;  %v2211_v28 = vshll.u32 %v7336_v5, 16  ;;  %v2215_v56 = vshrl.u32 %v7336_v5, 16  ;;  %v5420_v8 = vld [vmem:[%s6688_s13 + $0x48] sm:$0xf]  ;;  %v7371_v1 = vld [vmem:[%s6688_s13 + $0x4c] sm:$0xf] }
  0x89   : > { %v2204_v50 = vrot.slane %v2202_v20, 4  ;;  %v2207_v51 = vrot.slane %v2205_v60, 5  ;;  %v9413_v3 = vcombine.low %v6749_v53, %v6753_v58  ;;  %v5323_v55 = vcombine.low %v7321_v18, %v7330_v4 }
  0x8a   : > { %v7350_v45 = vrot.slane %v2211_v28, 5  ;;  %v2217_v11 = vrot.slane %v2215_v56, 4  ;;  %v2152_v63 = vsel %vm6732_vm4, %v2147_v12, %v2151_v62  ;;  %v2166_v52 = vsel %vm6732_vm4, %v2161_v14, %v7309_v17 }
  0x8b   : > { %6169 = vmatmul.mubr.msk.bf16.gmra.mxu0 %vm756_vm3, %v5317_v61  ;;  %v7353_v61 = vld [vmem:[%s6688_s13 + $0x40] sm:$0xf]  ;;  %v9414_v53 = vcombine.low %v6787_v35, %v6798_v46  ;;  %v2176_v58 = vsel %vm6732_vm4, %v2171_v15, %v2175_v16  ;;  %v2185_v23 = vrot.slane %v2184_v57, 4  ;;  %v2208_v20 = vor.u32 %v2207_v51, %v2204_v50  ;;  %v7405_v50 = vld [vmem:[%s6688_s13 + $0x44] sm:$0x1] }
  0x8c   : > { %6172 = vmatprep.mubr.msk.bf16.mxu0 %vm756_vm3, %v5318_v40  ;;  %v2142_v40 = vsel %vm6732_vm4, %v2137_v34, %v7293_v30  ;;  %v2195_v30 = vrot.slane %v2194_v6, 4  ;;  %v2199_v34 = vrot.slane %v2197_v32, 5  ;;  %v2221_v62 = vshll.u32 %v7344_v41, 16  ;;  %v5423_v51 = vld [vmem:[%s6688_s13 + $0x54] sm:$0xf] }
  0x8d   : > { %v2226_v12 = vshrl.u32 %v5417_v13, 16  ;;  %v2229_v17 = vshll.u32 %v5417_v13, 16  ;;  %v7382_v14 = vsel %vm805_vm0, %v7113_v22, 0  ;;  %v2218_v35 = vor.u32 %v2217_v11, %v7350_v45 }
  0x8e   : > { %6135 = vmatmul.mubr.msk.bf16.gmra.mxu1 %vm756_vm3, %v9413_v3  ;;  %v2235_v46 = vshll.u32 %v7353_v61, 16  ;;  %v2239_v16 = vshrl.u32 %v7353_v61, 16  ;;  %v7387_v15 = vcombine.low %v2142_v40, %v2152_v63  ;;  %v7391_v32 = vsel %vm805_vm0, %v7085_v24, 0  ;;  %v7414_v40 = vld [vmem:[%s6688_s13 + $0x58] sm:$0xf] }
  0x8f   : > { %6138 = vmatprep.mubr.msk.bf16.mxu1 %vm756_vm3, %v9414_v53  ;;  %v2250_v60 = vshrl.u32 %v5420_v8, 16  ;;  %v2253_v57 = vshll.u32 %v5420_v8, 16  ;;  %v9415_v6 = vcombine.low %v7200_v25, %v7210_v54  ;;  %v7397_v22 = vcombine.low %v2166_v52, %v2176_v58  ;;  %v7419_v8 = vld [vmem:[%s6688_s13 + $0x50] sm:$0x1] }
  0x90   : > { %v2190_v28 = vsel %vm6732_vm4, %v2185_v23, %v7338_v33  ;;  %v2200_v56 = vsel %vm6732_vm4, %v2195_v30, %v2199_v34  ;;  %v2259_v24 = vshll.u32 %v7371_v1, 16  ;;  %v9416_v25 = vcombine.low %v7214_v39, %v7224_v27  ;;  %v5426_v34 = vld [vmem:[%s6688_s13 + $0x60] sm:$0xf] }
  0x91   : > { %v2209_v54 = vrot.slane %v2208_v20, 4  ;;  %v2223_v13 = vrot.slane %v2221_v62, 5  ;;  %v2228_v11 = vrot.slane %v2226_v12, 4  ;;  %v2231_v3 = vrot.slane %v2229_v17, 5 }
  0x92   : > { %v2219_v33 = vrot.slane %v2218_v35, 4  ;;  %v7416_v63 = vrot.slane %v2235_v46, 5  ;;  %v2241_v52 = vrot.slane %v2239_v16, 4  ;;  %v2263_v53 = vshrl.u32 %v7371_v1, 16  ;;  %v7436_v35 = vld [vmem:[%s6688_s13 + $0x5c] sm:$0x1] }
  0x93   : > { %6173 = vmatmul.mubr.msk.bf16.gmra.mxu0 %vm756_vm3, %v9415_v6  ;;  %v9417_v39 = vcombine.low %v6837_v36, %v6844_v43  ;;  %v2252_v27 = vrot.slane %v2250_v60, 4  ;;  %v2255_v58 = vrot.slane %v2253_v57, 5  ;;  %v2274_v23 = vshrl.u32 %v5423_v51, 16 }
  0x94   : > { %6176 = vmatprep.mubr.msk.bf16.mxu0 %vm756_vm3, %v9416_v25  ;;  %v2277_v30 = vshll.u32 %v5423_v51, 16  ;;  %v9418_v20 = vcombine.low %v9401_v2, %v9400_v10  ;;  %v7431_v62 = vcombine.low %v2190_v28, %v2200_v56  ;;  %v7433_v12 = vrot.slane %v2259_v24, 5  ;;  %v7449_v28 = vld [vmem:[%s6688_s13 + $0x64] sm:$0xf] }
  0x95   : > { %v2265_v17 = vrot.slane %v2263_v53, 4  ;;  %v2283_v36 = vshll.u32 %v7414_v40, 16  ;;  %v2245_v43 = vshll.u32 %v7405_v50, 16  ;;  %v2276_v46 = vrot.slane %v2274_v23, 4 }
  0x96   : > { %6139 = vmatmul.mubr.msk.bf16.gmra.mxu1 %vm756_vm3, %v9417_v39  ;;  %v2279_v16 = vrot.slane %v2277_v30, 5  ;;  %v2287_v60 = vshrl.u32 %v7414_v40, 16  ;;  %v2214_v10 = vsel %vm6732_vm4, %v2209_v54, %v7350_v45  ;;  %v2224_v2 = vsel %vm6732_vm4, %v2219_v33, %v2223_v13  ;;  %v7471_v30 = vld [vmem:[%s6688_s13 + $0x68] sm:$0x1] }
  0x97   : > { %6142 = vmatprep.mubr.msk.bf16.mxu1 %vm756_vm3, %v9418_v20  ;;  %v2232_v57 = vor.u32 %v2231_v3, %v2228_v11  ;;  %v7446_v6 = vrot.slane %v2283_v36, 5  ;;  %v2242_v56 = vor.u32 %v2241_v52, %v7416_v63  ;;  %v2256_v24 = vor.u32 %v2255_v58, %v2252_v27  ;;  %v5429_v3 = vld [vmem:[%s6688_s13 + $0x6c] sm:$0xf]  ;;  %v7468_v27 = vld [vmem:[%s6688_s13 + $0x70] sm:$0xf] }
  0x98   : > { %v2269_v51 = vshll.u32 %v7419_v8, 16  ;;  %v2289_v25 = vrot.slane %v2287_v60, 4  ;;  %v9419_v53 = vcombine.low %v7234_v19, %v7254_v9  ;;  %v2266_v45 = vor.u32 %v2265_v17, %v7433_v12 }
  0x99   : > { %v2280_v54 = vor.u32 %v2279_v16, %v2276_v46  ;;  %v2298_v13 = vshrl.u32 %v5426_v34, 16  ;;  %v2301_v11 = vshll.u32 %v5426_v34, 16  ;;  %v9420_v33 = vcombine.low %v7246_v59, %v7270_v7  ;;  %v5432_v16 = vld [vmem:[%s6688_s13 + $0x78] sm:$0xf] }
  0x9a   : > { %v2290_v52 = vor.u32 %v2289_v25, %v7446_v6  ;;  %v2293_v39 = vshll.u32 %v7436_v35, 16  ;;  %v2307_v19 = vshll.u32 %v7449_v28, 16  ;;  %v2311_v9 = vshrl.u32 %v7449_v28, 16 }
  0x9b   : > { %6177 = vmatmul.mubr.msk.bf16.gmra.mxu0 %vm756_vm3, %v9419_v53  ;;  %v2233_v58 = vrot.slane %v2232_v57, 4  ;;  %v2247_v23 = vrot.slane %v2245_v43, 5  ;;  %v2300_v34 = vrot.slane %v2298_v13, 4  ;;  %v2303_v20 = vrot.slane %v2301_v11, 5 }
  0x9c   : > { %6180 = vmatprep.mubr.msk.bf16.mxu0 %vm756_vm3, %v9420_v33  ;;  %v9421_v59 = vcombine.low %v9404_v26, %v9403_v38  ;;  %v7477_v7 = vcombine.low %v2214_v10, %v2224_v2  ;;  %v2243_v17 = vrot.slane %v2242_v56, 4  ;;  %v2257_v36 = vrot.slane %v2256_v24, 4  ;;  %v7487_v2 = vld [vmem:[%s6688_s13 + $0x7c] sm:$0xf] }
  0x9d   : > { %v7479_v46 = vrot.slane %v2307_v19, 5  ;;  %v9422_v43 = vcombine.low %v9407_v42, %v9406_v48  ;;  %v2267_v60 = vrot.slane %v2266_v45, 4  ;;  %v2271_v57 = vrot.slane %v2269_v51, 5  ;;  %9423 = vst [vmem:[#allocation6_spill] sm:$0xff] %v7487_v2  ;;  %v5435_v19 = vld [vmem:[%s6688_s13 + $0x84] sm:$0xf] }
  0x9e   : > { %6143 = vmatmul.mubr.msk.bf16.gmra.mxu1 %vm756_vm3, %v9421_v59  ;;  %v2281_v25 = vrot.slane %v2280_v54, 4  ;;  %v2313_v38 = vrot.slane %v2311_v9, 4  ;;  %v2291_v26 = vrot.slane %v2290_v52, 4  ;;  %v2295_v53 = vrot.slane %v2293_v39, 5 }
  0x9f   : > { %6146 = vmatprep.mubr.msk.bf16.mxu1 %vm756_vm3, %v9422_v43  ;;  %v2304_v13 = vor.u32 %v2303_v20, %v2300_v34  ;;  %v2322_v10 = vshrl.u32 %v5429_v3, 16  ;;  %v2238_v56 = vsel %vm6732_vm4, %v2233_v58, %v7416_v63  ;;  %v2325_v24 = vshll.u32 %v5429_v3, 16  ;;  %v6474_v63 = vld [vmem:[%s6688_s13 + $0xc] sm:$0xff]   ;;  %v7521_v34 = vld [vmem:[%s6688_s13 + $0x88] sm:$0xf] }
  0xa0   : > { %v2331_v48 = vshll.u32 %v7468_v27, 16  ;;  %v2335_v42 = vshrl.u32 %v7468_v27, 16  ;;  %v2248_v51 = vsel %vm6732_vm4, %v2243_v17, %v2247_v23  ;;  %v2262_v45 = vsel %vm6732_vm4, %v2257_v36, %v7433_v12  ;;  %9424 = vst [vmem:[#allocation8_spill] sm:$0xff] %v7521_v34  ;;  %v7530_v36 = vld [vmem:[%s6688_s13 + $0x74] sm:$0x1] }
  0xa1   : > { %v2314_v54 = vor.u32 %v2313_v38, %v7479_v46  ;;  %v2317_v11 = vshll.u32 %v7471_v30, 16  ;;  %v2272_v3 = vsel %vm6732_vm4, %v2267_v60, %v2271_v57  ;;  %v2286_v33 = vsel %vm6732_vm4, %v2281_v25, %v7446_v6  ;;  %9426 = vst [vmem:[#allocation7_spill] sm:$0xff] %v7530_v36  ;;  %v7540_v38 = vld [vmem:[%s6688_s13 + $0x80] sm:$0x1] }
  0xa2   : > { %v2346_v52 = vshrl.u32 %v5432_v16, 16  ;;  %v2349_v12 = vshll.u32 %v5432_v16, 16  ;;  %v2296_v18 = vsel %vm6732_vm4, %v2291_v26, %v2295_v53  ;;  %v2305_v4 = vrot.slane %v2304_v13, 4  ;;  %9427 = vst [vmem:[#allocation9_spill] sm:$0xff] %v7540_v38  ;;  %v7543_v26 = vld [vmem:[%s6688_s13 + $0x8c] sm:$0x1] }
  0xa3   : > { %6181 = vmatmul.mubr.msk.bf16.gmra.mxu0 %vm756_vm3, %v5323_v55  ;;  %v2324_v55 = vrot.slane %v2322_v10, 4  ;;  %v2355_v39 = vshll.u32 %v7487_v2, 16  ;;  %v2327_v9 = vrot.slane %v2325_v24, 5  ;;  %v7517_v58 = vrot.slane %v2331_v48, 5  ;;  %9428 = vst [vmem:[#allocation11_spill] sm:$0xff] %v7543_v26  ;;  %v6475_v10 = vld [vmem:[%s6688_s13 + $0x18] sm:$0xff]  }
  0xa4   : > { %6220 = vmatprep.mubr.msk.bf16.mxu0 %vm756_vm3, %v7387_v15  ;;  %v2337_v23 = vrot.slane %v2335_v42, 4  ;;  %v2359_v6 = vshrl.u32 %v7487_v2, 16  ;;  %v9425_v15 = vcombine.low %v9409_v29, %v6997_v37  ;;  %v7527_v20 = vcombine.low %v2238_v56, %v2248_v51  ;;  %v5438_v51 = vld [vmem:[%s6688_s13 + $0x90] sm:$0xf] }
  0xa5   : > { %v2315_v59 = vrot.slane %v2314_v54, 4  ;;  %v2319_v17 = vrot.slane %v2317_v11, 5  ;;  %v2348_v16 = vrot.slane %v2346_v52, 4  ;;  %v2351_v43 = vrot.slane %v2349_v12, 5 }
  0xa6   : > { %6147 = vmatmul.mubr.msk.bf16.gmra.mxu1 %vm756_vm3, %v9425_v15  ;;  %v7533_v60 = vrot.slane %v2355_v39, 5  ;;  %v2361_v57 = vrot.slane %v2359_v6, 4  ;;  %v2370_v25 = vshrl.u32 %v5435_v19, 16  ;;  %v7535_v37 = vcombine.low %v2262_v45, %v2272_v3  ;;  %v7554_v45 = vld [vmem:[%s6688_s13 + $0x94] sm:$0xf] }
  0xa7   : > { %6186 = vmatprep.mubr.msk.bf16.mxu1 %vm756_vm3, %v6474_v63  ;;  %v7537_v29 = vcombine.low %v2286_v33, %v2296_v18  ;;  %v2373_v53 = vshll.u32 %v5435_v19, 16  ;;  %v2379_v13 = vshll.u32 %v7521_v34, 16  ;;  %v2310_v56 = vsel %vm6732_vm4, %v2305_v4, %v7479_v46  ;;  %9429 = vst [vmem:[#allocation10_spill] sm:$0xff] %v7554_v45  ;;  %v7562_v33 = vld [vmem:[%s9340_s1 + $0x20] sm:$0xf]  ;;  %v6476_v46 = vld [vmem:[%s6688_s13 + $0x24] sm:$0xff]  }
  0xa8   : > { %v2328_v24 = vor.u32 %v2327_v9, %v2324_v55  ;;  %v2338_v48 = vor.u32 %v2337_v23, %v7517_v58  ;;  %v2341_v42 = vshll.u32 %v7530_v36, 16  ;;  %v2372_v54 = vrot.slane %v2370_v25, 4  ;;  %9430 = vst [vmem:[#allocation12_spill] sm:$0xff] %v7562_v33 }
  0xa9   : > { %v2375_v11 = vrot.slane %v2373_v53, 5  ;;  %v7556_v63 = vrot.slane %v2379_v13, 5  ;;  %v2383_v3 = vshrl.u32 %v7521_v34, 16  ;;  %v2320_v52 = vsel %vm6732_vm4, %v2315_v59, %v2319_v17 }
  0xaa   : > { %v2352_v12 = vor.u32 %v2351_v43, %v2348_v16  ;;  %v2362_v18 = vor.u32 %v2361_v57, %v7533_v60  ;;  %v2365_v4 = vshll.u32 %v7540_v38, 16  ;;  %v2394_v19 = vshrl.u32 %v5438_v51, 16  ;;  %v7596_v57 = vld [vmem:[%s6688_s13 + $0xa0] sm:$0xf] }
  0xab   : > { %6221 = vmatmul.mubr.msk.bf16.vlgmr.msra.gmra.mxu0 %vm756_vm3, %v7397_v22  ;;  %v2376_v55 = vor.u32 %v2375_v11, %v2372_v54  ;;  %v2385_v39 = vrot.slane %v2383_v3, 4  ;;  %v2397_v9 = vshll.u32 %v5438_v51, 16  ;;  %v5441_v22 = vld [vmem:[%s6688_s13 + $0x9c] sm:$0xf]  ;;  %v7575_v23 = vrot.slane %v2328_v24, 4  ;;  %9432 = vst [vmem:[#allocation13_spill] sm:$0xff] %v7596_v57 }
  0xac   : > { %6287 = vmatpush3.bf16.msra.mxu0 %v7391_v32  ;;  %6224 = vmatprep.mubr.msk.bf16.mxu0 %vm756_vm3, %v7431_v62  ;;  %v7577_v6 = vrot.slane %v2341_v42, 5  ;;  %v2389_v15 = vshll.u32 %v7543_v26, 16  ;;  %v2403_v59 = vshll.u32 %v7554_v45, 16  ;;  %v7584_v32 = vld [vmem:[%s9340_s1 + $0x1c] sm:$0xf]  ;;  %v7589_v62 = vcombine.low %v2310_v56, %v2320_v52 }
  0xad   : > { %9431 = vst [vmem:[#allocation14_spill] sm:$0xff] %v7584_v32  ;;  %6399 = vmatprep.subr.msk.bf16.mxu0 %vm805_vm0, %v7562_v33  ;;  %v7591_v17 = vrot.slane %v2338_v48, 4  ;;  %v2386_v16 = vor.u32 %v2385_v39, %v7556_v63  ;;  %v2407_v43 = vshrl.u32 %v7554_v45, 16  ;;  %v7600_v25 = vrot.slane %v2352_v12, 4  ;;  %v7609_v56 = vld [vmem:[%s6688_s13 + $0x98] sm:$0x1] }
  0xae   : > { %6187 = vmatmul.mubr.msk.bf16.vlgmr.msra.gmra.mxu1 %vm756_vm3, %v6475_v10  ;;  %v7602_v53 = vrot.slane %v2362_v18, 4  ;;  %v7604_v13 = vrot.slane %v2365_v4, 5  ;;  %v7606_v10 = vrot.slane %v2376_v55, 4  ;;  %9433 = vst [vmem:[#allocation15_spill] sm:$0xff] %v7609_v56  ;;  %v2396_v24 = vrot.slane %v2394_v19, 4  ;;  %v6478_v19 = vld [vmem:[%s6688_s13 + $0x3c] sm:$0xff]  }
  0xaf   : > { %6253 = vmatpush3.bf16.msra.mxu1 %v7382_v14  ;;  %6190 = vmatprep.mubr.msk.bf16.mxu1 %vm756_vm3, %v6476_v46  ;;  %v2399_v48 = vrot.slane %v2397_v9, 5  ;;  %v2418_v42 = vshrl.u32 %v5441_v22, 16  ;;  %v2421_v51 = vshll.u32 %v5441_v22, 16  ;;  %v6477_v14 = vld [vmem:[%s6688_s13 + $0x30] sm:$0xff]   ;;  %v7618_v11 = vrot.slane %v2389_v15, 5 }
  0xb0   : > { %6398 = vmatprep.subr.msk.bf16.mxu1 %vm805_vm0, %v7584_v32  ;;  %v7620_v3 = vrot.slane %v2403_v59, 5  ;;  %v2427_v46 = vshll.u32 %v7596_v57, 16  ;;  %v5444_v52 = vld [vmem:[%s6688_s13 + $0xa8] sm:$0xf]  ;;  %v7624_v12 = vrot.slane %v2386_v16, 4  ;;  %v2409_v18 = vrot.slane %v2407_v43, 4 }
  0xb1   : > { %v2413_v4 = vshll.u32 %v7609_v56, 16  ;;  %v2431_v55 = vshrl.u32 %v7596_v57, 16  ;;  %v7629_v39 = vld [vmem:[%s6688_s13 + $0xac] sm:$0xf]  ;;  %v2400_v59 = vor.u32 %v2399_v48, %v2396_v24  ;;  %v7653_v16 = vld [vmem:[%s6688_s13 + $0xa4] sm:$0x1] }
  0xb2   : > { %9434 = vst [vmem:[#allocation16_spill] sm:$0xff] %v7629_v39  ;;  %9435 = vst [vmem:[#allocation5_spill] sm:$0xff] %v7653_v16  ;;  %v2420_v43 = vrot.slane %v2418_v42, 4  ;;  %v2423_v22 = vrot.slane %v2421_v51, 5  ;;  %v2442_v54 = vshrl.u32 %v5444_v52, 16  ;;  %v7655_v9 = vrot.slane %v2427_v46, 5 }
  0xb3   : > { %6225 = vmatmul.mubr.msk.bf16.gmra.mxu0 %vm756_vm3, %v7477_v7  ;;  %v2433_v32 = vrot.slane %v2431_v55, 4  ;;  %v2445_v15 = vshll.u32 %v5444_v52, 16  ;;  %v2451_v33 = vshll.u32 %v7629_v39, 16  ;;  %v5447_v57 = vld [vmem:[%s6688_s13 + $0xb4] sm:$0xf]  ;;  %v2410_v24 = vor.u32 %v2409_v18, %v7620_v3 }
  0xb4   : > { %6228 = vmatprep.mubr.msk.bf16.mxu0 %vm756_vm3, %v7527_v20  ;;  %v2392_v20 = vsel %vm6732_vm4, %v7624_v12, %v7618_v11  ;;  %v7665_v48 = vrot.slane %v2413_v4, 5  ;;  %v7668_v42 = vld [vmem:[%s6688_s13 + $0xb0] sm:$0x1]  ;;  %v2444_v51 = vrot.slane %v2442_v54, 4  ;;  %v7671_v46 = vld [vmem:[%s6688_s13 + $0xb8] sm:$0xf]  ;;  %v2424_v18 = vor.u32 %v2423_v22, %v2420_v43 }
  0xb5   : > { %9436 = vst [vmem:[#allocation17_spill] sm:$0xff] %v7668_v42  ;;  %9437 = vst [vmem:[#allocation18_spill] sm:$0xff] %v7671_v46  ;;  %v2447_v52 = vrot.slane %v2445_v15, 5  ;;  %v7675_v55 = vrot.slane %v2451_v33, 5  ;;  %v2455_v11 = vshrl.u32 %v7629_v39, 16  ;;  %v7678_v12 = vrot.slane %v2400_v59, 4 }
  0xb6   : > { %6191 = vmatmul.mubr.msk.bf16.gmra.mxu1 %vm756_vm3, %v6477_v14  ;;  %v2437_v14 = vshll.u32 %v7653_v16, 16  ;;  %v7681_v4 = vld [vmem:[%s6688_s13 + $0xbc] sm:$0x1]  ;;  %v2466_v54 = vshrl.u32 %v5447_v57, 16  ;;  %v2469_v7 = vshll.u32 %v5447_v57, 16  ;;  %v2434_v56 = vor.u32 %v2433_v32, %v7655_v9  ;;  %v6479_v16 = vld [vmem:[%s6688_s13 + $0x48] sm:$0xff]  }
  0xb7   : > { %6194 = vmatprep.mubr.msk.bf16.mxu1 %vm756_vm3, %v6478_v19  ;;  %v2457_v45 = vrot.slane %v2455_v11, 4  ;;  %v2461_v19 = vshll.u32 %v7668_v42, 16  ;;  %v2475_v15 = vshll.u32 %v7671_v46, 16  ;;  %v5450_v33 = vld [vmem:[%s6688_s13 + $0xc0] sm:$0xf]  ;;  %v2448_v26 = vor.u32 %v2447_v52, %v2444_v51  ;;  %v6480_v57 = vld [vmem:[%s6688_s13 + $0x54] sm:$0xff]  }
  0xb8   : > { %v2468_v39 = vrot.slane %v2466_v54, 4  ;;  %v2471_v34 = vrot.slane %v2469_v7, 5  ;;  %v2479_v59 = vshrl.u32 %v7671_v46, 16  ;;  %v7690_v22 = vld [vmem:[%s6688_s13 + $0xc4] sm:$0xf]  ;;  %v2411_v43 = vrot.slane %v2410_v24, 4 }
  0xb9   : > { %v2439_v32 = vrot.slane %v2437_v14, 5  ;;  %v2458_v11 = vor.u32 %v2457_v45, %v7675_v55  ;;  %v2477_v42 = vrot.slane %v2475_v15, 5  ;;  %v2485_v7 = vshll.u32 %v7681_v4, 16  ;;  %v7702_v45 = vld [vmem:[%s6688_s13 + $0xc8] sm:$0x1] }
  0xba   : > { %v2472_v51 = vor.u32 %v2471_v34, %v2468_v39  ;;  %v2481_v52 = vrot.slane %v2479_v59, 4  ;;  %v2490_v54 = vshrl.u32 %v5450_v33, 16  ;;  %v2425_v46 = vrot.slane %v2424_v18, 4 }
  0xbb   : > { %6229 = vmatmul.mubr.msk.bf16.gmra.mxu0 %vm756_vm3, %v7535_v37  ;;  %v2435_v38 = vrot.slane %v2434_v56, 4  ;;  %v2493_v2 = vshll.u32 %v5450_v33, 16  ;;  %v2499_v37 = vshll.u32 %v7690_v22, 16  ;;  %v2449_v24 = vrot.slane %v2448_v26, 4 }
  0xbc   : > { %6232 = vmatprep.mubr.msk.bf16.mxu0 %vm756_vm3, %v7537_v29  ;;  %v2463_v14 = vrot.slane %v2461_v19, 5  ;;  %v2482_v36 = vor.u32 %v2481_v52, %v2477_v42  ;;  %v2492_v15 = vrot.slane %v2490_v54, 4  ;;  %v2459_v34 = vrot.slane %v2458_v11, 4 }
  0xbd   : > { %v2495_v29 = vrot.slane %v2493_v2, 5  ;;  %v7705_v39 = vrot.slane %v2499_v37, 5  ;;  %v2503_v56 = vshrl.u32 %v7690_v22, 16  ;;  %v9438_v26 = vsel %vm6732_vm4, %v7591_v17, %v7577_v6 }
  0xbe   : > { %6195 = vmatmul.mubr.msk.bf16.gmra.mxu1 %vm756_vm3, %v6479_v16  ;;  %v9439_v16 = vsel %vm6732_vm4, %v7575_v23, %v7517_v58  ;;  %v2473_v19 = vrot.slane %v2472_v51, 4  ;;  %v2483_v33 = vrot.slane %v2482_v36, 4  ;;  %v2487_v2 = vrot.slane %v2485_v7, 5  ;;  %v6481_v23 = vld [vmem:[%s6688_s13 + $0x60] sm:$0xff]  }
  0xbf   : > { %6198 = vmatprep.mubr.msk.bf16.mxu1 %vm756_vm3, %v6480_v57  ;;  %v5462_v18 = vcombine.low %v9439_v16, %v9438_v26  ;;  %v9440_v59 = vsel %vm6732_vm4, %v7602_v53, %v7604_v13  ;;  %v9441_v6 = vsel %vm6732_vm4, %v7600_v25, %v7533_v60  ;;  %v2496_v57 = vor.u32 %v2495_v29, %v2492_v15  ;;  %v5488_v13 = vld [vmem:[%s6688_s13 + $0x24] sm:$0xe]  ;;  %v5491_v26 = vld [vmem:[%s6688_s13 + $0x48] sm:$0xe] }
  0xc0   : > { %v5463_v17 = vcombine.low %v9441_v6, %v9440_v59  ;;  %v2505_v11 = vrot.slane %v2503_v56, 4  ;;  %v2509_v58 = vshll.u32 %v7702_v45, 16  ;;  %v9442_v36 = vsel %vm6732_vm4, %v7606_v10, %v7556_v63  ;;  %v6482_v63 = vld [vmem:[%s6688_s13 + $0x6c] sm:$0xff]   ;;  %v5492_v6 = vld [vmem:[%s6688_s13 + $0x54] sm:$0xe] }
  0xc1   : > { %v5464_v51 = vcombine.low %v9442_v36, %v2392_v20  ;;  %v2406_v53 = vsel %vm6732_vm4, %v7678_v12, %v7620_v3  ;;  %v2416_v60 = vsel %vm6732_vm4, %v2411_v43, %v7665_v48  ;;  %v2430_v25 = vsel %vm6732_vm4, %v2425_v46, %v7655_v9  ;;  %v7758_v12 = vld [vmem:[%s6688_s13 + $0xc] sm:$0xe] }
  0xc2   : > { %v2440_v10 = vsel %vm6732_vm4, %v2435_v38, %v2439_v32  ;;  %v2454_v3 = vsel %vm6732_vm4, %v2449_v24, %v7675_v55  ;;  %v2464_v20 = vsel %vm6732_vm4, %v2459_v34, %v2463_v14  ;;  %v2506_v48 = vor.u32 %v2505_v11, %v7705_v39  ;;  %v5489_v55 = vld [vmem:[%s6688_s13 + $0x30] sm:$0xe]  ;;  %v5490_v14 = vld [vmem:[%s6688_s13 + $0x3c] sm:$0xe] }
  0xc3   : > { %6233 = vmatmul.mubr.msk.bf16.gmra.mxu0 %vm756_vm3, %v7589_v62  ;;  %v2478_v62 = vsel %vm6732_vm4, %v2473_v19, %v2477_v42  ;;  %v2488_v38 = vsel %vm6732_vm4, %v2483_v33, %v2487_v2  ;;  %v7765_v9 = vrot.slane %v2496_v57, 4  ;;  %v2873_v46 = vrot.slane %v7249_v49, 5  ;;  %v6483_v57 = vld [vmem:[%s6688_s13 + $0x78] sm:$0xff]  }
  0xc4   : > { %6236 = vmatprep.mubr.msk.bf16.mxu0 %vm756_vm3, %v5462_v18  ;;  %v7769_v43 = vcombine.low %v2406_v53, %v2416_v60  ;;  %v7771_v32 = vrot.slane %v2506_v48, 4  ;;  %v7773_v52 = vrot.slane %v2509_v58, 5  ;;  %v5504_v7 = vrot.slane %v5488_v13, 9  ;;  %v6484_v53 = vld [vmem:[%s6688_s13 + $0x84] sm:$0xff]   ;;  %v5493_v13 = vld [vmem:[%s6688_s13 + $0x60] sm:$0xe] }
  0xc5   : > { %v7776_v54 = vcombine.low %v2430_v25, %v2440_v10  ;;  %v7778_v42 = vcombine.low %v2454_v3, %v2464_v20  ;;  %v5502_v37 = vrot.slane %v7758_v12, 9  ;;  %v2887_v24 = vrot.slane %v7298_v44, 5  ;;  %v6490_v49 = vld [vmem:[%s6688_s13 + $0x18] sm:$0xff]  }
  0xc6   : > { %6199 = vmatmul.mubr.msk.bf16.gmra.mxu1 %vm756_vm3, %v6481_v23  ;;  %v7784_v15 = vcombine.low %v2478_v62, %v2488_v38  ;;  %v2876_v34 = vrot.slane %v7285_v47, 5  ;;  %v2890_v29 = vrot.slane %v7313_v21, 5  ;;  %v5505_v56 = vrot.slane %v5489_v55, 9  ;;  %v5495_v55 = vld [vmem:[%s6688_s13 + $0x78] sm:$0xe] }
  0xc7   : > { %6202 = vmatprep.mubr.msk.bf16.mxu1 %vm756_vm3, %v6482_v63  ;;  %v2502_v16 = vsel %vm6732_vm4, %v7765_v9, %v7705_v39  ;;  %v7795_v44 = vrot.slane %v2873_v46, 4  ;;  %v7799_v18 = vsel %vm7018_vm7, %v5504_v7, %v2887_v24  ;;  %v2889_v19 = vrot.slane %v2887_v24, 4 }
  0xc8   : > { %v2512_v21 = vsel %vm6732_vm4, %v7771_v32, %v7773_v52  ;;  %v2894_v33 = vrot.slane %v7336_v5, 5  ;;  %v2897_v2 = vrot.slane %v7344_v41, 5  ;;  %v5506_v59 = vrot.slane %v5490_v14, 9  ;;  %v6489_v52 = vld [vmem:[%s6688_s13 + $0xc0] sm:$0xff]  }
  0xc9   : > { %v7811_v11 = vsel %vm7018_vm7, %v2889_v19, %v2890_v29  ;;  %v2901_v58 = vrot.slane %v7353_v61, 5  ;;  %v2904_v23 = vrot.slane %v7405_v50, 5  ;;  %v5507_v36 = vrot.slane %v5491_v26, 9  ;;  %v5496_v19 = vld [vmem:[%s6688_s13 + $0x84] sm:$0xe] }
  0xca   : > { %v5521_v5 = vcombine.low %v7799_v18, %v7811_v11  ;;  %v7821_v41 = vsel %vm7018_vm7, %v5505_v56, %v2894_v33  ;;  %v2896_v60 = vrot.slane %v2894_v33, 4  ;;  %v2908_v25 = vrot.slane %v7371_v1, 5 }
  0xcb   : > { %6237 = vmatmul.mubr.msk.bf16.gmra.mxu0 %vm756_vm3, %v5463_v17  ;;  %v7828_v61 = vsel %vm7018_vm7, %v5506_v59, %v2901_v58  ;;  %v2903_v50 = vrot.slane %v2901_v58, 4  ;;  %v2911_v17 = vrot.slane %v7419_v8, 5  ;;  %v5508_v63 = vrot.slane %v5492_v6, 9  ;;  %v9443_v59 = vld [vmem:[#allocation7_spill] sm:$0xff] }
  0xcc   : > { %6240 = vmatprep.mubr.msk.bf16.mxu0 %vm756_vm3, %v5464_v51  ;;  %v7833_v10 = vsel %vm7018_vm7, %v2896_v60, %v2897_v2  ;;  %v7837_v3 = vsel %vm7018_vm7, %v5507_v36, %v2908_v25  ;;  %v2910_v1 = vrot.slane %v2908_v25, 4  ;;  %v2915_v20 = vrot.slane %v7414_v40, 5  ;;  %v5494_v51 = vld [vmem:[%s6688_s13 + $0x6c] sm:$0xe]  ;;  %v6485_v58 = vld [vmem:[%s6688_s13 + $0x90] sm:$0xff]  }
  0xcd   : > { %v5522_v48 = vcombine.low %v7821_v41, %v7833_v10  ;;  %v7846_v8 = vsel %vm7018_vm7, %v2903_v50, %v2904_v23  ;;  %v2918_v62 = vrot.slane %v7436_v35, 5  ;;  %v5509_v38 = vrot.slane %v5493_v13, 9  ;;  %v9444_v36 = vld [vmem:[#allocation6_spill] sm:$0xff]  ;;  %v5497_v60 = vld [vmem:[%s6688_s13 + $0x90] sm:$0xe]  ;;  %v9445_v50 = vld [vmem:[#allocation9_spill] sm:$0xff] }
  0xce   : > { %6203 = vmatmul.mubr.msk.bf16.gmra.mxu1 %vm756_vm3, %v6483_v57  ;;  %v5523_v40 = vcombine.low %v7828_v61, %v7846_v8  ;;  %v7855_v7 = vsel %vm7018_vm7, %v2910_v1, %v2911_v17  ;;  %v7859_v24 = vsel %vm7018_vm7, %v5508_v63, %v2915_v20  ;;  %v2917_v14 = vrot.slane %v2915_v20, 4 }
  0xcf   : > { %6206 = vmatprep.mubr.msk.bf16.mxu1 %vm756_vm3, %v6484_v53  ;;  %v5524_v35 = vcombine.low %v7837_v3, %v7855_v7  ;;  %v2922_v29 = vrot.slane %v7449_v28, 5  ;;  %v2925_v56 = vrot.slane %v7471_v30, 5  ;;  %v5510_v26 = vrot.slane %v5494_v51, 9  ;;  %v9446_v51 = vld [vmem:[#allocation8_spill] sm:$0xff]  ;;  %v5628_v3 = vld [vmem:[%s6688_s13 + $0x48] sm:$0xf] }
  0xd0   : > { %v7868_v33 = vsel %vm7018_vm7, %v2917_v14, %v2918_v62  ;;  %v2929_v2 = vrot.slane %v7468_v27, 5  ;;  %v2932_v6 = vrot.slane %v9443_v59, 5  ;;  %v5511_v57 = vrot.slane %v5495_v55, 9  ;;  %v6486_v27 = vld [vmem:[%s6688_s13 + $0x9c] sm:$0xff]   ;;  %v9454_v55 = vld [vmem:[#allocation18_spill] sm:$0xff] }
  0xd1   : > { %v5525_v23 = vcombine.low %v7859_v24, %v7868_v33  ;;  %v7877_v28 = vsel %vm7018_vm7, %v5509_v38, %v2922_v29  ;;  %v2924_v30 = vrot.slane %v2922_v29, 4  ;;  %v2936_v53 = vrot.slane %v9444_v36, 5  ;;  %v5498_v38 = vld [vmem:[%s6688_s13 + $0x9c] sm:$0xe]  ;;  %v9449_v36 = vld [vmem:[#allocation15_spill] sm:$0xff] }
  0xd2   : > { %v7886_v25 = vsel %vm7018_vm7, %v5510_v26, %v2929_v2  ;;  %v2931_v13 = vrot.slane %v2929_v2, 4  ;;  %v2939_v17 = vrot.slane %v9445_v50, 5  ;;  %v5512_v63 = vrot.slane %v5496_v19, 9  ;;  %v5499_v26 = vld [vmem:[%s6688_s13 + $0xa8] sm:$0xe] }
  0xd3   : > { %6241 = vmatmul.mubr.msk.bf16.gmra.mxu0 %vm756_vm3, %v7769_v43  ;;  %v7893_v1 = vsel %vm7018_vm7, %v2924_v30, %v2925_v56  ;;  %v7897_v43 = vsel %vm7018_vm7, %v5511_v57, %v2936_v53  ;;  %v2938_v20 = vrot.slane %v2936_v53, 4  ;;  %v2943_v62 = vrot.slane %v9446_v51, 5  ;;  %v5501_v57 = vld [vmem:[%s6688_s13 + $0xc0] sm:$0xe]  ;;  %v6487_v19 = vld [vmem:[%s6688_s13 + $0xa8] sm:$0xff]  }
  0xd4   : > { %6244 = vmatprep.mubr.msk.bf16.mxu0 %vm756_vm3, %v7776_v54  ;;  %v7905_v14 = vsel %vm7018_vm7, %v2931_v13, %v2932_v6  ;;  %v9447_v54 = vld [vmem:[#allocation11_spill] sm:$0xff]  ;;  %v5513_v56 = vrot.slane %v5497_v60, 9  ;;  %v2953_v53 = vrot.slane %v9449_v36, 5  ;;  %v5514_v60 = vrot.slane %v5498_v38, 9  ;;  %v9452_v38 = vld [vmem:[#allocation16_spill] sm:$0xff] }
  0xd5   : > { %v2946_v29 = vrot.slane %v9447_v54, 5  ;;  %v7914_v2 = vsel %vm7018_vm7, %v2938_v20, %v2939_v17  ;;  %v7918_v59 = vsel %vm7018_vm7, %v5512_v63, %v2943_v62  ;;  %v2945_v6 = vrot.slane %v2943_v62, 4  ;;  %v5500_v13 = vld [vmem:[%s6688_s13 + $0xb4] sm:$0xe]  ;;  %v9450_v17 = vld [vmem:[#allocation13_spill] sm:$0xff] }
  0xd6   : > { %6207 = vmatmul.mubr.msk.bf16.gmra.mxu1 %vm756_vm3, %v6485_v58  ;;  %v9448_v58 = vld [vmem:[#allocation10_spill] sm:$0xff]  ;;  %v2957_v63 = vrot.slane %v9450_v17, 5  ;;  %v9451_v20 = vld [vmem:[#allocation5_spill] sm:$0xff]  ;;  %v5515_v62 = vrot.slane %v5499_v26, 9  ;;  %v2964_v36 = vrot.slane %v9452_v38, 5  ;;  %v5516_v26 = vrot.slane %v5500_v13, 9 }
  0xd7   : > { %6210 = vmatprep.mubr.msk.bf16.mxu1 %vm756_vm3, %v6486_v27  ;;  %v2950_v30 = vrot.slane %v9448_v58, 5  ;;  %v7928_v50 = vsel %vm7018_vm7, %v2945_v6, %v2946_v29  ;;  %v2960_v51 = vrot.slane %v9451_v20, 5  ;;  %v9453_v17 = vld [vmem:[#allocation17_spill] sm:$0xff]  ;;  %v6488_v27 = vld [vmem:[%s6688_s13 + $0xb4] sm:$0xff]   ;;  %v2877_v39 = vsel %vm7018_vm7, %v7795_v44, %v2876_v34  ;;  %v8145_v7 = vld [vmem:[%s6688_s13 + $0x4c] sm:$0xf] }
  0xd8   : > { %v7943_v29 = vsel %vm7018_vm7, %v5514_v60, %v2957_v63  ;;  %v2959_v6 = vrot.slane %v2957_v63, 4  ;;  %v2967_v20 = vrot.slane %v9453_v17, 5  ;;  %v2966_v38 = vrot.slane %v2964_v36, 4  ;;  %v6507_v44 = vld [vmem:[%s6688_s13 + $0x20] sm:$0x1] }
  0xd9   : > { %v7936_v54 = vsel %vm7018_vm7, %v5513_v56, %v2950_v30  ;;  %v2952_v58 = vrot.slane %v2950_v30, 4  ;;  %v7955_v30 = vsel %vm7018_vm7, %v5515_v62, %v2964_v36  ;;  %v2971_v60 = vrot.slane %v9454_v55, 5 }
  0xda   : > { %v5517_v63 = vrot.slane %v5501_v57, 9  ;;  %v7971_v55 = vsel %vm7018_vm7, %v2966_v38, %v2967_v20  ;;  %v2978_v57 = vrot.slane %v7690_v22, 5  ;;  %v2874_v22 = vsel %vm7018_vm7, %v5502_v37, %v2873_v46  ;;  %v6492_v38 = vld [vmem:[%s6688_s13 + $0x30] sm:$0xff]  }
  0xdb   : > { %6245 = vmatmul.mubr.msk.bf16.gmra.mxu0 %vm756_vm3, %v7778_v42  ;;  %v7951_v56 = vsel %vm7018_vm7, %v2952_v58, %v2953_v53  ;;  %v7964_v42 = vsel %vm7018_vm7, %v2959_v6, %v2960_v51  ;;  %v2974_v53 = vrot.slane %v7681_v4, 5  ;;  %v2973_v58 = vrot.slane %v2971_v60, 4 }
  0xdc   : > { %6248 = vmatprep.mubr.msk.bf16.mxu0 %vm756_vm3, %v7784_v15  ;;  %v7975_v15 = vsel %vm7018_vm7, %v5516_v26, %v2971_v60  ;;  %v2981_v51 = vrot.slane %v7702_v45, 5  ;;  %v5487_v45 = vld [vmem:[%s6688_s13 + $0x18] sm:$0xe]  ;;  %v8015_v9 = vsel %vm7018_vm7, %v5517_v63, %v2978_v57  ;;  %v2980_v46 = vrot.slane %v2978_v57, 4  ;;  %v6491_v26 = vld [vmem:[%s6688_s13 + $0x24] sm:$0xff]  }
  0xdd   : > { %v8003_v32 = vsel %vm7018_vm7, %v2973_v58, %v2974_v53  ;;  %v5503_v37 = vrot.slane %v5487_v45, 9  ;;  %v5519_v34 = vcombine.low %v2874_v22, %v2877_v39  ;;  %v9455_v60 = vld [vmem:[#allocation12_spill] sm:$0xff] }
  0xde   : > { %6211 = vmatmul.mubr.msk.bf16.gmra.mxu1 %vm756_vm3, %v6487_v19  ;;  %v5469_v19 = vcombine.low %v2502_v16, %v2512_v21  ;;  %v8020_v47 = vsel %vm7018_vm7, %v2980_v46, %v2981_v51  ;;  %v2883_v21 = vrot.slane %v6507_v44, 5  ;;  %v4640_v53 = vsel %vm805_vm0, %v9455_v60, 0  ;;  %v5616_v63 = vld [vmem:[%s6688_s13 + $0x18] sm:$0xf]  ;;  %v5617_v57 = vld [vmem:[%s6688_s13 + $0x1c] sm:$0xf] }
  0xdf   : > { %6214 = vmatprep.mubr.msk.bf16.mxu1 %vm756_vm3, %v6488_v27  ;;  %v6506_v27 = vld [vmem:[%s6688_s13 + $0x1c] sm:$0xf]  ;;  %v5619_v51 = vld [vmem:[%s6688_s13 + $0x24] sm:$0xf]  ;;  %v3688_v45 = vshrl.u32 %v5616_v63, 16  ;;  %v3697_v39 = vshll.u32 %v5617_v57, 16 }
  0xe0   : > { %v2880_v36 = vrot.slane %v6506_v27, 5  ;;  %v3691_v27 = vshll.u32 %v5616_v63, 16  ;;  %v3712_v46 = vshrl.u32 %v5619_v51, 16  ;;  %v6494_v44 = vld [vmem:[%s6688_s13 + $0x48] sm:$0xff]   ;;  %v5697_v60 = vld [vmem:[%s6688_s13 + $0x18] sm:$0xe] }
  0xe1   : > { %v8061_v63 = vld [vmem:[%s6688_s13 + $0x2c] sm:$0x1] }
  0xe2   : > { %v2882_v16 = vrot.slane %v2880_v36, 4  ;;  %v2881_v17 = vsel %vm7018_vm7, %v5503_v37, %v2880_v36  ;;  %v8045_v36 = vld [vmem:[%s6688_s13 + $0x28] sm:$0xf]  ;;  %v6493_v37 = vld [vmem:[%s6688_s13 + $0x3c] sm:$0xff]   ;;  %v3714_v18 = vrot.slane %v3712_v46, 4 }
  0xe3   : > { %6249 = vmatmul.mubr.msk.bf16.gmra.mxu0 %vm756_vm3, %v5469_v19  ;;  %v9456_v19 = vld [vmem:[#allocation14_spill] sm:$0xff] }
  0xe4   : > { %6288 = vmatprep.mubr.msk.bf16.mxu0 %vm756_vm3, %v6490_v49  ;;  %v2884_v20 = vsel %vm7018_vm7, %v2882_v16, %v2883_v21  ;;  %v4170_v22 = vsel %vm805_vm0, %v9456_v19, 0  ;;  %v3701_v49 = vshrl.u32 %v5617_v57, 16  ;;  %v3725_v16 = vshrl.u32 %v8045_v36, 16  ;;  %v5618_v21 = vld [vmem:[%s6688_s13 + $0x20] sm:$0x1] }
  0xe5   : > { %v5520_v58 = vcombine.low %v2881_v17, %v2884_v20  ;;  %v3690_v17 = vrot.slane %v3688_v45, 4  ;;  %v3693_v20 = vrot.slane %v3691_v27, 5  ;;  %v5622_v19 = vld [vmem:[%s6688_s13 + $0x30] sm:$0xf]  ;;  %v3707_v45 = vshll.u32 %v5618_v21, 16 }
  0xe6   : > { %6215 = vmatmul.mubr.msk.bf16.gmra.mxu1 %vm756_vm3, %v6489_v52  ;;  %v3715_v52 = vshll.u32 %v5619_v51, 16  ;;  %v3727_v51 = vrot.slane %v3725_v16, 4  ;;  %v5713_v27 = vrot.slane %v5697_v60, 9  ;;  %v4434_v46 = vrot.slane %v5618_v21, 5  ;;  %v5698_v16 = vld [vmem:[%s6688_s13 + $0x24] sm:$0xe] }
  0xe7   : > { %6254 = vmatprep.mubr.msk.bf16.mxu1 %vm756_vm3, %v5519_v34  ;;  %v3721_v34 = vshll.u32 %v8045_v36, 16  ;;  %v6495_v21 = vld [vmem:[%s6688_s13 + $0x54] sm:$0xff]   ;;  %v3739_v10 = vshll.u32 %v5622_v19, 16  ;;  %v6496_v60 = vld [vmem:[%s6688_s13 + $0x60] sm:$0xff]  }
  0xe8   : > { %v3717_v11 = vrot.slane %v3715_v52, 5  ;;  %v3731_v52 = vshll.u32 %v8061_v63, 16 }
  0xeb   : > { %6289 = vmatmul.mubr.msk.bf16.vlgmr.msra.gmra.mxu0 %vm756_vm3, %v6491_v26  ;;  %v8057_v26 = vrot.slane %v3697_v39, 5 }
  0xec   : > { %6355 = vmatpush3.bf16.msra.mxu0 %v4640_v53  ;;  %6292 = vmatprep.mubr.msk.bf16.mxu0 %vm756_vm3, %v6492_v38  ;;  %v3703_v38 = vrot.slane %v3701_v49, 4  ;;  %v4431_v53 = vrot.slane %v5617_v57, 5  ;;  %v8071_v57 = vld [vmem:[%s6688_s13 + $0x34] sm:$0xf] }
  0xee   : > { %6255 = vmatmul.mubr.msk.bf16.vlgmr.msra.gmra.mxu1 %vm756_vm3, %v5520_v58  ;;  %v8066_v58 = vrot.slane %v3721_v34, 5  ;;  %v3704_v39 = vor.u32 %v3703_v38, %v8057_v26  ;;  %v4433_v49 = vrot.slane %v4431_v53, 4  ;;  %v3718_v34 = vor.u32 %v3717_v11, %v3714_v18 }
  0xef   : > { %6321 = vmatpush3.bf16.msra.mxu1 %v4170_v22  ;;  %6258 = vmatprep.mubr.msk.bf16.mxu1 %vm756_vm3, %v5521_v5  ;;  %v8064_v5 = vpop.f32.mrf.mxu0  ;;  %v3694_v22 = vor.u32 %v3693_v20, %v3690_v17  ;;  %v3736_v17 = vshrl.u32 %v5622_v19, 16  ;;  %v3749_v38 = vshrl.u32 %v8071_v57, 16  ;;  %v8096_v61 = vsel %vm7018_vm7, %v5713_v27, %v4431_v53  ;;  %v5625_v19 = vld [vmem:[%s6688_s13 + $0x3c] sm:$0xf] }
  0xf0   : > { %v3728_v41 = vor.u32 %v3727_v51, %v8066_v58  ;;  %v3705_v8 = vrot.slane %v3704_v39, 4  ;;  %v3733_v11 = vrot.slane %v3731_v52, 5  ;;  %v5714_v51 = vrot.slane %v5698_v16, 9  ;;  %v8110_v39 = vld [vmem:[%s6688_s13 + $0x38] sm:$0x1] }
  0xf1   : > { %v8088_v20 = vpop.f32.mrf.mxu0  ;;  %v3695_v18 = vrot.slane %v3694_v22, 4  ;;  %v3719_v12 = vrot.slane %v3718_v34, 4  ;;  %v4441_v22 = vrot.slane %v8061_v63, 5  ;;  %v3751_v52 = vrot.slane %v3749_v38, 4 }
  0xf2   : > { %v3729_v27 = vrot.slane %v3728_v41, 4  ;;  %v3760_v34 = vshrl.u32 %v5625_v19, 16  ;;  %v3763_v16 = vshll.u32 %v5625_v19, 16  ;;  %v8123_v41 = vld [vmem:[%s6688_s13 + $0x40] sm:$0xf] }
  0xf3   : > { %6293 = vmatmul.mubr.msk.bf16.gmra.mxu0 %vm756_vm3, %v6493_v37  ;;  %v8107_v53 = vpop.f32.mrf.mxu0  ;;  %v3700_v63 = vsel %vm6732_vm4, %v3695_v18, %v8057_v26  ;;  %v3724_v26 = vsel %vm6732_vm4, %v3719_v12, %v8066_v58  ;;  %v5699_v18 = vld [vmem:[%s6688_s13 + $0x30] sm:$0xe]  ;;  %v3769_v24 = vshll.u32 %v8123_v41, 16  ;;  %v3773_v33 = vshrl.u32 %v8123_v41, 16 }
  0xf4   : > { %6296 = vmatprep.mubr.msk.bf16.mxu0 %vm756_vm3, %v6494_v44  ;;  %v8079_v37 = vpop.f32.mrf.mxu1  ;;  %v4438_v44 = vrot.slane %v8045_v36, 5  ;;  %v3709_v36 = vrot.slane %v3707_v45, 5  ;;  %v3738_v45 = vrot.slane %v3736_v17, 4  ;;  %v3734_v58 = vsel %vm6732_vm4, %v3729_v27, %v3733_v11 }
  0xf5   : > { %9457 = vst [vmem:[#allocation7_spill] sm:$0xff] %v8079_v37  ;;  %v8152_v12 = vpop.f32.mrf.mxu0  ;;  %v3765_v19 = vrot.slane %v3763_v16, 5  ;;  %v3797_v11 = vshrl.u32 %v8145_v7, 16 }
  0xf6   : > { %6259 = vmatmul.mubr.msk.bf16.gmra.mxu1 %vm756_vm3, %v5522_v48  ;;  %v3745_v48 = vshll.u32 %v8071_v57, 16  ;;  %v8103_v6 = vpop.f32.mrf.mxu1  ;;  %v4440_v4 = vrot.slane %v4438_v44, 4  ;;  %v3710_v17 = vsel %vm6732_vm4, %v3705_v8, %v3709_v36  ;;  %v4445_v36 = vrot.slane %v8071_v57, 5  ;;  %v6498_v8 = vld [vmem:[%s6688_s13 + $0x78] sm:$0xff]  }
  0xf7   : > { %6262 = vmatprep.mubr.msk.bf16.mxu1 %vm756_vm3, %v5523_v40  ;;  %v8100_v40 = vsel %vm7018_vm7, %v4433_v49, %v4434_v46  ;;  %9458 = vst [vmem:[#allocation6_spill] sm:$0xff] %v8103_v6  ;;  %v3741_v49 = vrot.slane %v3739_v10, 5  ;;  %v8166_v27 = vcombine.low %v3700_v63, %v3710_v17  ;;  %v8168_v57 = vcombine.low %v3724_v26, %v3734_v58  ;;  %v8182_v17 = vld [vmem:[%s6688_s13 + $0x58] sm:$0xf]  ;;  %v8188_v58 = vld [vmem:[%s6688_s13 + $0x44] sm:$0x1] }
  0xf8   : > { %v8112_v46 = vrot.slane %v3745_v48, 5  ;;  %v8129_v10 = vpop.f32.mrf.mxu1  ;;  %v8136_v48 = vsel %vm7018_vm7, %v5714_v51, %v4438_v44  ;;  %v8140_v38 = vsel %vm7018_vm7, %v4440_v4, %v4441_v22  ;;  %v3762_v51 = vrot.slane %v3760_v34, 4  ;;  %v5631_v34 = vld [vmem:[%s6688_s13 + $0x54] sm:$0xf] }
  0xf9   : > { %9459 = vst [vmem:[#allocation9_spill] sm:$0xff] %v8129_v10  ;;  %v3742_v44 = vor.u32 %v3741_v49, %v3738_v45  ;;  %v3787_v22 = vshll.u32 %v5628_v3, 16  ;;  %v4447_v13 = vrot.slane %v4445_v36, 4  ;;  %v4448_v63 = vrot.slane %v8110_v39, 5  ;;  %v5700_v49 = vld [vmem:[%s6688_s13 + $0x3c] sm:$0xe] }
  0xfa   : > { %v3752_v4 = vor.u32 %v3751_v52, %v8112_v46  ;;  %v8164_v45 = vpop.f32.mrf.mxu1  ;;  %v5715_v52 = vrot.slane %v5699_v18, 9  ;;  %v3766_v18 = vor.u32 %v3765_v19, %v3762_v51  ;;  %v9462_v6 = vcombine.low %v7877_v28, %v7893_v1 }
  0xfb   : > { %6297 = vmatmul.mubr.msk.bf16.gmra.mxu0 %vm756_vm3, %v6495_v21  ;;  %v3793_v21 = vshll.u32 %v8145_v7, 16  ;;  %9460 = vst [vmem:[#allocation8_spill] sm:$0xff] %v8164_v45  ;;  %v3789_v45 = vrot.slane %v3787_v22, 5  ;;  %v3808_v51 = vshrl.u32 %v5631_v34, 16  ;;  %v3811_v19 = vshll.u32 %v5631_v34, 16 }
  0xfc   : > { %6300 = vmatprep.mubr.msk.bf16.mxu0 %vm756_vm3, %v6496_v60  ;;  %v3755_v60 = vshll.u32 %v8110_v39, 16  ;;  %v8185_v26 = vrot.slane %v3752_v4, 4  ;;  %v3799_v39 = vrot.slane %v3797_v11, 4  ;;  %v8223_v22 = vsel %vm7018_vm7, %v4447_v13, %v4448_v63 }
  0xfd   : > { %v8193_v10 = vrot.slane %v3793_v21, 5  ;;  %v9464_v21 = vcombine.low %v7886_v25, %v7905_v14  ;;  %v4452_v25 = vrot.slane %v8123_v41, 5  ;;  %v6500_v14 = vld [vmem:[%s6688_s13 + $0x90] sm:$0xff]   ;;  %v5716_v1 = vrot.slane %v5700_v49, 9  ;;  %v5634_v41 = vld [vmem:[%s6688_s13 + $0x60] sm:$0xf] }
  0xfe   : > { %6263 = vmatmul.mubr.msk.bf16.gmra.mxu1 %vm756_vm3, %v5524_v35  ;;  %v6497_v35 = vld [vmem:[%s6688_s13 + $0x6c] sm:$0xff]   ;;  %v8178_v62 = vrot.slane %v3755_v60, 5  ;;  %v3810_v37 = vrot.slane %v3808_v51, 4 }
  0xff   : > { %6266 = vmatprep.mubr.msk.bf16.mxu1 %vm756_vm3, %v5525_v23  ;;  %v3784_v23 = vshrl.u32 %v5628_v3, 16  ;;  %v8176_v3 = vrot.slane %v3742_v44, 4  ;;  %v3775_v44 = vrot.slane %v3773_v33, 4  ;;  %v3821_v33 = vshrl.u32 %v8182_v17, 16 }
 0x100   : > { %v8174_v16 = vpop.f32.mrf.mxu0  ;;  %v3800_v13 = vor.u32 %v3799_v39, %v8193_v10  ;;  %v4459_v39 = vrot.slane %v8145_v7, 5  ;;  %v9468_v7 = vcombine.low %v7897_v43, %v7914_v2  ;;  %v9470_v43 = vcombine.low %v7918_v59, %v7928_v50  ;;  %v6501_v2 = vld [vmem:[%s6688_s13 + $0x9c] sm:$0xff]  }
 0x101   : > { %9461 = vst [vmem:[#allocation11_spill] sm:$0xff] %v8174_v16  ;;  %v3786_v60 = vrot.slane %v3784_v23, 4  ;;  %v6499_v23 = vld [vmem:[%s6688_s13 + $0x84] sm:$0xff]   ;;  %v8250_v16 = vld [vmem:[%s6688_s13 + $0x5c] sm:$0x1]  ;;  %v4466_v59 = vrot.slane %v8182_v17, 5 }
 0x102   : > { %v8211_v28 = vpop.f32.mrf.mxu0 }
 0x103   : > { %6301 = vmatmul.mubr.msk.bf16.gmra.mxu0 %vm756_vm3, %v6497_v35  ;;  %v8190_v35 = vrot.slane %v3769_v24, 5  ;;  %v3817_v24 = vshll.u32 %v8182_v17, 16  ;;  %9465 = vst [vmem:[#allocation15_spill] sm:$0xff] %v8211_v28  ;;  %v3813_v28 = vrot.slane %v3811_v19, 5 }
 0x104   : > { %6304 = vmatprep.mubr.msk.bf16.mxu0 %vm756_vm3, %v6498_v8  ;;  %v8199_v4 = vpop.f32.mrf.mxu1  ;;  %v8202_v8 = vld [vmem:[%s6688_s13 + $0x50] sm:$0x1]  ;;  %v8243_v49 = vpop.f32.mrf.mxu0 }
 0x105   : > { %9463 = vst [vmem:[#allocation10_spill] sm:$0xff] %v8199_v4  ;;  %v3776_v34 = vor.u32 %v3775_v44, %v8190_v35  ;;  %v8233_v4 = vrot.slane %v3766_v18, 4  ;;  %v8240_v11 = vrot.slane %v3817_v24, 5  ;;  %v3823_v44 = vrot.slane %v3821_v33, 4  ;;  %9467 = vst [vmem:[#allocation5_spill] sm:$0xff] %v8243_v49 }
 0x106   : > { %6267 = vmatmul.mubr.msk.bf16.gmra.mxu1 %vm756_vm3, %v9462_v6  ;;  %v8219_v6 = vsel %vm7018_vm7, %v5715_v52, %v4445_v36  ;;  %v3790_v36 = vor.u32 %v3789_v45, %v3786_v60  ;;  %v3803_v52 = vshll.u32 %v8202_v8, 16  ;;  %v8238_v63 = vpop.f32.mrf.mxu1  ;;  %v4454_v18 = vrot.slane %v4452_v25, 4  ;;  %v5701_v24 = vld [vmem:[%s6688_s13 + $0x48] sm:$0xe] }
 0x107   : > { %6270 = vmatprep.mubr.msk.bf16.mxu1 %vm756_vm3, %v9464_v21  ;;  %v3779_v21 = vshll.u32 %v8188_v58, 16  ;;  %9466 = vst [vmem:[#allocation13_spill] sm:$0xff] %v8238_v63  ;;  %v4455_v60 = vrot.slane %v8188_v58, 5  ;;  %v3777_v51 = vrot.slane %v3776_v34, 4  ;;  %v3832_v33 = vshrl.u32 %v5634_v41, 16 }
 0x108   : > { %v8256_v63 = vsel %vm7018_vm7, %v5716_v1, %v4452_v25  ;;  %v3791_v45 = vrot.slane %v3790_v36, 4  ;;  %v3801_v49 = vrot.slane %v3800_v13, 4  ;;  %v3805_v58 = vrot.slane %v3803_v52, 5  ;;  %v8271_v36 = vld [vmem:[%s6688_s13 + $0x64] sm:$0xf]  ;;  %v8278_v13 = vpop.f32.mrf.mxu0 }
 0x109   : > { %v3781_v19 = vrot.slane %v3779_v21, 5  ;;  %v3772_v34 = vsel %vm6732_vm4, %v8233_v4, %v8190_v35  ;;  %v3814_v21 = vor.u32 %v3813_v28, %v3810_v37  ;;  %v3824_v1 = vor.u32 %v3823_v44, %v8240_v11  ;;  %9471 = vst [vmem:[#allocation17_spill] sm:$0xff] %v8278_v13  ;;  %v5702_v28 = vld [vmem:[%s6688_s13 + $0x54] sm:$0xe]  ;;  %v6505_v13 = vld [vmem:[%s6688_s13 + $0xcc] sm:$0xff]  }
 0x10a   : > { %v3827_v25 = vshll.u32 %v8250_v16, 16  ;;  %v8282_v52 = vsel %vm7018_vm7, %v4454_v18, %v4455_v60  ;;  %v5717_v35 = vrot.slane %v5701_v24, 9  ;;  %v4461_v37 = vrot.slane %v4459_v39, 4 }
 0x10b   : > { %6305 = vmatmul.mubr.msk.bf16.gmra.mxu0 %vm756_vm3, %v6499_v23  ;;  %v3835_v23 = vshll.u32 %v5634_v41, 16  ;;  %v4462_v4 = vrot.slane %v8202_v8, 5  ;;  %v6502_v41 = vld [vmem:[%s6688_s13 + $0xa8] sm:$0xff]   ;;  %v3782_v44 = vsel %vm6732_vm4, %v3777_v51, %v3781_v19  ;;  %v3834_v50 = vrot.slane %v3832_v33, 4 }
 0x10c   : > { %6308 = vmatprep.mubr.msk.bf16.mxu0 %vm756_vm3, %v6500_v14  ;;  %v8262_v14 = vpop.f32.mrf.mxu1  ;;  %v3806_v18 = vsel %vm6732_vm4, %v3801_v49, %v3805_v58  ;;  %v3841_v60 = vshll.u32 %v8271_v36, 16  ;;  %v3845_v8 = vshrl.u32 %v8271_v36, 16  ;;  %v3825_v51 = vrot.slane %v3824_v1, 4  ;;  %v8300_v33 = vld [vmem:[%s6688_s13 + $0x68] sm:$0x1] }
 0x10d   : > { %9469 = vst [vmem:[#allocation16_spill] sm:$0xff] %v8262_v14  ;;  %v3815_v14 = vrot.slane %v3814_v21, 4  ;;  %v3829_v17 = vrot.slane %v3827_v25, 5  ;;  %v5718_v19 = vrot.slane %v5702_v28, 9  ;;  %v9474_v49 = vsel %vm6732_vm4, %v8185_v26, %v8178_v62  ;;  %v5637_v25 = vld [vmem:[%s6688_s13 + $0x6c] sm:$0xf] }
 0x10e   : > { %6271 = vmatmul.mubr.msk.bf16.gmra.mxu1 %vm756_vm3, %v9468_v7  ;;  %v3837_v7 = vrot.slane %v3835_v23, 5  ;;  %v8297_v24 = vpop.f32.mrf.mxu1  ;;  %v8321_v21 = vsel %vm7018_vm7, %v5717_v35, %v4459_v39  ;;  %v8325_v1 = vsel %vm7018_vm7, %v4461_v37, %v4462_v4  ;;  %v8328_v62 = vcombine.low %v3772_v34, %v3782_v44  ;;  %v5703_v4 = vld [vmem:[%s6688_s13 + $0x60] sm:$0xe]  ;;  %v5643_v44 = vld [vmem:[%s6688_s13 + $0x84] sm:$0xf] }
 0x10f   : > { %6274 = vmatprep.mubr.msk.bf16.mxu1 %vm756_vm3, %v9470_v43  ;;  %v3796_v43 = vsel %vm6732_vm4, %v3791_v45, %v8193_v10  ;;  %9472 = vst [vmem:[#allocation18_spill] sm:$0xff] %v8297_v24  ;;  %v9475_v45 = vsel %vm6732_vm4, %v8176_v3, %v8112_v46  ;;  %v4468_v46 = vrot.slane %v4466_v59, 4  ;;  %v4469_v3 = vrot.slane %v8250_v16, 5 }
 0x110   : > { %v8315_v23 = vcombine.low %v9475_v45, %v9474_v49  ;;  %9476 = vst [vmem:[#allocation14_spill] sm:$0xff] %v8328_v62  ;;  %v3838_v26 = vor.u32 %v3837_v7, %v3834_v50  ;;  %v8335_v28 = vcombine.low %v3796_v43, %v3806_v18  ;;  %v8337_v39 = vrot.slane %v3841_v60, 5 }
 0x111   : > { %v8303_v10 = vpop.f32.mrf.mxu0  ;;  %v8339_v35 = vrot.slane %v3845_v8, 4  ;;  %v3851_v37 = vshll.u32 %v8300_v33, 16  ;;  %v9478_v34 = vcombine.low %v7936_v54, %v7951_v56  ;;  %v3820_v50 = vsel %vm6732_vm4, %v3815_v14, %v8240_v11  ;;  %v5640_v54 = vld [vmem:[%s6688_s13 + $0x78] sm:$0xf] }
 0x112   : > { %9473 = vst [vmem:[#allocation12_spill] sm:$0xff] %v8303_v10  ;;  %9477 = vst [vmem:[#allocation19_spill] sm:$0xff] %v8335_v28  ;;  %v3830_v7 = vsel %vm6732_vm4, %v3825_v51, %v3829_v17  ;;  %v8359_v43 = vsel %vm7018_vm7, %v5718_v19, %v4466_v59  ;;  %v9480_v56 = vcombine.low %v7943_v29, %v7964_v42  ;;  %v3856_v60 = vshrl.u32 %v5637_v25, 16  ;;  %v8371_v51 = vld [vmem:[%s6688_s13 + $0x7c] sm:$0xf]  ;;  %v6504_v59 = vld [vmem:[%s6688_s13 + $0xc0] sm:$0xff]  }
 0x113   : > { %6309 = vmatmul.mubr.msk.bf16.gmra.mxu0 %vm756_vm3, %v6501_v2  ;;  %v8333_v2 = vld [vmem:[%s6688_s13 + $0x70] sm:$0xf]  ;;  %v8366_v18 = vpop.f32.mrf.mxu0  ;;  %v3859_v8 = vshll.u32 %v5637_v25, 16  ;;  %v8376_v17 = vsel %vm7018_vm7, %v4468_v46, %v4469_v3  ;;  %v8378_v29 = vrot.slane %v3838_v26, 4  ;;  %v5719_v42 = vrot.slane %v5703_v4, 9 }
 0x114   : > { %6312 = vmatprep.mubr.msk.bf16.mxu0 %vm756_vm3, %v6502_v41  ;;  %v6503_v41 = vld [vmem:[%s6688_s13 + $0xb4] sm:$0xff]   ;;  %9481 = vst [vmem:[#allocation21_spill] sm:$0xff] %v8366_v18  ;;  %v3865_v11 = vshll.u32 %v8333_v2, 16  ;;  %v3869_v14 = vshrl.u32 %v8333_v2, 16  ;;  %v4473_v19 = vrot.slane %v8271_v36, 5  ;;  %v8381_v49 = vcombine.low %v3820_v50, %v3830_v7 }
 0x115   : > { %v3848_v45 = vor.u32 %v8339_v35, %v8337_v39  ;;  %v8385_v25 = vrot.slane %v3851_v37, 5  ;;  %v3880_v46 = vshrl.u32 %v5640_v54, 16  ;;  %v3883_v3 = vshll.u32 %v5640_v54, 16  ;;  %v8397_v4 = vld [vmem:[%s6688_s13 + $0x88] sm:$0xf]  ;;  %v8400_v35 = vpop.f32.mrf.mxu0 }
 0x116   : > { %6275 = vmatmul.mubr.msk.bf16.gmra.mxu1 %vm756_vm3, %v9478_v34  ;;  %v8347_v16 = vpop.f32.mrf.mxu1  ;;  %9482 = vst [vmem:[#allocation22_spill] sm:$0xff] %v8381_v49  ;;  %v4476_v34 = vrot.slane %v8300_v33, 5  ;;  %v3889_v36 = vshll.u32 %v8371_v51, 16  ;;  %v3893_v26 = vshrl.u32 %v8371_v51, 16  ;;  %9484 = vst [vmem:[#allocation24_spill] sm:$0xff] %v8400_v35  ;;  %v3858_v33 = vrot.slane %v3856_v60, 4 }
 0x117   : > { %9479 = vst [vmem:[#allocation20_spill] sm:$0xff] %v8347_v16  ;;  %6278 = vmatprep.mubr.msk.bf16.mxu1 %vm756_vm3, %v9480_v56  ;;  %v8389_v56 = vld [vmem:[%s6688_s13 + $0x74] sm:$0x1]  ;;  %v3861_v37 = vrot.slane %v3859_v8, 5  ;;  %v8402_v50 = vrot.slane %v3865_v11, 5  ;;  %v3871_v7 = vrot.slane %v3869_v14, 4  ;;  %v9485_v54 = vcombine.low %v7955_v30, %v7971_v55  ;;  %v8430_v49 = vpop.f32.mrf.mxu0 }
 0x118   : > { %v8392_v58 = vpop.f32.mrf.mxu1  ;;  %v4475_v16 = vrot.slane %v4473_v19, 4  ;;  %v8415_v60 = vld [vmem:[%s6688_s13 + $0x80] sm:$0x1]  ;;  %v8418_v8 = vld [vmem:[%s6688_s13 + $0x6c] sm:$0xe]  ;;  %v3904_v11 = vshrl.u32 %v5643_v44, 16 }
 0x119   : > { %9483 = vst [vmem:[#allocation23_spill] sm:$0xff] %v8392_v58  ;;  %v8411_v58 = vsel %vm7018_vm7, %v5719_v42, %v4473_v19  ;;  %v3907_v14 = vshll.u32 %v5643_v44, 16  ;;  %v3917_v24 = vshrl.u32 %v8397_v4, 16  ;;  %v3882_v19 = vrot.slane %v3880_v46, 4  ;;  %9487 = vst [vmem:[#allocation26_spill] sm:$0xff] %v8430_v49 }
 0x11a   : > { %v8426_v42 = vpop.f32.mrf.mxu1  ;;  %v3885_v35 = vrot.slane %v3883_v3, 5  ;;  %v8428_v18 = vrot.slane %v3889_v36, 5  ;;  %v3895_v10 = vrot.slane %v3893_v26, 4  ;;  %v9488_v44 = vcombine.low %v7975_v15, %v8003_v32  ;;  %v8449_v32 = vld [vmem:[%s6688_s13 + $0x8c] sm:$0x1] }
 0x11b   : > { %6313 = vmatmul.mubr.msk.bf16.gmra.mxu0 %vm756_vm3, %v6503_v41  ;;  %v3875_v41 = vshll.u32 %v8389_v56, 16  ;;  %9486 = vst [vmem:[#allocation25_spill] sm:$0xff] %v8426_v42  ;;  %v3862_v30 = vor.u32 %v3861_v37, %v3858_v33  ;;  %v3872_v55 = vor.u32 %v3871_v7, %v8402_v50  ;;  %v3899_v46 = vshll.u32 %v8415_v60, 16  ;;  %v5705_v33 = vld [vmem:[%s6688_s13 + $0x78] sm:$0xe] }
 0x11c   : > { %6316 = vmatprep.mubr.msk.bf16.mxu0 %vm756_vm3, %v6504_v59  ;;  %v3913_v59 = vshll.u32 %v8397_v4, 16  ;;  %v8440_v3 = vrot.slane %v3848_v45, 4  ;;  %v8444_v36 = vsel %vm7018_vm7, %v4475_v16, %v4476_v34  ;;  %v5720_v26 = vrot.slane %v8418_v8, 9  ;;  %v8454_v42 = vpop.f32.mrf.mxu1  ;;  %v5646_v8 = vld [vmem:[%s6688_s13 + $0x90] sm:$0xf] }
 0x11d   : > { %v4487_v15 = vrot.slane %v8371_v51, 5  ;;  %v3906_v37 = vrot.slane %v3904_v11, 4  ;;  %v3909_v7 = vrot.slane %v3907_v14, 5  ;;  %9489 = vst [vmem:[#allocation27_spill] sm:$0xff] %v8454_v42  ;;  %v3877_v45 = vrot.slane %v3875_v41, 5 }
 0x11e   : > { %6279 = vmatmul.mubr.msk.bf16.gmra.mxu1 %vm756_vm3, %v9485_v54  ;;  %v4480_v54 = vrot.slane %v8333_v2, 5  ;;  %v8452_v2 = vrot.slane %v3913_v59, 5  ;;  %v4483_v49 = vrot.slane %v8389_v56, 5  ;;  %v3886_v16 = vor.u32 %v3885_v35, %v3882_v19  ;;  %v8463_v59 = vld [vmem:[%s6688_s13 + $0x94] sm:$0xf] }
 0x11f   : > { %6282 = vmatprep.mubr.msk.bf16.mxu1 %vm756_vm3, %v9488_v44  ;;  %v3919_v44 = vrot.slane %v3917_v24, 4  ;;  %v3896_v34 = vor.u32 %v3895_v10, %v8428_v18  ;;  %v3863_v51 = vrot.slane %v3862_v30, 4  ;;  %v3873_v11 = vrot.slane %v3872_v55, 4 }
 0x120   : > { %v4482_v62 = vrot.slane %v4480_v54, 4  ;;  %v3901_v14 = vrot.slane %v3899_v46, 5  ;;  %v9490_v24 = vcombine.low %v8096_v61, %v8100_v40  ;;  %v5721_v56 = vrot.slane %v5705_v33, 9 }
 0x121   : > { %v4489_v35 = vrot.slane %v4487_v15, 4  ;;  %v4490_v10 = vrot.slane %v8415_v60, 5  ;;  %v3923_v41 = vshll.u32 %v8449_v32, 16  ;;  %v3920_v30 = vor.u32 %v3919_v44, %v8452_v2 }
 0x122   : > { %v3928_v55 = vshrl.u32 %v5646_v8, 16  ;;  %v3931_v46 = vshll.u32 %v5646_v8, 16  ;;  %v9492_v61 = vcombine.low %v8015_v9, %v8020_v47  ;;  %v3887_v40 = vrot.slane %v3886_v16, 4 }
 0x123   : > { %v8459_v28 = vpop.f32.mrf.mxu0  ;;  %6317 = vmatmul.mubr.msk.bf16.gmra.mxu0 %vm756_vm3, %v6505_v13  ;;  %v3910_v13 = vor.u32 %v3909_v7, %v3906_v37  ;;  %v3897_v33 = vrot.slane %v3896_v34, 4  ;;  %v3937_v60 = vshll.u32 %v8463_v59, 16  ;;  %v3854_v37 = vsel %vm6732_vm4, %v8440_v3, %v8385_v25 }
 0x124   : > { %6356 = vmatprep.mubr.msk.bf16.mxu0 %vm756_vm3, %v9490_v24  ;;  %v3941_v24 = vshrl.u32 %v8463_v59, 16  ;;  %v3868_v9 = vsel %vm6732_vm4, %v3863_v51, %v8402_v50  ;;  %v8495_v47 = vsel %vm7018_vm7, %v5720_v26, %v4480_v54  ;;  %v8499_v7 = vsel %vm7018_vm7, %v4482_v62, %v4483_v49  ;;  %v5706_v54 = vld [vmem:[%s6688_s13 + $0x84] sm:$0xe]  ;;  %v9531_v31 = vld [vmem:[#allocation27_spill] sm:$0xff] }
 0x125   : > { %v8471_v19 = vpop.f32.mrf.mxu0  ;;  %v8507_v25 = vsel %vm7018_vm7, %v5721_v56, %v4487_v15  ;;  %v8511_v50 = vsel %vm7018_vm7, %v4489_v35, %v4490_v10  ;;  %v3925_v3 = vrot.slane %v3923_v41, 5  ;;  %v3911_v62 = vrot.slane %v3910_v13, 4  ;;  %v8535_v13 = vld [vmem:[%s6688_s13 + $0x98] sm:$0x1] }
 0x126   : > { %9491 = vst [vmem:[#allocation28_spill] sm:$0xff] %v8471_v19  ;;  %v8474_v42 = vpop.f32.mrf.mxu1  ;;  %6283 = vmatmul.mubr.msk.bf16.gmra.mxu1 %vm756_vm3, %v9492_v61  ;;  %v3921_v49 = vrot.slane %v3920_v30, 4  ;;  %v3930_v16 = vrot.slane %v3928_v55, 4  ;;  %v3933_v34 = vrot.slane %v3931_v46, 5  ;;  %v3892_v15 = vsel %vm6732_vm4, %v3887_v40, %v8428_v18  ;;  %v5649_v30 = vld [vmem:[%s6688_s13 + $0x9c] sm:$0xf] }
 0x127   : > { %v8482_v19 = vpop.f32.mrf.mxu0  ;;  %6322 = vmatprep.mubr.msk.bf16.mxu1 %vm756_vm3, %v8166_v27  ;;  %v3878_v27 = vsel %vm6732_vm4, %v3873_v11, %v3877_v45  ;;  %v3902_v45 = vsel %vm6732_vm4, %v3897_v33, %v3901_v14  ;;  %v8523_v51 = vrot.slane %v3937_v60, 5  ;;  %v3943_v11 = vrot.slane %v3941_v24, 4  ;;  %v8566_v24 = vld [vmem:[%s6688_s13 + $0xa0] sm:$0xf] }
 0x128   : > { %v8501_v44 = vpop.f32.mrf.mxu1  ;;  %v9493_v35 = vcombine.low %v8136_v48, %v8140_v38  ;;  %v5735_v10 = vcombine.low %v8359_v43, %v8376_v17  ;;  %v5736_v41 = vcombine.low %v8411_v58, %v8444_v36  ;;  %v5722_v18 = vrot.slane %v5706_v54, 9 }
 0x129   : > { %v8514_v26 = vpop.f32.mrf.mxu0  ;;  %v4494_v14 = vrot.slane %v8397_v4, 5  ;;  %v9494_v48 = vcombine.low %v8219_v6, %v8223_v22  ;;  %v9495_v38 = vsel %vm6732_vm4, %v8378_v29, %v8337_v39  ;;  %v8551_v61 = vcombine.low %v3868_v9, %v3878_v27  ;;  %v5707_v29 = vld [vmem:[%s6688_s13 + $0x90] sm:$0xe]  ;;  %v9502_v4 = vld [vmem:[#allocation5_spill] sm:$0xff] }
 0x12a   : > { %v8516_v8 = vpop.f32.mrf.mxu1  ;;  %v8549_v46 = vcombine.low %v9495_v38, %v3854_v37  ;;  %v8557_v60 = vcombine.low %v3892_v15, %v3902_v45  ;;  %v3916_v6 = vsel %vm6732_vm4, %v3911_v62, %v8452_v2  ;;  %v3926_v22 = vsel %vm6732_vm4, %v3921_v49, %v3925_v3 }
 0x12b   : > { %v6154_v56 = vpop.f32.mrf.mxu0  ;;  %6357 = vmatmul.mubr.msk.bf16.vlgmr.msra.gmra.mxu0 %vm756_vm3, %v9493_v35  ;;  %v3934_v39 = vor.u32 %v3933_v34, %v3930_v16  ;;  %v3944_v9 = vor.u32 %v3943_v11, %v8523_v51  ;;  %v3947_v27 = vshll.u32 %v8535_v13, 16  ;;  %v3952_v54 = vshrl.u32 %v5649_v30, 16 }
 0x12c   : > { %v8538_v55 = vpop.f32.mrf.mxu1  ;;  %6360 = vmatprep.mubr.msk.bf16.mxu0 %vm756_vm3, %v9494_v48  ;;  %v3955_v15 = vshll.u32 %v5649_v30, 16  ;;  %v8577_v3 = vsel %vm7018_vm7, %v5722_v18, %v4494_v14  ;;  %v4496_v62 = vrot.slane %v4494_v14, 4  ;;  %v4497_v49 = vrot.slane %v8449_v32, 5 }
 0x12d   : > { %v1560_v33 = vpop.f32.mrf.mxu0  ;;  %v5723_v16 = vrot.slane %v5707_v29, 9  ;;  %v4501_v34 = vrot.slane %v8463_v59, 5  ;;  %v3961_v11 = vshll.u32 %v8566_v24, 16  ;;  %v3965_v35 = vshrl.u32 %v8566_v24, 16 }
 0x12e   : > { %v6120_v37 = vpop.f32.mrf.mxu1  ;;  %6323 = vmatmul.mubr.msk.bf16.vlgmr.msra.gmra.mxu1 %vm756_vm3, %v8168_v57  ;;  %v8586_v48 = vcombine.low %v3916_v6, %v3926_v22  ;;  %v8588_v18 = vrot.slane %v3934_v39, 4  ;;  %v3945_v32 = vrot.slane %v3944_v9, 4  ;;  %v3949_v38 = vrot.slane %v3947_v27, 5  ;;  %v5652_v22 = vld [vmem:[%s6688_s13 + $0xa8] sm:$0xf] }
 0x12f   : > { %v1144_v45 = vadd.f32 %v6120_v37, %v8064_v5  ;;  %v6155_v2 = vpop.f32.mrf.mxu0  ;;  %6326 = vmatprep.mubr.msk.bf16.mxu1 %vm756_vm3, %v8315_v23  ;;  %v3954_v29 = vrot.slane %v3952_v54, 4  ;;  %v3957_v59 = vrot.slane %v3955_v15, 5  ;;  %v4504_v6 = vrot.slane %v8535_v13, 5  ;;  %v8614_v27 = vld [vmem:[%s6688_s13 + $0xac] sm:$0xf] }
 0x130   : > { %v1135_v57 = vpop.f32.mrf.mxu1  ;;  %v3967_v9 = vrot.slane %v3965_v35, 4  ;;  %v9499_v35 = vld [vmem:[#allocation11_spill] sm:$0xff] }
 0x131   : > { %v8583_v5 = vadd.f32 %v6154_v56, %v1144_v45  ;;  %v1136_v23 = vadd.f32 %v1135_v57, %v8088_v20  ;;  %v1563_v30 = vpop.f32.mrf.mxu0  ;;  %v9496_v45 = vcombine.low %v8256_v63, %v8282_v52  ;;  %v8599_v20 = vsel %vm7018_vm7, %v4496_v62, %v4497_v49  ;;  %v5708_v62 = vld [vmem:[%s6688_s13 + $0x9c] sm:$0xe] }
 0x132   : > { %v6121_v14 = vpop.f32.mrf.mxu1  ;;  %v4503_v63 = vrot.slane %v4501_v34, 4  ;;  %v8611_v52 = vrot.slane %v3961_v11, 5  ;;  %v4508_v49 = vrot.slane %v8566_v24, 5  ;;  %v3985_v24 = vshll.u32 %v8614_v27, 16 }
 0x133   : > { %v8590_v37 = vadd.f32 %v1560_v33, %v1136_v23  ;;  %v1147_v40 = vadd.f32 %v6121_v14, %v8107_v53  ;;  %v6158_v56 = vpop.f32.mrf.mxu0  ;;  %6361 = vmatmul.mubr.msk.bf16.gmra.mxu0 %vm756_vm3, %v9496_v45  ;;  %v9497_v33 = vcombine.low %v8321_v21, %v8325_v1  ;;  %v8609_v53 = vsel %vm7018_vm7, %v5723_v16, %v4501_v34  ;;  %v5651_v1 = vld [vmem:[%s6688_s13 + $0xa4] sm:$0x1]  ;;  %v9498_v16 = vld [vmem:[#allocation14_spill] sm:$0xff] }
 0x134   : > { %v1138_v39 = vpop.f32.mrf.mxu1  ;;  %v3940_v21 = vsel %vm6732_vm4, %v8588_v18, %v8523_v51  ;;  %v3976_v34 = vshrl.u32 %v5652_v22, 16  ;;  %v9500_v51 = vld [vmem:[#allocation19_spill] sm:$0xff]  ;;  %v3989_v18 = vshrl.u32 %v8614_v27, 16 }
 0x135   : > { %6364 = vmatprep.mubr.msk.bf16.mxu0 %vm756_vm3, %v9497_v33  ;;  %v8616_v54 = vadd.f32 %v6155_v2, %v1147_v40  ;;  %v1139_v13 = vadd.f32 %v1138_v39, %v8152_v12  ;;  %v1576_v15 = vpop.f32.mrf.mxu0  ;;  %v3950_v40 = vsel %vm6732_vm4, %v3945_v32, %v3949_v38  ;;  %v3958_v2 = vor.u32 %v3957_v59, %v3954_v29  ;;  %v9501_v59 = vld [vmem:[#allocation15_spill] sm:$0xff] }
 0x136   : > { %v6124_v57 = vpop.f32.mrf.mxu1  ;;  %6327 = vmatmul.mubr.msk.bf16.gmra.mxu1 %vm756_vm3, %v9498_v16  ;;  %v3979_v12 = vshll.u32 %v5652_v22, 16  ;;  %v8639_v39 = vsel %vm7018_vm7, %v4503_v63, %v4504_v6  ;;  %v3968_v32 = vor.u32 %v3967_v9, %v8611_v52  ;;  %v3971_v38 = vshll.u32 %v5651_v1, 16 }
 0x137   : > { %v8630_v11 = vadd.f32 %v1563_v30, %v1139_v13  ;;  %v1160_v23 = vadd.f32 %v6124_v57, %v9499_v35  ;;  %v6159_v14 = vpop.f32.mrf.mxu0  ;;  %6330 = vmatprep.mubr.msk.bf16.mxu1 %vm756_vm3, %v9500_v51  ;;  %v5724_v30 = vrot.slane %v5708_v62, 9  ;;  %v4510_v13 = vrot.slane %v4508_v49, 4 }
 0x138   : > { %v1151_v45 = vpop.f32.mrf.mxu1  ;;  %v4511_v57 = vrot.slane %v5651_v1, 5  ;;  %v8647_v51 = vrot.slane %v3958_v2, 4  ;;  %v3978_v6 = vrot.slane %v3976_v34, 4  ;;  %v3981_v63 = vrot.slane %v3979_v12, 5  ;;  %v8657_v1 = vld [vmem:[%s6688_s13 + $0xb0] sm:$0x1] }
 0x139   : > { %v8642_v29 = vadd.f32 %v6158_v56, %v1160_v23  ;;  %v1152_v22 = vadd.f32 %v1151_v45, %v9501_v59  ;;  %v1579_v33 = vpop.f32.mrf.mxu0  ;;  %v8659_v23 = vrot.slane %v3985_v24, 5  ;;  %v3991_v2 = vrot.slane %v3989_v18, 4  ;;  %v9503_v12 = vld [vmem:[#allocation17_spill] sm:$0xff] }
 0x13a   : > { %v6125_v16 = vpop.f32.mrf.mxu1  ;;  %v8669_v43 = vrot.slane %v3968_v32, 4  ;;  %v8671_v17 = vrot.slane %v3971_v38, 5  ;;  %v8679_v58 = vsel %vm7018_vm7, %v5724_v30, %v4508_v49  ;;  %v8683_v36 = vsel %vm7018_vm7, %v4510_v13, %v4511_v57  ;;  %v8695_v30 = vld [vmem:[%s6688_s13 + $0xb8] sm:$0xf] }
 0x13b   : > { %v8649_v9 = vadd.f32 %v1576_v15, %v1152_v22  ;;  %v1163_v62 = vadd.f32 %v6125_v16, %v9502_v4  ;;  %v6162_v56 = vpop.f32.mrf.mxu0  ;;  %6365 = vmatmul.mubr.msk.bf16.gmra.mxu0 %vm756_vm3, %v5735_v10  ;;  %v8665_v15 = vcombine.low %v3940_v21, %v3950_v40  ;;  %v5709_v10 = vld [vmem:[%s6688_s13 + $0xa8] sm:$0xe]  ;;  %v3982_v32 = vor.u32 %v3981_v63, %v3978_v6  ;;  %v9505_v22 = vld [vmem:[#allocation12_spill] sm:$0xff] }
 0x13c   : > { %v1154_v45 = vpop.f32.mrf.mxu1  ;;  %6368 = vmatprep.mubr.msk.bf16.mxu0 %vm756_vm3, %v5736_v41  ;;  %v5655_v41 = vld [vmem:[%s6688_s13 + $0xb4] sm:$0xf]  ;;  %v9504_v40 = vld [vmem:[#allocation22_spill] sm:$0xff]  ;;  %v3995_v38 = vshll.u32 %v8657_v1, 16  ;;  %v4515_v49 = vrot.slane %v8614_v27, 5  ;;  %v3992_v16 = vor.u32 %v3991_v2, %v8659_v23  ;;  %v3974_v27 = vsel %vm6732_vm4, %v8669_v43, %v8671_v17 }
 0x13d   : > { %v8674_v34 = vadd.f32 %v6159_v14, %v1163_v62  ;;  %v1155_v24 = vadd.f32 %v1154_v45, %v9503_v12  ;;  %v1592_v18 = vpop.f32.mrf.mxu0  ;;  %v5725_v62 = vrot.slane %v5709_v10, 9  ;;  %v4000_v6 = vshrl.u32 %v5655_v41, 16 }
 0x13e   : > { %v6128_v21 = vpop.f32.mrf.mxu1  ;;  %6331 = vmatmul.mubr.msk.bf16.gmra.mxu1 %vm756_vm3, %v9504_v40  ;;  %v4003_v63 = vshll.u32 %v5655_v41, 16  ;;  %v4009_v2 = vshll.u32 %v8695_v30, 16  ;;  %v4013_v10 = vshrl.u32 %v8695_v30, 16  ;;  %v5658_v40 = vld [vmem:[%s6688_s13 + $0xc0] sm:$0xf]  ;;  %v3983_v4 = vrot.slane %v3982_v32, 4 }
 0x13f   : > { %v8697_v59 = vadd.f32 %v1579_v33, %v1155_v24  ;;  %v1176_v13 = vadd.f32 %v6128_v21, %v9505_v22  ;;  %v6163_v57 = vpop.f32.mrf.mxu0  ;;  %6334 = vmatprep.mubr.msk.bf16.mxu1 %vm756_vm3, %v8549_v46  ;;  %v9507_v24 = vld [vmem:[#allocation21_spill] sm:$0xff]  ;;  %v3997_v43 = vrot.slane %v3995_v38, 5  ;;  %v4517_v17 = vrot.slane %v4515_v49, 4 }
 0x140   : > { %v1167_v45 = vpop.f32.mrf.mxu1  ;;  %v4518_v33 = vrot.slane %v8657_v1, 5  ;;  %v8725_v14 = vsel %vm7018_vm7, %v5725_v62, %v4515_v49  ;;  %v8728_v32 = vld [vmem:[%s6688_s13 + $0xc4] sm:$0xf]  ;;  %v9511_v1 = vcombine.low %v8507_v25, %v8511_v50  ;;  %v8740_v62 = vrot.slane %v4009_v2, 5 }
 0x141   : > { %v8709_v12 = vadd.f32 %v6162_v56, %v1176_v13  ;;  %v1168_v21 = vadd.f32 %v1167_v45, %v9507_v24  ;;  %v1595_v46 = vpop.f32.mrf.mxu0  ;;  %v9509_v56 = vld [vmem:[#allocation24_spill] sm:$0xff]  ;;  %v9510_v45 = vcombine.low %v8495_v47, %v8499_v7  ;;  %v3993_v24 = vrot.slane %v3992_v16, 4  ;;  %v9512_v16 = vld [vmem:[#allocation26_spill] sm:$0xff] }
 0x142   : > { %v6129_v22 = vpop.f32.mrf.mxu1  ;;  %v4024_v47 = vshrl.u32 %v5658_v40, 16  ;;  %v4027_v7 = vshll.u32 %v5658_v40, 16  ;;  %v3988_v25 = vsel %vm6732_vm4, %v3983_v4, %v8659_v23  ;;  %v8749_v50 = vsel %vm7018_vm7, %v4517_v17, %v4518_v33  ;;  %v5710_v40 = vld [vmem:[%s6688_s13 + $0xb4] sm:$0xe] }
 0x143   : > { %9506 = vst [vmem:[#allocation14_spill] sm:$0xff] %v8709_v12  ;;  %v8716_v35 = vadd.f32 %v1592_v18, %v1168_v21  ;;  %v1179_v41 = vadd.f32 %v6129_v22, %v9509_v56  ;;  %v6166_v13 = vpop.f32.mrf.mxu0  ;;  %6369 = vmatmul.mubr.msk.bf16.gmra.mxu0 %vm756_vm3, %v9510_v45  ;;  %v8735_v18 = vld [vmem:[%s6688_s13 + $0xbc] sm:$0x1]  ;;  %v4002_v21 = vrot.slane %v4000_v6, 4  ;;  %v4005_v22 = vrot.slane %v4003_v63, 5 }
 0x144   : > { %v1170_v38 = vpop.f32.mrf.mxu1  ;;  %6372 = vmatprep.mubr.msk.bf16.mxu0 %vm756_vm3, %v9511_v1  ;;  %v4037_v6 = vshrl.u32 %v8728_v32, 16  ;;  %v4019_v23 = vshll.u32 %v8735_v18, 16  ;;  %v4522_v17 = vrot.slane %v8695_v30, 5  ;;  %v9513_v1 = vld [vmem:[#allocation28_spill] sm:$0xff] }
 0x145   : > { %9508 = vst [vmem:[#allocation11_spill] sm:$0xff] %v8716_v35  ;;  %v8737_v56 = vadd.f32 %v6163_v57, %v1179_v41  ;;  %v1171_v45 = vadd.f32 %v1170_v38, %v9512_v16  ;;  %v1608_v49 = vpop.f32.mrf.mxu0  ;;  %v4015_v35 = vrot.slane %v4013_v10, 4  ;;  %v4033_v57 = vshll.u32 %v8728_v32, 16 }
 0x146   : > { %v6132_v12 = vpop.f32.mrf.mxu1  ;;  %6335 = vmatmul.mubr.msk.bf16.gmra.mxu1 %vm756_vm3, %v8551_v61  ;;  %v3998_v61 = vsel %vm6732_vm4, %v3993_v24, %v3997_v43  ;;  %v4006_v33 = vor.u32 %v4005_v22, %v4002_v21  ;;  %v4026_v41 = vrot.slane %v4024_v47, 4  ;;  %v4029_v38 = vrot.slane %v4027_v7, 5 }
 0x147   : > { %v8753_v63 = vadd.f32 %v1595_v46, %v1171_v45  ;;  %v1192_v2 = vadd.f32 %v6132_v12, %v8459_v28  ;;  %v6167_v10 = vpop.f32.mrf.mxu0  ;;  %6338 = vmatprep.mubr.msk.bf16.mxu1 %vm756_vm3, %v8557_v60  ;;  %v9514_v60 = vsel %vm6732_vm4, %v8647_v51, %v8611_v52  ;;  %v4016_v24 = vor.u32 %v4015_v35, %v8740_v62 }
 0x148   : > { %v1183_v4 = vpop.f32.mrf.mxu1  ;;  %v8771_v43 = vcombine.low %v9514_v60, %v3974_v27  ;;  %v8774_v30 = vcombine.low %v3988_v25, %v3998_v61  ;;  %v8778_v22 = vrot.slane %v4033_v57, 5  ;;  %v4039_v47 = vrot.slane %v4037_v6, 4  ;;  %v5660_v27 = vld [vmem:[%s6688_s13 + $0xc8] sm:$0x1] }
 0x149   : > { %v8763_v46 = vadd.f32 %v6166_v13, %v1192_v2  ;;  %v1184_v28 = vadd.f32 %v1183_v4, %v9513_v1  ;;  %v1611_v12 = vpop.f32.mrf.mxu0  ;;  %v5742_v13 = vcombine.low %v8725_v14, %v8749_v50  ;;  %v9515_v52 = vcombine.low %v8577_v3, %v8599_v20  ;;  %v5661_v14 = vld [vmem:[%s6688_s13 + $0xcc] sm:$0xf]  ;;  %v8799_v20 = vld [vmem:[%s6688_s13 + $0xd0] sm:$0xf]  ;;  %v5711_v4 = vld [vmem:[%s6688_s13 + $0xc0] sm:$0xe] }
 0x14a   : > { %v6133_v21 = vpop.f32.mrf.mxu1  ;;  %v8787_v35 = vrot.slane %v4019_v23, 5  ;;  %v5726_v51 = vrot.slane %v5710_v40, 9  ;;  %v9516_v50 = vcombine.low %v8609_v53, %v8639_v39  ;;  %v4525_v57 = vrot.slane %v8735_v18, 5 }
 0x14b   : > { %v8780_v7 = vadd.f32 %v1608_v49, %v1184_v28  ;;  %v1195_v16 = vadd.f32 %v6133_v21, %v8482_v19  ;;  %v6170_v45 = vpop.f32.mrf.mxu0  ;;  %6373 = vmatmul.mubr.msk.bf16.gmra.mxu0 %vm756_vm3, %v9515_v52  ;;  %v8795_v49 = vrot.slane %v4006_v33, 4  ;;  %v4524_v19 = vrot.slane %v4522_v17, 4 }
 0x14c   : > { %v1186_v25 = vpop.f32.mrf.mxu1  ;;  %6376 = vmatprep.mubr.msk.bf16.mxu0 %vm756_vm3, %v9516_v50  ;;  %v4030_v3 = vor.u32 %v4029_v38, %v4026_v41  ;;  %v8804_v23 = vrot.slane %v4016_v24, 4  ;;  %v4529_v53 = vrot.slane %v8728_v32, 5  ;;  %v4040_v33 = vor.u32 %v4039_v47, %v8778_v22 }
 0x14d   : > { %v8801_v6 = vadd.f32 %v6167_v10, %v1195_v16  ;;  %v1187_v2 = vadd.f32 %v1186_v25, %v8514_v26  ;;  %v1624_v61 = vpop.f32.mrf.mxu0  ;;  %v4043_v18 = vshll.u32 %v5660_v27, 16  ;;  %v4048_v40 = vshrl.u32 %v5661_v14, 16  ;;  %v9519_v10 = vld [vmem:[#allocation7_spill] sm:$0xff]  ;;  %v9520_v16 = vld [vmem:[#allocation6_spill] sm:$0xff] }
 0x14e   : > { %v6136_v39 = vpop.f32.mrf.mxu1  ;;  %6339 = vmatmul.mubr.msk.bf16.gmra.mxu1 %vm756_vm3, %v8586_v48  ;;  %v4051_v41 = vshll.u32 %v5661_v14, 16  ;;  %v4057_v28 = vshll.u32 %v8799_v20, 16  ;;  %v4061_v32 = vshrl.u32 %v8799_v20, 16  ;;  %v4523_v48 = vsel %vm7018_vm7, %v5726_v51, %v4522_v17  ;;  %v9521_v17 = vld [vmem:[#allocation9_spill] sm:$0xff] }
 0x14f   : > { %9517 = vst [vmem:[#allocation19_spill] sm:$0xff] %v8801_v6  ;;  %v8811_v38 = vadd.f32 %v1611_v12, %v1187_v2  ;;  %v1208_v1 = vadd.f32 %v6136_v39, %v9519_v10  ;;  %v6171_v26 = vpop.f32.mrf.mxu0  ;;  %6342 = vmatprep.mubr.msk.bf16.mxu1 %vm756_vm3, %v8665_v15  ;;  %v4526_v24 = vsel %vm7018_vm7, %v4524_v19, %v4525_v57  ;;  %v4031_v21 = vrot.slane %v4030_v3, 4 }
 0x150   : > { %v1199_v60 = vpop.f32.mrf.mxu1  ;;  %v5727_v12 = vrot.slane %v5711_v4, 9  ;;  %v4531_v25 = vrot.slane %v4529_v53, 4  ;;  %v4532_v15 = vrot.slane %v5660_v27, 5  ;;  %v4041_v2 = vrot.slane %v4040_v33, 4  ;;  %v5663_v33 = vld [vmem:[%s6688_s13 + $0xd4] sm:$0x1] }
 0x151   : > { %9518 = vst [vmem:[#allocation15_spill] sm:$0xff] %v8811_v38  ;;  %v8822_v47 = vadd.f32 %v6170_v45, %v1208_v1  ;;  %v1200_v52 = vadd.f32 %v1199_v60, %v9520_v16  ;;  %v1627_v14 = vpop.f32.mrf.mxu0  ;;  %v4045_v39 = vrot.slane %v4043_v18, 5  ;;  %v4050_v10 = vrot.slane %v4048_v40, 4  ;;  %v9523_v18 = vld [vmem:[#allocation8_spill] sm:$0xff] }
 0x152   : > { %v6137_v50 = vpop.f32.mrf.mxu1  ;;  %v4053_v38 = vrot.slane %v4051_v41, 5  ;;  %v9522_v45 = vcombine.low %v8679_v58, %v8683_v36  ;;  %v8832_v57 = vrot.slane %v4057_v28, 5  ;;  %v4063_v27 = vrot.slane %v4061_v32, 4 }
 0x153   : > { %v8825_v6 = vadd.f32 %v1624_v61, %v1200_v52  ;;  %v1211_v51 = vadd.f32 %v6137_v50, %v9521_v17  ;;  %v6174_v19 = vpop.f32.mrf.mxu0  ;;  %v4012_v61 = vsel %vm6732_vm4, %v8795_v49, %v8740_v62  ;;  %v4022_v4 = vsel %vm6732_vm4, %v8804_v23, %v8787_v35  ;;  %v5712_v62 = vld [vmem:[%s6688_s13 + $0xcc] sm:$0xe] }
 0x154   : > { %6377 = vmatmul.mubr.msk.bf16.gmra.mxu0 %vm756_vm3, %v9522_v45  ;;  %v1202_v3 = vpop.f32.mrf.mxu1  ;;  %v4536_v58 = vrot.slane %v8799_v20, 5  ;;  %v4533_v1 = vsel %vm7018_vm7, %v4531_v25, %v4532_v15  ;;  %v5743_v35 = vcombine.low %v4523_v48, %v4526_v24  ;;  %v4036_v20 = vsel %vm6732_vm4, %v4031_v21, %v8778_v22  ;;  %v9525_v25 = vld [vmem:[#allocation13_spill] sm:$0xff] }
 0x155   : > { %6380 = vmatprep.mubr.msk.bf16.mxu0 %vm756_vm3, %v5742_v13  ;;  %v8845_v36 = vadd.f32 %v6171_v26, %v1211_v51  ;;  %v1203_v40 = vadd.f32 %v1202_v3, %v9523_v18  ;;  %v1640_v41 = vpop.f32.mrf.mxu0  ;;  %v4530_v13 = vsel %vm7018_vm7, %v5727_v12, %v4529_v53  ;;  %v4046_v23 = vsel %vm6732_vm4, %v4041_v2, %v4045_v39  ;;  %v9524_v53 = vld [vmem:[#allocation10_spill] sm:$0xff] }
 0x156   : > { %v6140_v49 = vpop.f32.mrf.mxu1  ;;  %6343 = vmatmul.mubr.msk.bf16.gmra.mxu1 %vm756_vm3, %v8771_v43  ;;  %v4054_v26 = vor.u32 %v4053_v38, %v4050_v10  ;;  %v4064_v12 = vor.u32 %v4063_v27, %v8832_v57  ;;  %v4067_v43 = vshll.u32 %v5663_v33, 16  ;;  %v5744_v24 = vcombine.low %v4530_v13, %v4533_v1 }
 0x157   : > { %v8860_v28 = vadd.f32 %v1627_v14, %v1203_v40  ;;  %v1224_v32 = vadd.f32 %v6140_v49, %v9524_v53  ;;  %v6175_v60 = vpop.f32.mrf.mxu0  ;;  %6346 = vmatprep.mubr.msk.bf16.mxu1 %vm756_vm3, %v8774_v30  ;;  %v5728_v16 = vrot.slane %v5712_v62, 9  ;;  %v4538_v52 = vrot.slane %v4536_v58, 4  ;;  %v9526_v30 = vld [vmem:[#allocation16_spill] sm:$0xff] }
 0x158   : > { %v1215_v48 = vpop.f32.mrf.mxu1  ;;  %v4539_v22 = vrot.slane %v5663_v33, 5  ;;  %v5678_v50 = vcombine.low %v4012_v61, %v4022_v4  ;;  %v5679_v2 = vcombine.low %v4036_v20, %v4046_v23  ;;  %v4055_v39 = vrot.slane %v4054_v26, 4  ;;  %v9527_v33 = vld [vmem:[#allocation18_spill] sm:$0xff]  ;;  %v9528_v62 = vld [vmem:[#allocation20_spill] sm:$0xff]  ;;  %v9529_v26 = vld [vmem:[#allocation23_spill] sm:$0xff] }
 0x159   : > { %v8866_v21 = vadd.f32 %v6174_v19, %v1224_v32  ;;  %v1216_v38 = vadd.f32 %v1215_v48, %v9525_v25  ;;  %v1643_v14 = vpop.f32.mrf.mxu0  ;;  %v4065_v45 = vrot.slane %v4064_v12, 4  ;;  %v4069_v27 = vrot.slane %v4067_v43, 5  ;;  %v9530_v43 = vld [vmem:[#allocation25_spill] sm:$0xff] }
 0x15a   : > { %v6141_v15 = vpop.f32.mrf.mxu1  ;;  %v4537_v19 = vsel %vm7018_vm7, %v5728_v16, %v4536_v58  ;;  %v4540_v61 = vsel %vm7018_vm7, %v4538_v52, %v4539_v22  ;;  %v4060_v13 = vsel %vm6732_vm4, %v4055_v39, %v8832_v57 }
 0x15b   : > { %v8869_v10 = vadd.f32 %v1640_v41, %v1216_v38  ;;  %v1227_v17 = vadd.f32 %v6141_v15, %v9526_v30  ;;  %v6178_v51 = vpop.f32.mrf.mxu0  ;;  %v4070_v0 = vsel %vm6732_vm4, %v4065_v45, %v4069_v27 }
 0x15c   : > { %6381 = vmatmul.mubr.msk.bf16.gmra.mxu0 %vm756_vm3, %v5743_v35  ;;  %v1218_v3 = vpop.f32.mrf.mxu1  ;;  %v5745_v35 = vcombine.low %v4537_v19, %v4540_v61  ;;  %v5680_v12 = vcombine.low %v4060_v13, %v4070_v0 }
 0x15d   : > { %6384 = vmatprep.mubr.msk.bf16.mxu0 %vm756_vm3, %v5744_v24  ;;  %v8878_v4 = vadd.f32 %v6175_v60, %v1227_v17  ;;  %v1219_v18 = vadd.f32 %v1218_v3, %v9527_v33  ;;  %v1656_v40 = vpop.f32.mrf.mxu0 }
 0x15e   : > { %v6144_v41 = vpop.f32.mrf.mxu1  ;;  %6347 = vmatmul.mubr.msk.bf16.gmra.mxu1 %vm756_vm3, %v5678_v50 }
 0x15f   : > { %v8885_v1 = vadd.f32 %v1643_v14, %v1219_v18  ;;  %v1240_v49 = vadd.f32 %v6144_v41, %v9528_v62  ;;  %v6179_v58 = vpop.f32.mrf.mxu0  ;;  %6350 = vmatprep.mubr.msk.bf16.mxu1 %vm756_vm3, %v5679_v2 }
 0x160   : > { %v1231_v20 = vpop.f32.mrf.mxu1 }
 0x161   : > { %v8891_v23 = vadd.f32 %v6178_v51, %v1240_v49  ;;  %v1232_v53 = vadd.f32 %v1231_v20, %v9529_v26  ;;  %v1659_v32 = vpop.f32.mrf.mxu0 }
 0x162   : > { %v6145_v60 = vpop.f32.mrf.mxu1 }
 0x163   : > { %v8894_v57 = vadd.f32 %v1656_v40, %v1232_v53  ;;  %v1243_v48 = vadd.f32 %v6145_v60, %v9530_v43  ;;  %v6182_v24 = vpop.f32.mrf.mxu0 }
 0x164   : > { %6385 = vmatmul.mubr.msk.bf16.gmra.mxu0 %vm756_vm3, %v5745_v35  ;;  %v1234_v16 = vpop.f32.mrf.mxu1 }
 0x165   : > { %v8898_v52 = vadd.f32 %v6179_v58, %v1243_v48  ;;  %v1235_v22 = vadd.f32 %v1234_v16, %v9531_v31  ;;  %v1672_v25 = vpop.f32.mrf.mxu0 }
 0x166   : > { %v6148_v38 = vpop.f32.mrf.mxu1  ;;  %6351 = vmatmul.mubr.msk.bf16.gmra.mxu1 %vm756_vm3, %v5680_v12 }
 0x167   : > { %v8902_v14 = vadd.f32 %v1659_v32, %v1235_v22  ;;  %v1256_v15 = vadd.f32 %v6148_v38, %v8474_v42  ;;  %v6183_v50 = vpop.f32.mrf.mxu0 }
 0x168   : > { %v1247_v2 = vpop.f32.mrf.mxu1 }
 0x169   : > { %v8905_v39 = vadd.f32 %v6182_v24, %v1256_v15  ;;  %v1248_v30 = vadd.f32 %v1247_v2, %v8501_v44  ;;  %v1675_v17 = vpop.f32.mrf.mxu0 }
 0x16a   : > { %v6149_v51 = vpop.f32.mrf.mxu1 }
 0x16b   : > { %v8908_v45 = vadd.f32 %v1672_v25, %v1248_v30  ;;  %v1259_v27 = vadd.f32 %v6149_v51, %v8516_v8  ;;  %v6222_v3 = vpop.f32.mrf.mxu0  ;;  %v9532_v30 = vld [vmem:[#allocation14_spill] sm:$0xff] }
 0x16c   : > { %v1250_v19 = vpop.f32.mrf.mxu1 }
 0x16d   : > { %v8911_v61 = vadd.f32 %v6183_v50, %v1259_v27  ;;  %v1251_v33 = vadd.f32 %v1250_v19, %v8538_v55  ;;  %v2648_v18 = vpop.f32.mrf.mxu0 }
 0x16e   : > { %v6188_v42 = vpop.f32.mrf.mxu1 }
 0x16f   : > { %v8914_v40 = vadd.f32 %v1675_v17, %v1251_v33  ;;  %v2051_v41 = vadd.f32 %v6188_v42, %v8583_v5  ;;  %v6223_v13 = vpop.f32.mrf.mxu0 }
 0x170   : > { %v1922_v44 = vpop.f32.mrf.mxu1 }
 0x171   : > { %v8917_v62 = vadd.f32 %v6222_v3, %v2051_v41  ;;  %v2049_v49 = vadd.f32 %v1922_v44, %v8590_v37  ;;  %v2651_v58 = vpop.f32.mrf.mxu0  ;;  %v9533_v3 = vld [vmem:[#allocation11_spill] sm:$0xff] }
 0x172   : > { %v6189_v8 = vpop.f32.mrf.mxu1 }
 0x173   : > { %v8920_v0 = vadd.f32 %v2648_v18, %v2049_v49  ;;  %v2052_v35 = vadd.f32 %v6189_v8, %v8616_v54  ;;  %v6226_v20 = vpop.f32.mrf.mxu0 }
 0x174   : > { %v1925_v55 = vpop.f32.mrf.mxu1 }
 0x175   : > { %v8923_v26 = vadd.f32 %v6223_v13, %v2052_v35  ;;  %v2050_v53 = vadd.f32 %v1925_v55, %v8630_v11  ;;  %v2664_v32 = vpop.f32.mrf.mxu0 }
 0x176   : > { %v6192_v5 = vpop.f32.mrf.mxu1 }
 0x177   : > { %v8926_v60 = vadd.f32 %v2651_v58, %v2050_v53  ;;  %v2055_v12 = vadd.f32 %v6192_v5, %v8642_v29  ;;  %v6227_v43 = vpop.f32.mrf.mxu0 }
 0x178   : > { %v1938_v37 = vpop.f32.mrf.mxu1 }
 0x179   : > { %v8929_v48 = vadd.f32 %v6226_v20, %v2055_v12  ;;  %v2053_v24 = vadd.f32 %v1938_v37, %v8649_v9  ;;  %v2667_v16 = vpop.f32.mrf.mxu0 }
 0x17a   : > { %v6193_v54 = vpop.f32.mrf.mxu1 }
 0x17b   : > { %v8932_v31 = vadd.f32 %v2664_v32, %v2053_v24  ;;  %v2056_v22 = vadd.f32 %v6193_v54, %v8674_v34  ;;  %v6230_v25 = vpop.f32.mrf.mxu0  ;;  %v9535_v54 = vld [vmem:[#allocation15_spill] sm:$0xff] }
 0x17c   : > { %v1941_v11 = vpop.f32.mrf.mxu1 }
 0x17d   : > { %v8935_v38 = vadd.f32 %v6227_v43, %v2056_v22  ;;  %v2054_v15 = vadd.f32 %v1941_v11, %v8697_v59  ;;  %v2680_v50 = vpop.f32.mrf.mxu0  ;;  %v9534_v43 = vld [vmem:[#allocation19_spill] sm:$0xff] }
 0x17e   : > { %v6196_v29 = vpop.f32.mrf.mxu1 }
 0x17f   : > { %v8938_v2 = vadd.f32 %v2667_v16, %v2054_v15  ;;  %v2059_v17 = vadd.f32 %v6196_v29, %v9532_v30  ;;  %v6231_v51 = vpop.f32.mrf.mxu0 }
 0x180   : > { %v1954_v9 = vpop.f32.mrf.mxu1 }
 0x181   : > { %v8941_v27 = vadd.f32 %v6230_v25, %v2059_v17  ;;  %v2057_v19 = vadd.f32 %v1954_v9, %v9533_v3  ;;  %v2683_v33 = vpop.f32.mrf.mxu0 }
 0x182   : > { %v6197_v34 = vpop.f32.mrf.mxu1 }
 0x183   : > { %v8944_v18 = vadd.f32 %v2680_v50, %v2057_v19  ;;  %v2060_v42 = vadd.f32 %v6197_v34, %v8737_v56  ;;  %v6234_v41 = vpop.f32.mrf.mxu0 }
 0x184   : > { %v1957_v59 = vpop.f32.mrf.mxu1 }
 0x185   : > { %v8947_v13 = vadd.f32 %v6231_v51, %v2060_v42  ;;  %v2058_v44 = vadd.f32 %v1957_v59, %v8753_v63  ;;  %v2696_v49 = vpop.f32.mrf.mxu0 }
 0x186   : > { %v6200_v58 = vpop.f32.mrf.mxu1 }
 0x187   : > { %v8950_v8 = vadd.f32 %v2683_v33, %v2058_v44  ;;  %v2063_v35 = vadd.f32 %v6200_v58, %v8763_v46  ;;  %v6235_v20 = vpop.f32.mrf.mxu0 }
 0x188   : > { %v1970_v55 = vpop.f32.mrf.mxu1 }
 0x189   : > { %v8953_v53 = vadd.f32 %v6234_v41, %v2063_v35  ;;  %v2061_v32 = vadd.f32 %v1970_v55, %v8780_v7  ;;  %v2699_v5 = vpop.f32.mrf.mxu0 }
 0x18a   : > { %v6201_v56 = vpop.f32.mrf.mxu1 }
 0x18b   : > { %v8956_v12 = vadd.f32 %v2696_v49, %v2061_v32  ;;  %v2064_v37 = vadd.f32 %v6201_v56, %v9534_v43  ;;  %v6238_v24 = vpop.f32.mrf.mxu0 }
 0x18c   : > { %v1973_v63 = vpop.f32.mrf.mxu1 }
 0x18d   : > { %v8959_v16 = vadd.f32 %v6235_v20, %v2064_v37  ;;  %v2062_v22 = vadd.f32 %v1973_v63, %v9535_v54  ;;  %v2712_v25 = vpop.f32.mrf.mxu0 }
 0x18e   : > { %v6204_v46 = vpop.f32.mrf.mxu1 }
 0x18f   : > { %v8962_v11 = vadd.f32 %v2699_v5, %v2062_v22  ;;  %v2067_v15 = vadd.f32 %v6204_v46, %v8822_v47  ;;  %v6239_v50 = vpop.f32.mrf.mxu0 }
 0x190   : > { %v1986_v7 = vpop.f32.mrf.mxu1 }
 0x191   : > { %v8965_v29 = vadd.f32 %v6238_v24, %v2067_v15  ;;  %v2065_v30 = vadd.f32 %v1986_v7, %v8825_v6  ;;  %v2715_v17 = vpop.f32.mrf.mxu0 }
 0x192   : > { %v6205_v51 = vpop.f32.mrf.mxu1 }
 0x193   : > { %v8968_v9 = vadd.f32 %v2712_v25, %v2065_v30  ;;  %v2068_v3 = vadd.f32 %v6205_v51, %v8845_v36  ;;  %v6242_v19 = vpop.f32.mrf.mxu0 }
 0x194   : > { %v1989_v33 = vpop.f32.mrf.mxu1 }
 0x195   : > { %v8971_v34 = vadd.f32 %v6239_v50, %v2068_v3  ;;  %v2066_v42 = vadd.f32 %v1989_v33, %v8860_v28  ;;  %v2728_v41 = vpop.f32.mrf.mxu0 }
 0x196   : > { %v6208_v47 = vpop.f32.mrf.mxu1 }
 0x197   : > { %v8974_v59 = vadd.f32 %v2715_v17, %v2066_v42  ;;  %v2071_v44 = vadd.f32 %v6208_v47, %v8866_v21  ;;  %v6243_v49 = vpop.f32.mrf.mxu0 }
 0x198   : > { %v2002_v6 = vpop.f32.mrf.mxu1 }
 0x199   : > { %v8977_v58 = vadd.f32 %v6242_v19, %v2071_v44  ;;  %v2069_v35 = vadd.f32 %v2002_v6, %v8869_v10  ;;  %v2731_v20 = vpop.f32.mrf.mxu0 }
 0x19a   : > { %v6209_v36 = vpop.f32.mrf.mxu1 }
 0x19b   : > { %v8980_v55 = vadd.f32 %v2728_v41, %v2069_v35  ;;  %v2072_v32 = vadd.f32 %v6209_v36, %v8878_v4  ;;  %v6246_v5 = vpop.f32.mrf.mxu0 }
 0x19c   : > { %v2005_v28 = vpop.f32.mrf.mxu1 }
 0x19d   : > { %v8983_v56 = vadd.f32 %v6243_v49, %v2072_v32  ;;  %v2070_v43 = vadd.f32 %v2005_v28, %v8885_v1  ;;  %v2744_v37 = vpop.f32.mrf.mxu0 }
 0x19e   : > { %v6212_v21 = vpop.f32.mrf.mxu1 }
 0x19f   : > { %v8986_v24 = vadd.f32 %v2731_v20, %v2070_v43  ;;  %v2075_v63 = vadd.f32 %v6212_v21, %v8891_v23  ;;  %v6247_v54 = vpop.f32.mrf.mxu0 }
 0x1a0   : > { %v2018_v10 = vpop.f32.mrf.mxu1 }
 0x1a1   : > { %v8989_v22 = vadd.f32 %v6246_v5, %v2075_v63  ;;  %v2073_v25 = vadd.f32 %v2018_v10, %v8894_v57  ;;  %v2747_v46 = vpop.f32.mrf.mxu0 }
 0x1a2   : > { %v6213_v4 = vpop.f32.mrf.mxu1 }
 0x1a3   : > { %v8992_v15 = vadd.f32 %v2744_v37, %v2073_v25  ;;  %v2076_v50 = vadd.f32 %v6213_v4, %v8898_v52  ;;  %v6250_v7 = vpop.f32.mrf.mxu0 }
 0x1a4   : > { %v2021_v1 = vpop.f32.mrf.mxu1 }
 0x1a5   : > { %v8995_v30 = vadd.f32 %v6247_v54, %v2076_v50  ;;  %v2074_v17 = vadd.f32 %v2021_v1, %v8902_v14  ;;  %v2760_v51 = vpop.f32.mrf.mxu0 }
 0x1a6   : > { %v6216_v23 = vpop.f32.mrf.mxu1 }
 0x1a7   : > { %9536 = vst [vmem:[#allocation5_spill] sm:$0xff] %v8995_v30  ;;  %v8998_v3 = vadd.f32 %v2747_v46, %v2074_v17  ;;  %v2079_v19 = vadd.f32 %v6216_v23, %v8905_v39  ;;  %v6251_v33 = vpop.f32.mrf.mxu0 }
 0x1a8   : > { %v2034_v57 = vpop.f32.mrf.mxu1 }
 0x1a9   : > { %9537 = vst [vmem:[#allocation17_spill] sm:$0xff] %v8998_v3  ;;  %v9001_v42 = vadd.f32 %v6250_v7, %v2079_v19  ;;  %v2077_v41 = vadd.f32 %v2034_v57, %v8908_v45  ;;  %v2763_v47 = vpop.f32.mrf.mxu0 }
 0x1aa   : > { %v6217_v52 = vpop.f32.mrf.mxu1 }
 0x1ab   : > { %v9004_v44 = vadd.f32 %v2760_v51, %v2077_v41  ;;  %v2080_v49 = vadd.f32 %v6217_v52, %v8911_v61  ;;  %v6290_v6 = vpop.f32.mrf.mxu0 }
 0x1ac   : > { %v2037_v14 = vpop.f32.mrf.mxu1 }
 0x1ad   : > { %v9007_v35 = vadd.f32 %v6251_v33, %v2080_v49  ;;  %v2078_v20 = vadd.f32 %v2037_v14, %v8914_v40  ;;  %v3480_v36 = vpop.f32.mrf.mxu0 }
 0x1ae   : > { %v6256_v39 = vpop.f32.mrf.mxu1 }
 0x1af   : > { %9538 = vst [vmem:[#allocation22_spill] sm:$0xff] %v9007_v35  ;;  %v9010_v32 = vadd.f32 %v2763_v47, %v2078_v20  ;;  %v3247_v5 = vadd.f32 %v6256_v39, %v8917_v62  ;;  %v9013_v28 = vpop.f32.mrf.mxu0 }
 0x1b0   : > { %v3118_v45 = vpop.f32.mrf.mxu1 }
 0x1b1   : > { %9539 = vst [vmem:[#allocation12_spill] sm:$0xff] %v9010_v32  ;;  %v9015_v43 = vadd.f32 %v6290_v6, %v3247_v5  ;;  %v3245_v37 = vadd.f32 %v3118_v45, %v8920_v0  ;;  %v9018_v61 = vpop.f32.mrf.mxu0 }
 0x1b2   : > { %v9020_v21 = vpop.f32.mrf.mxu1 }
 0x1b3   : > { %v9022_v63 = vadd.f32 %v3480_v36, %v3245_v37  ;;  %v6294_v40 = vpop.f32.mrf.mxu0 }
 0x1b4   : > { %v9024_v54 = vpop.f32.mrf.mxu1 }
 0x1b5   : > { %v3496_v10 = vpop.f32.mrf.mxu0 }
 0x1b6   : > { %v6260_v25 = vpop.f32.mrf.mxu1 }
 0x1b7   : > { %v3251_v62 = vadd.f32 %v6260_v25, %v8929_v48  ;;  %v9027_v46 = vpop.f32.mrf.mxu0 }
 0x1b8   : > { %v3134_v4 = vpop.f32.mrf.mxu1 }
 0x1b9   : > { %v9029_v50 = vadd.f32 %v6294_v40, %v3251_v62  ;;  %v3249_v0 = vadd.f32 %v3134_v4, %v8932_v31  ;;  %v9032_v7 = vpop.f32.mrf.mxu0 }
 0x1ba   : > { %v9034_v1 = vpop.f32.mrf.mxu1 }
 0x1bb   : > { %v9036_v17 = vadd.f32 %v3496_v10, %v3249_v0  ;;  %v6298_v51 = vpop.f32.mrf.mxu0 }
 0x1bc   : > { %v9038_v23 = vpop.f32.mrf.mxu1 }
 0x1bd   : > { %v3512_v19 = vpop.f32.mrf.mxu0 }
 0x1be   : > { %v6264_v33 = vpop.f32.mrf.mxu1 }
 0x1bf   : > { %v3255_v48 = vadd.f32 %v6264_v33, %v8941_v27  ;;  %v9041_v57 = vpop.f32.mrf.mxu0 }
 0x1c0   : > { %v3150_v41 = vpop.f32.mrf.mxu1 }
 0x1c1   : > { %v9043_v47 = vadd.f32 %v6298_v51, %v3255_v48  ;;  %v3253_v31 = vadd.f32 %v3150_v41, %v8944_v18  ;;  %v9046_v52 = vpop.f32.mrf.mxu0 }
 0x1c2   : > { %v9048_v49 = vpop.f32.mrf.mxu1 }
 0x1c3   : > { %v9050_v6 = vadd.f32 %v3512_v19, %v3253_v31  ;;  %v6302_v14 = vpop.f32.mrf.mxu0 }
 0x1c4   : > { %v9052_v20 = vpop.f32.mrf.mxu1 }
 0x1c5   : > { %v3528_v36 = vpop.f32.mrf.mxu0 }
 0x1c6   : > { %v6268_v39 = vpop.f32.mrf.mxu1 }
 0x1c7   : > { %v3259_v27 = vadd.f32 %v6268_v39, %v8953_v53  ;;  %v9055_v5 = vpop.f32.mrf.mxu0 }
 0x1c8   : > { %v3166_v45 = vpop.f32.mrf.mxu1 }
 0x1c9   : > { %v9057_v37 = vadd.f32 %v6302_v14, %v3259_v27  ;;  %v3257_v18 = vadd.f32 %v3166_v45, %v8956_v12  ;;  %v9060_v40 = vpop.f32.mrf.mxu0 }
 0x1ca   : > { %v9062_v10 = vpop.f32.mrf.mxu1 }
 0x1cb   : > { %v9064_v25 = vadd.f32 %v3528_v36, %v3257_v18  ;;  %v6306_v62 = vpop.f32.mrf.mxu0 }
 0x1cc   : > { %v9066_v4 = vpop.f32.mrf.mxu1 }
 0x1cd   : > { %v3544_v0 = vpop.f32.mrf.mxu0 }
 0x1ce   : > { %v6272_v51 = vpop.f32.mrf.mxu1 }
 0x1cf   : > { %v3263_v53 = vadd.f32 %v6272_v51, %v8965_v29  ;;  %v9069_v19 = vpop.f32.mrf.mxu0 }
 0x1d0   : > { %v3182_v33 = vpop.f32.mrf.mxu1 }
 0x1d1   : > { %v9071_v48 = vadd.f32 %v6306_v62, %v3263_v53  ;;  %v3261_v12 = vadd.f32 %v3182_v33, %v8968_v9  ;;  %v9074_v41 = vpop.f32.mrf.mxu0 }
 0x1d2   : > { %v9076_v31 = vpop.f32.mrf.mxu1 }
 0x1d3   : > { %v9078_v14 = vadd.f32 %v3544_v0, %v3261_v12  ;;  %v6310_v36 = vpop.f32.mrf.mxu0 }
 0x1d4   : > { %v9080_v39 = vpop.f32.mrf.mxu1 }
 0x1d5   : > { %v3560_v27 = vpop.f32.mrf.mxu0 }
 0x1d6   : > { %v6276_v45 = vpop.f32.mrf.mxu1 }
 0x1d7   : > { %v3267_v29 = vadd.f32 %v6276_v45, %v8977_v58  ;;  %v9083_v18 = vpop.f32.mrf.mxu0 }
 0x1d8   : > { %9540 = vst [vmem:[#allocation21_spill] sm:$0xff] %v9083_v18  ;;  %v3198_v51 = vpop.f32.mrf.mxu1 }
 0x1d9   : > { %v9085_v62 = vadd.f32 %v6310_v36, %v3267_v29  ;;  %v3265_v9 = vadd.f32 %v3198_v51, %v8980_v55  ;;  %v9088_v53 = vpop.f32.mrf.mxu0 }
 0x1da   : > { %9541 = vst [vmem:[#allocation24_spill] sm:$0xff] %v9088_v53  ;;  %v9090_v33 = vpop.f32.mrf.mxu1 }
 0x1db   : > { %v9092_v0 = vadd.f32 %v3560_v27, %v3265_v9  ;;  %v6314_v12 = vpop.f32.mrf.mxu0 }
 0x1dc   : > { %v9094_v32 = vpop.f32.mrf.mxu1 }
 0x1dd   : > { %9542 = vst [vmem:[#allocation26_spill] sm:$0xff] %v9092_v0  ;;  %v3576_v35 = vpop.f32.mrf.mxu0 }
 0x1de   : > { %v6280_v3 = vpop.f32.mrf.mxu1 }
 0x1df   : > { %v3271_v58 = vadd.f32 %v6280_v3, %v8989_v22  ;;  %v9097_v45 = vpop.f32.mrf.mxu0 }
 0x1e0   : > { %9543 = vst [vmem:[#allocation28_spill] sm:$0xff] %v9097_v45  ;;  %v3214_v30 = vpop.f32.mrf.mxu1 }
 0x1e1   : > { %v9099_v36 = vadd.f32 %v6314_v12, %v3271_v58  ;;  %v3269_v55 = vadd.f32 %v3214_v30, %v8992_v15  ;;  %v9102_v29 = vpop.f32.mrf.mxu0 }
 0x1e2   : > { %9544 = vst [vmem:[#allocation7_spill] sm:$0xff] %v9102_v29  ;;  %v9104_v51 = vpop.f32.mrf.mxu1 }
 0x1e3   : > { %v9106_v27 = vadd.f32 %v3576_v35, %v3269_v55  ;;  %v6318_v9 = vpop.f32.mrf.mxu0 }
 0x1e4   : > { %v9108_v53 = vpop.f32.mrf.mxu1 }
 0x1e5   : > { %9545 = vst [vmem:[#allocation6_spill] sm:$0xff] %v9106_v27  ;;  %v3592_v0 = vpop.f32.mrf.mxu0  ;;  %v3248_v27 = vadd.f32 %v9020_v21, %v8923_v26  ;;  %v9134_v26 = vld [vmem:[%s9341_s2] ss:$0 sm:$0xff] }
 0x1e6   : > { %v6284_v18 = vpop.f32.mrf.mxu1 }
 0x1e7   : > { %v3275_v22 = vadd.f32 %v6284_v18, %v9001_v42  ;;  %v9111_v3 = vpop.f32.mrf.mxu0 }
 0x1e8   : > { %9546 = vst [vmem:[#allocation9_spill] sm:$0xff] %v9111_v3  ;;  %v3230_v45 = vpop.f32.mrf.mxu1 }
 0x1e9   : > { %v9113_v12 = vadd.f32 %v6318_v9, %v3275_v22  ;;  %v3273_v15 = vadd.f32 %v3230_v45, %v9004_v44  ;;  %v9116_v30 = vpop.f32.mrf.mxu0  ;;  %v3246_v9 = vadd.f32 %v9024_v54, %v8926_v60 }
 0x1ea   : > { %9548 = vst [vmem:[#allocation10_spill] sm:$0xff] %v9116_v30  ;;  %v9118_v58 = vpop.f32.mrf.mxu1  ;;  %v3610_v30 = vadd.f32 %v9013_v28, %v3248_v27 }
 0x1eb   : > { %9547 = vst [vmem:[#allocation8_spill] sm:$0xff] %v9113_v12  ;;  %v9120_v35 = vadd.f32 %v3592_v0, %v3273_v15  ;;  %v6358_v55 = vpop.f32.mrf.mxu0 }
 0x1ec   : > { %v9122_v29 = vpop.f32.mrf.mxu1 }
 0x1ed   : > { %9549 = vst [vmem:[#allocation13_spill] sm:$0xff] %v9120_v35  ;;  %v4676_v42 = vpop.f32.mrf.mxu0  ;;  %v3608_v35 = vadd.f32 %v9018_v61, %v3246_v9  ;;  %v9146_v61 = vld [vmem:[%s9342_s3] ss:$0 sm:$0xff] }
 0x1ee   : > { %v6324_v18 = vpop.f32.mrf.mxu1 }
 0x1ef   : > { %v4335_v44 = vadd.f32 %v6324_v18, %v9015_v43  ;;  %v6359_v45 = vpop.f32.mrf.mxu0 }
 0x1f0   : > { %v4206_v22 = vpop.f32.mrf.mxu1 }
 0x1f1   : > { %v4805_v0 = vadd.f32 %v6358_v55, %v4335_v44  ;;  %v4333_v15 = vadd.f32 %v4206_v22, %v9022_v63  ;;  %v4679_v3 = vpop.f32.mrf.mxu0  ;;  %v3252_v44 = vadd.f32 %v9034_v1, %v8935_v38  ;;  %v3250_v22 = vadd.f32 %v9038_v23, %v8938_v2 }
 0x1f2   : > { %v6325_v21 = vpop.f32.mrf.mxu1 }
 0x1f3   : > { %v4803_v60 = vadd.f32 %v4676_v42, %v4333_v15  ;;  %v4336_v54 = vadd.f32 %v6325_v21, %v3610_v30  ;;  %v6362_v43 = vpop.f32.mrf.mxu0  ;;  %v4844_v28 = vmul.f32 %v9134_v26, %v4805_v0 }
 0x1f4   : > { %v4209_v18 = vpop.f32.mrf.mxu1 }
 0x1f5   : > { %v4806_v27 = vadd.f32 %v6359_v45, %v4336_v54  ;;  %v4334_v55 = vadd.f32 %v4209_v18, %v3608_v35  ;;  %v4692_v63 = vpop.f32.mrf.mxu0  ;;  %v4842_v42 = vmul.f32 %v9134_v26, %v4803_v60  ;;  %v4883_v1 = vadd.f32 %v9146_v61, %v4844_v28 }
 0x1f6   : > { %v6328_v30 = vpop.f32.mrf.mxu1  ;;  %v3614_v60 = vadd.f32 %v9027_v46, %v3252_v44  ;;  %v3612_v54 = vadd.f32 %v9032_v7, %v3250_v22 }
 0x1f7   : > { %v4845_v9 = vmul.f32 %v9134_v26, %v4806_v27  ;;  %v4804_v35 = vadd.f32 %v4679_v3, %v4334_v55  ;;  %v4339_v45 = vadd.f32 %v6328_v30, %v9029_v50  ;;  %v6363_v0 = vpop.f32.mrf.mxu0  ;;  %v4881_v3 = vadd.f32 %v9146_v61, %v4842_v42 }
 0x1f8   : > { %v4222_v38 = vpop.f32.mrf.mxu1 }
 0x1f9   : > { %v4884_v2 = vadd.f32 %v9146_v61, %v4845_v9  ;;  %v4843_v23 = vmul.f32 %v9134_v26, %v4804_v35  ;;  %v4337_v15 = vadd.f32 %v4222_v38, %v9036_v17  ;;  %v4695_v21 = vpop.f32.mrf.mxu0  ;;  %v4809_v18 = vadd.f32 %v6362_v43, %v4339_v45 }
 0x1fa   : > { %v6329_v27 = vpop.f32.mrf.mxu1  ;;  %v3256_v35 = vadd.f32 %v9048_v49, %v8947_v13  ;;  %v3254_v13 = vadd.f32 %v9052_v20, %v8950_v8 }
 0x1fb   : > { %v5842_v50 = vpack.c.bf16 %v4884_v2, %v4883_v1  ;;  %v4882_v55 = vadd.f32 %v9146_v61, %v4843_v23  ;;  %v4807_v30 = vadd.f32 %v4692_v63, %v4337_v15  ;;  %v6366_v28 = vpop.f32.mrf.mxu0  ;;  %v4340_v12 = vadd.f32 %v6329_v27, %v3614_v60 }
 0x1fc   : > { %v4225_v9 = vpop.f32.mrf.mxu1  ;;  %v4848_v43 = vmul.f32 %v9134_v26, %v4809_v18  ;;  %v3618_v2 = vadd.f32 %v9041_v57, %v3256_v35  ;;  %v3616_v57 = vadd.f32 %v9046_v52, %v3254_v13  ;;  %v3260_v27 = vadd.f32 %v9062_v10, %v8959_v16 }
 0x1fd   : > { %5914 = vst [vmem:[%s9163_s22 + $0x8] sm:$0xff] %v5842_v50   ;;  %v5837_v46 = vpack.c.bf16 %v4882_v55, %v4881_v3  ;;  %v4338_v7 = vadd.f32 %v4225_v9, %v3612_v54  ;;  %v4708_v17 = vpop.f32.mrf.mxu0  ;;  %v4810_v44 = vadd.f32 %v6363_v0, %v4340_v12  ;;  %v4846_v63 = vmul.f32 %v9134_v26, %v4807_v30 }
 0x1fe   : > { %v6332_v22 = vpop.f32.mrf.mxu1  ;;  %v4887_v60 = vadd.f32 %v9146_v61, %v4848_v43  ;;  %v3622_v10 = vadd.f32 %v9055_v5, %v3260_v27 }
 0x1ff   : > { %5838 = vst [vmem:[%s9163_s22] sm:$0xff] %v5837_v46   ;;  %v4808_v42 = vadd.f32 %v4695_v21, %v4338_v7  ;;  %v4343_v45 = vadd.f32 %v6332_v22, %v9043_v47  ;;  %v6367_v38 = vpop.f32.mrf.mxu0  ;;  %v4849_v49 = vmul.f32 %v9134_v26, %v4810_v44  ;;  %v4885_v54 = vadd.f32 %v9146_v61, %v4846_v63 }
 0x200   : > { %v4238_v1 = vpop.f32.mrf.mxu1  ;;  %v3258_v7 = vadd.f32 %v9066_v4, %v8962_v11 }
 0x201   : > { %v4847_v23 = vmul.f32 %v9134_v26, %v4808_v42  ;;  %v4813_v15 = vadd.f32 %v6366_v28, %v4343_v45  ;;  %v4341_v12 = vadd.f32 %v4238_v1, %v9050_v6  ;;  %v4711_v0 = vpop.f32.mrf.mxu0  ;;  %v4888_v47 = vadd.f32 %v9146_v61, %v4849_v49 }
 0x202   : > { %v6333_v21 = vpop.f32.mrf.mxu1 }
 0x203   : > { %v4886_v8 = vadd.f32 %v9146_v61, %v4847_v23  ;;  %v4344_v20 = vadd.f32 %v6333_v21, %v3618_v2  ;;  %v6370_v18 = vpop.f32.mrf.mxu0  ;;  %v5852_v6 = vpack.c.bf16 %v4888_v47, %v4887_v60  ;;  %v4811_v3 = vadd.f32 %v4708_v17, %v4341_v12 }
 0x204   : > { %v4241_v50 = vpop.f32.mrf.mxu1  ;;  %v4852_v30 = vmul.f32 %v9134_v26, %v4813_v15  ;;  %v3264_v21 = vadd.f32 %v9076_v31, %v8971_v34 }
 0x205   : > { %v5847_v55 = vpack.c.bf16 %v4886_v8, %v4885_v54  ;;  %v4814_v28 = vadd.f32 %v6367_v38, %v4344_v20  ;;  %v4724_v9 = vpop.f32.mrf.mxu0  ;;  %5916 = vst [vmem:[%s9163_s22 + $0x18] sm:$0xff] %v5852_v6   ;;  %v4342_v35 = vadd.f32 %v4241_v50, %v3616_v57  ;;  %v4850_v17 = vmul.f32 %v9134_v26, %v4811_v3 }
 0x206   : > { %v6336_v46 = vpop.f32.mrf.mxu1  ;;  %v4891_v63 = vadd.f32 %v9146_v61, %v4852_v30 }
 0x207   : > { %5915 = vst [vmem:[%s9163_s22 + $0x10] sm:$0xff] %v5847_v55   ;;  %v4853_v52 = vmul.f32 %v9134_v26, %v4814_v28  ;;  %v4347_v43 = vadd.f32 %v6336_v46, %v9057_v37  ;;  %v6371_v16 = vpop.f32.mrf.mxu0  ;;  %v4812_v44 = vadd.f32 %v4711_v0, %v4342_v35  ;;  %v3620_v37 = vadd.f32 %v9060_v40, %v3258_v7 }
 0x208   : > { %v4254_v22 = vpop.f32.mrf.mxu1  ;;  %v4889_v23 = vadd.f32 %v9146_v61, %v4850_v17  ;;  %v3262_v40 = vadd.f32 %v9080_v39, %v8974_v59  ;;  %v3626_v39 = vadd.f32 %v9069_v19, %v3264_v21 }
 0x209   : > { %v4892_v42 = vadd.f32 %v9146_v61, %v4853_v52  ;;  %v4817_v45 = vadd.f32 %v6370_v18, %v4347_v43  ;;  %v4345_v11 = vadd.f32 %v4254_v22, %v9064_v25  ;;  %v4727_v4 = vpop.f32.mrf.mxu0  ;;  %v4851_v38 = vmul.f32 %v9134_v26, %v4812_v44 }
 0x20a   : > { %v6337_v13 = vpop.f32.mrf.mxu1  ;;  %v3624_v30 = vadd.f32 %v9074_v41, %v3262_v40 }
 0x20b   : > { %v5862_v49 = vpack.c.bf16 %v4892_v42, %v4891_v63  ;;  %v4815_v5 = vadd.f32 %v4724_v9, %v4345_v11  ;;  %v4348_v1 = vadd.f32 %v6337_v13, %v3622_v10  ;;  %v6374_v2 = vpop.f32.mrf.mxu0  ;;  %v4890_v15 = vadd.f32 %v9146_v61, %v4851_v38  ;;  %v9550_v38 = vld [vmem:[#allocation21_spill] sm:$0xff] }
 0x20c   : > { %v4257_v12 = vpop.f32.mrf.mxu1  ;;  %v4856_v0 = vmul.f32 %v9134_v26, %v4817_v45 }
 0x20d   : > { %5918 = vst [vmem:[%s9163_s22 + $0x28] sm:$0xff] %v5862_v49   ;;  %v4818_v25 = vadd.f32 %v6371_v16, %v4348_v1  ;;  %v4346_v60 = vadd.f32 %v4257_v12, %v3620_v37  ;;  %v4740_v47 = vpop.f32.mrf.mxu0  ;;  %v5857_v54 = vpack.c.bf16 %v4890_v15, %v4889_v23  ;;  %v4854_v20 = vmul.f32 %v9134_v26, %v4815_v5  ;;  %v9551_v5 = vld [vmem:[#allocation26_spill] sm:$0xff] }
 0x20e   : > { %v6340_v8 = vpop.f32.mrf.mxu1  ;;  %v4895_v50 = vadd.f32 %v9146_v61, %v4856_v0 }
 0x20f   : > { %v4857_v18 = vmul.f32 %v9134_v26, %v4818_v25  ;;  %v4816_v57 = vadd.f32 %v4727_v4, %v4346_v60  ;;  %v4351_v27 = vadd.f32 %v6340_v8, %v9071_v48  ;;  %v6375_v6 = vpop.f32.mrf.mxu0  ;;  %5917 = vst [vmem:[%s9163_s22 + $0x20] sm:$0xff] %v5857_v54   ;;  %v4893_v48 = vadd.f32 %v9146_v61, %v4854_v20  ;;  %v9552_v25 = vld [vmem:[#allocation24_spill] sm:$0xff] }
 0x210   : > { %v4270_v3 = vpop.f32.mrf.mxu1  ;;  %v3266_v4 = vadd.f32 %v9094_v32, %v8986_v24 }
 0x211   : > { %v4896_v55 = vadd.f32 %v9146_v61, %v4857_v18  ;;  %v4855_v34 = vmul.f32 %v9134_v26, %v4816_v57  ;;  %v4349_v59 = vadd.f32 %v4270_v3, %v9078_v14  ;;  %v4743_v31 = vpop.f32.mrf.mxu0  ;;  %v4821_v28 = vadd.f32 %v6374_v2, %v4351_v27 }
 0x212   : > { %v6341_v9 = vpop.f32.mrf.mxu1  ;;  %v3268_v14 = vadd.f32 %v9090_v33, %v8983_v56  ;;  %v3628_v60 = vadd.f32 %v9552_v25, %v3266_v4  ;;  %v9558_v4 = vld [vmem:[#allocation22_spill] sm:$0xff] }
 0x213   : > { %v5872_v35 = vpack.c.bf16 %v4896_v55, %v4895_v50  ;;  %v4894_v46 = vadd.f32 %v9146_v61, %v4855_v34  ;;  %v4819_v7 = vadd.f32 %v4740_v47, %v4349_v59  ;;  %v4352_v43 = vadd.f32 %v6341_v9, %v3626_v39  ;;  %v9553_v47 = vld [vmem:[#allocation5_spill] sm:$0xff] }
 0x214   : > { %v6378_v52 = vpop.f32.mrf.mxu0  ;;  %v4273_v16 = vpop.f32.mrf.mxu1  ;;  %v4860_v41 = vmul.f32 %v9134_v26, %v4821_v28  ;;  %v3630_v13 = vadd.f32 %v9550_v38, %v3268_v14  ;;  %v3272_v21 = vadd.f32 %v9104_v51, %v9553_v47  ;;  %v9554_v50 = vld [vmem:[#allocation17_spill] sm:$0xff] }
 0x215   : > { %5920 = vst [vmem:[%s9163_s22 + $0x38] sm:$0xff] %v5872_v35   ;;  %v5867_v10 = vpack.c.bf16 %v4894_v46, %v4893_v48  ;;  %v4350_v19 = vadd.f32 %v4273_v16, %v3624_v30  ;;  %v4822_v44 = vadd.f32 %v6375_v6, %v4352_v43  ;;  %v4858_v63 = vmul.f32 %v9134_v26, %v4819_v7  ;;  %v9556_v7 = vld [vmem:[#allocation6_spill] sm:$0xff] }
 0x216   : > { %v4756_v17 = vpop.f32.mrf.mxu0  ;;  %v6344_v22 = vpop.f32.mrf.mxu1  ;;  %v4899_v23 = vadd.f32 %v9146_v61, %v4860_v41  ;;  %v3270_v55 = vadd.f32 %v9108_v53, %v9554_v50 }
 0x217   : > { %5919 = vst [vmem:[%s9163_s22 + $0x30] sm:$0xff] %v5867_v10   ;;  %v4820_v42 = vadd.f32 %v4743_v31, %v4350_v19  ;;  %v4355_v45 = vadd.f32 %v6344_v22, %v9085_v62  ;;  %v4861_v56 = vmul.f32 %v9134_v26, %v4822_v44  ;;  %v4897_v12 = vadd.f32 %v9146_v61, %v4858_v63  ;;  %v9555_v31 = vld [vmem:[#allocation28_spill] sm:$0xff] }
 0x218   : > { %v6379_v11 = vpop.f32.mrf.mxu0  ;;  %v4286_v33 = vpop.f32.mrf.mxu1  ;;  %v3634_v39 = vadd.f32 %v9555_v31, %v3272_v21 }
 0x219   : > { %v4859_v37 = vmul.f32 %v9134_v26, %v4820_v42  ;;  %v4825_v49 = vadd.f32 %v6378_v52, %v4355_v45  ;;  %v4353_v1 = vadd.f32 %v4286_v33, %v9551_v5  ;;  %v4900_v62 = vadd.f32 %v9146_v61, %v4861_v56  ;;  %v9559_v33 = vld [vmem:[#allocation12_spill] sm:$0xff] }
 0x21a   : > { %v4759_v2 = vpop.f32.mrf.mxu0  ;;  %v6345_v15 = vpop.f32.mrf.mxu1  ;;  %v3276_v56 = vadd.f32 %v9118_v58, %v9558_v4  ;;  %v3274_v38 = vadd.f32 %v9122_v29, %v9559_v33  ;;  %v9561_v29 = vld [vmem:[#allocation13_spill] sm:$0xff] }
 0x21b   : > { %v4898_v24 = vadd.f32 %v9146_v61, %v4859_v37  ;;  %v4356_v32 = vadd.f32 %v6345_v15, %v3630_v13  ;;  %v5882_v40 = vpack.c.bf16 %v4900_v62, %v4899_v23  ;;  %v4823_v54 = vadd.f32 %v4756_v17, %v4353_v1  ;;  %v9560_v23 = vld [vmem:[#allocation8_spill] sm:$0xff] }
 0x21c   : > { %v6382_v0 = vpop.f32.mrf.mxu0  ;;  %v4289_v8 = vpop.f32.mrf.mxu1  ;;  %v4864_v18 = vmul.f32 %v9134_v26, %v4825_v49 }
 0x21d   : > { %v5877_v20 = vpack.c.bf16 %v4898_v24, %v4897_v12  ;;  %v4826_v57 = vadd.f32 %v6379_v11, %v4356_v32  ;;  %5922 = vst [vmem:[%s9163_s22 + $0x48] sm:$0xff] %v5882_v40   ;;  %v4354_v6 = vadd.f32 %v4289_v8, %v3628_v60  ;;  %v4862_v30 = vmul.f32 %v9134_v26, %v4823_v54  ;;  %v9563_v60 = vld [vmem:[#allocation10_spill] sm:$0xff] }
 0x21e   : > { %v4772_v27 = vpop.f32.mrf.mxu0  ;;  %v6348_v3 = vpop.f32.mrf.mxu1  ;;  %v4903_v48 = vadd.f32 %v9146_v61, %v4864_v18  ;;  %v3636_v47 = vadd.f32 %v9563_v60, %v3274_v38 }
 0x21f   : > { %5921 = vst [vmem:[%s9163_s22 + $0x40] sm:$0xff] %v5877_v20   ;;  %v4865_v34 = vmul.f32 %v9134_v26, %v4826_v57  ;;  %v4359_v59 = vadd.f32 %v6348_v3, %v9099_v36  ;;  %v4824_v28 = vadd.f32 %v4759_v2, %v4354_v6  ;;  %v9557_v36 = vld [vmem:[#allocation7_spill] sm:$0xff]  ;;  %v4901_v44 = vadd.f32 %v9146_v61, %v4862_v30 }
 0x220   : > { %v6383_v51 = vpop.f32.mrf.mxu0  ;;  %v4302_v9 = vpop.f32.mrf.mxu1  ;;  %v3632_v14 = vadd.f32 %v9557_v36, %v3270_v55 }
 0x221   : > { %v4904_v35 = vadd.f32 %v9146_v61, %v4865_v34  ;;  %v4829_v46 = vadd.f32 %v6382_v0, %v4359_v59  ;;  %v4357_v53 = vadd.f32 %v4302_v9, %v9556_v7  ;;  %v4863_v43 = vmul.f32 %v9134_v26, %v4824_v28  ;;  %v9562_v0 = vld [vmem:[#allocation9_spill] sm:$0xff] }
 0x222   : > { %v4775_v52 = vpop.f32.mrf.mxu0  ;;  %v6349_v16 = vpop.f32.mrf.mxu1  ;;  %v3638_v25 = vadd.f32 %v9562_v0, %v3276_v56 }
 0x223   : > { %v5892_v10 = vpack.c.bf16 %v4904_v35, %v4903_v48  ;;  %v4827_v19 = vadd.f32 %v4772_v27, %v4357_v53  ;;  %v4360_v17 = vadd.f32 %v6349_v16, %v3634_v39  ;;  %v4902_v22 = vadd.f32 %v9146_v61, %v4863_v43 }
 0x224   : > { %v6386_v41 = vpop.f32.mrf.mxu0  ;;  %v4305_v63 = vpop.f32.mrf.mxu1  ;;  %v4868_v42 = vmul.f32 %v9134_v26, %v4829_v46 }
 0x225   : > { %5924 = vst [vmem:[%s9163_s22 + $0x58] sm:$0xff] %v5892_v10   ;;  %v4830_v45 = vadd.f32 %v6383_v51, %v4360_v17  ;;  %v4358_v11 = vadd.f32 %v4305_v63, %v3632_v14  ;;  %v5887_v13 = vpack.c.bf16 %v4902_v22, %v4901_v44  ;;  %v4866_v5 = vmul.f32 %v9134_v26, %v4827_v19 }
 0x226   : > { %v6352_v37 = vpop.f32.mrf.mxu1  ;;  %v4788_v49 = vpop.f32.mrf.mxu0  ;;  %v4907_v12 = vadd.f32 %v9146_v61, %v4868_v42 }
 0x227   : > { %v4869_v1 = vmul.f32 %v9134_v26, %v4830_v45  ;;  %v4828_v2 = vadd.f32 %v4775_v52, %v4358_v11  ;;  %v4363_v62 = vadd.f32 %v6352_v37, %v9560_v23  ;;  %5923 = vst [vmem:[%s9163_s22 + $0x50] sm:$0xff] %v5887_v13   ;;  %v4905_v8 = vadd.f32 %v9146_v61, %v4866_v5 }
 0x228   : > { %v4318_v15 = vpop.f32.mrf.mxu1  ;;  %v6387_v54 = vpop.f32.mrf.mxu0 }
 0x229   : > { %v4908_v58 = vadd.f32 %v9146_v61, %v4869_v1  ;;  %v4867_v24 = vmul.f32 %v9134_v26, %v4828_v2  ;;  %v4361_v32 = vadd.f32 %v4318_v15, %v9561_v29  ;;  %v4833_v21 = vadd.f32 %v6386_v41, %v4363_v62 }
 0x22a   : > { %v6353_v40 = vpop.f32.mrf.mxu1  ;;  %v4791_v59 = vpop.f32.mrf.mxu0 }
 0x22b   : > { %v5902_v20 = vpack.c.bf16 %v4908_v58, %v4907_v12  ;;  %v4906_v18 = vadd.f32 %v9146_v61, %v4867_v24  ;;  %v4831_v57 = vadd.f32 %v4788_v49, %v4361_v32  ;;  %v4364_v27 = vadd.f32 %v6353_v40, %v3638_v25 }
 0x22c   : > { %v4321_v6 = vpop.f32.mrf.mxu1  ;;  %v4872_v55 = vmul.f32 %v9134_v26, %v4833_v21 }
 0x22d   : > { %5926 = vst [vmem:[%s9163_s22 + $0x68] sm:$0xff] %v5902_v20   ;;  %v5897_v3 = vpack.c.bf16 %v4906_v18, %v4905_v8  ;;  %v4362_v50 = vadd.f32 %v4321_v6, %v3636_v47  ;;  %v4834_v34 = vadd.f32 %v6387_v54, %v4364_v27  ;;  %v4870_v51 = vmul.f32 %v9134_v26, %v4831_v57 }
 0x22e   : > { %v4911_v28 = vadd.f32 %v9146_v61, %v4872_v55 }
 0x22f   : > { %5925 = vst [vmem:[%s9163_s22 + $0x60] sm:$0xff] %v5897_v3   ;;  %v4832_v31 = vadd.f32 %v4791_v59, %v4362_v50  ;;  %v4873_v39 = vmul.f32 %v9134_v26, %v4834_v34  ;;  %v4909_v48 = vadd.f32 %v9146_v61, %v4870_v51 }
 0x231   : > { %v4871_v30 = vmul.f32 %v9134_v26, %v4832_v31  ;;  %v4912_v9 = vadd.f32 %v9146_v61, %v4873_v39 }
 0x233   : > { %v4910_v35 = vadd.f32 %v9146_v61, %v4871_v30  ;;  %v5912_v46 = vpack.c.bf16 %v4912_v9, %v4911_v28 }
 0x235   : > { %v5907_v26 = vpack.c.bf16 %v4910_v35, %v4909_v48  ;;  %5928 = vst [vmem:[%s9163_s22 + $0x78] sm:$0xff] %v5912_v46  }
 0x237   : > { %5927 = vst [vmem:[%s9163_s22 + $0x70] sm:$0xff] %v5907_v26  }
 0x238   : > { %6521 = shalt.err (!%p6518_p5)
}
 0x239   : > { %s6522_s10 = scalar_lea.hbm %s9286_s5, 2048  ;;  %s6526_s13 = scalar_lea.hbm %s9343_s4, 4096 }
 0x23a   : > { %p6523_p6 = scmp.ne.s32.totalorder %s9286_s5, %s6522_s10  ;;  %p6527_p10 = scmp.lt.s32.totalorder %s9286_s5, %s9343_s4 }
 0x23b   : > { %p6528_p11 = scmp.lt.s32.totalorder %s6526_s13, %s6522_s10 }
 0x23c   : > { %p6524_p7 = pnand %p6523_p6, %p6654_p4 }
 0x23d   : > { %p6529_p12 = por %p6528_p11, %p6527_p10 }
 0x23e   : > { %p6525_p9 = pneg %p6524_p7 }
 0x240   : > { %p6530_p13 = pnand %p6529_p12, %p6525_p9 }
 0x242   : > { %6533 = shalt.err (!%p6530_p13)
}
 0x243   : > { %s6587_s22 = smov 64   ;;  %s6588_s24 = smov 4  }
 0x244   : > { %6401 = dma.vmem_to_hbm [thread:$0]  (%p6654_p4), %s9288_s26, 2048, %s9286_s5, %s9294_s18, %s6587_s22, %s6587_s22, %s6588_s24  }
 0x245 PF: > { %p6407_p0 = scmp.ge.s32.totalorder %s6584_s20, 2  ;;  %s5105_s29 = sand.u32 1, %s6564_s15  }
 0x246   : > { %s5106_s30 = scalar_lea.sflag [#allocation3], %s5105_s29 }
 0x247   : > { %p6404_p1 = pnand %p6407_p0, %p6661_p8 }
 0x249   : > { %p6405_p2 = pneg %p6404_p1 }
 0x24b   : > { %6559 = dma.done.wait (%p6405_p2), %s5106_s30, 2048  }
 0x24c   : > { %6561 = vsyncadd (%p6405_p2), %s5106_s30, 4294965248  ;;  %s17_s20 = sadd.s32 1, %s6584_s20   ;;  %s9564_s15 = smov %s6568_s16 }
 0x24d   : > { %p14_p3 = scmp.ge.s32.totalorder %s17_s20, 4   ;;  %s9565_s16 = smov %s6572_s17 }
 0x24e   : > { %s9566_s17 = smov %s6667_s28  ;;  %s9567_s18 = smov %s6580_s19 }
 0x24f   : > { %s9568_s19 = smov %s9570_s23  ;;  %16 = sbr.rel (!%p14_p3) target bundleno = 4 (0x4), region = 91 }
 0x254   :  { %5111 = vsyncpa [#allocation3], 1 }
 0x255   :  { %5113 = vsyncpa [#allocation3 + $0x1], 1 }

</bundles_post_ra>
